<compile_context>
chip_gen: v5e
topology: v5e:2x2
jax: 0.10.0
libtpu: 0.0.40
codegen_flags: <defaults>
</compile_context>

<pallas_src>
import functools
import math

import jax
import jax.numpy as jnp
from jax.experimental import pallas as pl
from jax.experimental.pallas import tpu as pltpu

_VMEM_LIMIT_BYTES = 32 * 1024 * 1024   # explicit scoped-VMEM cap (safe on v5e/v6e/v7x)
_HEAD_PAD = 128                        # lane-pad the fused actor/critic head weight


def _round_up(x, m):
    return ((x + m - 1) // m) * m


# ----------------------------------------------------------------------------
# Layout helpers (XLA side; pure reshape/transpose, no data blow-up)
# ----------------------------------------------------------------------------
def _nchw_to_s2d_nhwc(x, s):
    """(B, C, H, W) -> (B, H//s, W//s, s*s*C), channel order (di*s + dj)*C + c."""
    B, C, H, W = x.shape
    assert H % s == 0 and W % s == 0
    x = x.reshape(B, C, H // s, s, W // s, s)
    x = x.transpose(0, 2, 4, 3, 5, 1)
    return x.reshape(B, H // s, W // s, s * s * C)


def _space_to_depth(x, s):
    """(B, H, W, C) -> (B, H//s, W//s, s*s*C), channel order (di*s + dj)*C + c."""
    if s == 1:
        return x
    B, H, W, C = x.shape
    assert H % s == 0 and W % s == 0
    x = x.reshape(B, H // s, s, W // s, s, C)
    x = x.transpose(0, 1, 3, 2, 4, 5)
    return x.reshape(B, H // s, W // s, s * s * C)


def _conv_weight_to_taps(w, stride):
    """PyTorch (O, C, kh, kw) conv weight -> (khp*kwp, stride*stride*C, O) taps
    matching the space-to-depth input layout (stride-1 equivalent conv)."""
    O, C, kh, kw = w.shape
    s = stride
    assert kh % s == 0 and kw % s == 0
    khp, kwp = kh // s, kw // s
    w2 = w.reshape(O, C, khp, s, kwp, s)
    w2 = w2.transpose(2, 4, 3, 5, 1, 0)            # (khp, kwp, s, s, C, O)
    w2 = w2.reshape(khp * kwp, s * s * C, O)
    return w2.astype(jnp.bfloat16), khp, kwp


# ----------------------------------------------------------------------------
# Conv kernel: stride-1 (space-to-depth'd) conv, whole image per grid step.
# Patch taps are gathered in VMEM with static slices -> no im2col in HBM.
# ----------------------------------------------------------------------------
def _conv_img_kernel(x_ref, w_ref, b_ref, o_ref, *, khp, kwp, Ho, Wo):
    """
    x_ref : (1, Hs, Ws, Cs)  bf16   full spatial slab of one batch element
    w_ref : (khp*kwp, Cs, O) bf16   per-tap weights
    b_ref : (1, O)           f32
    o_ref : (1, Ho, Wo, O)   bf16   full output of one batch element
    """
    O = o_ref.shape[-1]
    bias = b_ref[...]                              # hoisted out of the loops
    for ho in range(Ho):                           # static unroll (Ho <= 20)
        acc = jnp.zeros((Wo, O), jnp.float32)
        for ii in range(khp):
            row = x_ref[0, ho + ii, :, :]          # (Ws, Cs) bf16, static index
            for jj in range(kwp):
                acc = acc + jnp.dot(row[jj:jj + Wo, :],
                                    w_ref[ii * kwp + jj],
                                    preferred_element_type=jnp.float32)
        o_ref[0, ho, :, :] = jnp.maximum(acc + bias, 0.0).astype(o_ref.dtype)


def conv_s2d_relu(x, w_taps, b, khp, kwp):
    """x: (B, Hs, Ws, Cs) bf16 (space-to-depth'd, stride-1 layout).
    Returns (B, Ho, Wo, O) bf16 with Ho = Hs - khp + 1, Wo = Ws - kwp + 1."""
    B, Hs, Ws, Cs = x.shape
    T, _, O = w_taps.shape
    Ho, Wo = Hs - khp + 1, Ws - kwp + 1
    kernel = functools.partial(_conv_img_kernel, khp=khp, kwp=kwp, Ho=Ho, Wo=Wo)
    return pl.pallas_call(
        kernel,
        grid=(B,),
        out_shape=jax.ShapeDtypeStruct((B, Ho, Wo, O), jnp.bfloat16),
        in_specs=[
            pl.BlockSpec((1, Hs, Ws, Cs), lambda b: (b, 0, 0, 0)),
            pl.BlockSpec((T, Cs, O), lambda b: (0, 0, 0)),
            pl.BlockSpec((1, O), lambda b: (0, 0)),
        ],
        out_specs=pl.BlockSpec((1, Ho, Wo, O), lambda b: (b, 0, 0, 0)),
        compiler_params=pltpu.CompilerParams(
            dimension_semantics=("parallel",),
            vmem_limit_bytes=_VMEM_LIMIT_BYTES),
    )(x.astype(jnp.bfloat16), w_taps, b)


# ----------------------------------------------------------------------------
# Fused fc (1568->512, ReLU) + actor/critic head (512 -> [dist | critic | pad]).
# The (B, 512) feature tensor never leaves VMEM.
# ----------------------------------------------------------------------------
def _fc_head_kernel(flat_ref, fcw_ref, fcb_ref, hw_ref, hb_ref, noise_ref,
                    value_ref, action_ref, logp_ref, *, num_actions):
    A = num_actions

    # fc + ReLU (f32 accumulation / epilogue)
    feat = jnp.dot(flat_ref[...], fcw_ref[...], preferred_element_type=jnp.float32)
    feat = jnp.maximum(feat + fcb_ref[...], 0.0)

    # fused head matmul: cols [0, A) = logits, col A = critic value, rest 0-pad
    full = jnp.dot(feat.astype(jnp.bfloat16), hw_ref[...],
                   preferred_element_type=jnp.float32) + hb_ref[...]
    P = full.shape[-1]
    idx = jax.lax.broadcasted_iota(jnp.int32, full.shape, 1)
    valid = idx < A
    neg = jnp.float32(-1e30)

    # critic value
    value_ref[...] = full[:, A:A + 1]

    # stable log-softmax over the A real logits
    logits = jnp.where(valid, full, neg)
    m = jnp.max(logits, axis=-1, keepdims=True)
    z = logits - m
    lse = jnp.log(jnp.sum(jnp.exp(z), axis=-1, keepdims=True))
    logp = z - lse

    # action = argmax(logits + gumbel noise); noise == 0 -> distribution.mode()
    noisy = jnp.where(valid, full + noise_ref[...], neg)
    nmax = jnp.max(noisy, axis=-1, keepdims=True)
    action = jnp.min(jnp.where(noisy == nmax, idx, P), axis=-1, keepdims=True)
    action_ref[...] = action

    # log-prob of the chosen action (FixedCategorical.log_probs -> (B, 1))
    logp_ref[...] = jnp.sum(jnp.where(idx == action, logp, 0.0),
                            axis=-1, keepdims=True)


def pallas_fc_head(flat, fc_w, fc_b, head_w, head_b, noise, num_actions, tb=256):
    B, K = flat.shape
    Hf = fc_w.shape[1]
    P = head_w.shape[1]
    tb = min(tb, _round_up(B, 8))
    return pl.pallas_call(
        functools.partial(_fc_head_kernel, num_actions=num_actions),
        grid=(pl.cdiv(B, tb),),
        out_shape=(
            jax.ShapeDtypeStruct((B, 1), jnp.float32),   # value
            jax.ShapeDtypeStruct((B, 1), jnp.int32),     # action
            jax.ShapeDtypeStruct((B, 1), jnp.float32),   # action_log_probs
        ),
        in_specs=[
            pl.BlockSpec((tb, K), lambda i: (i, 0)),
            pl.BlockSpec((K, Hf), lambda i: (0, 0)),
            pl.BlockSpec((1, Hf), lambda i: (0, 0)),
            pl.BlockSpec((Hf, P), lambda i: (0, 0)),
            pl.BlockSpec((1, P), lambda i: (0, 0)),
            pl.BlockSpec((tb, P), lambda i: (i, 0)),
        ],
        out_specs=(
            pl.BlockSpec((tb, 1), lambda i: (i, 0)),
            pl.BlockSpec((tb, 1), lambda i: (i, 0)),
            pl.BlockSpec((tb, 1), lambda i: (i, 0)),
        ),
        compiler_params=pltpu.CompilerParams(
            dimension_semantics=("parallel",),
            vmem_limit_bytes=_VMEM_LIMIT_BYTES),
    )(flat.astype(jnp.bfloat16), fc_w, fc_b, head_w, head_b, noise)


# ----------------------------------------------------------------------------
# Policy (CNNBase + Categorical), non-recurrent
# ----------------------------------------------------------------------------
class PallasPolicy:
    def __init__(self, observation_shape, action_space, recurrent_policy, key):
        assert not recurrent_policy  # TODO(synk): GRUCell recurrent path not implemented
        C = observation_shape[0]
        A = int(action_space)
        assert A + 1 <= _HEAD_PAD
        self.num_actions = A
        self.state_size = 1

        ks = jax.random.split(key, 12)

        def init_w(k, shape, fan_in):
            return jax.random.normal(k, shape, jnp.float32) * math.sqrt(2.0 / fan_in)

        def init_b(k, shape):
            return 0.05 * jax.random.normal(k, shape, jnp.float32)

        # ---- parameters in PyTorch layout (reference / checkpoint layout) ----
        c1_w, c1_b = init_w(ks[0], (32, C, 8, 8), C * 64), init_b(ks[1], (32,))
        c2_w, c2_b = init_w(ks[2], (64, 32, 4, 4), 32 * 16), init_b(ks[3], (64,))
        c3_w, c3_b = init_w(ks[4], (32, 64, 3, 3), 64 * 9), init_b(ks[5], (32,))
        fc_w = init_w(ks[6], (32 * 7 * 7, 512), 32 * 7 * 7)       # stored (in, out)
        fc_b = init_b(ks[7], (512,))
        critic_w, critic_b = init_w(ks[8], (512, 1), 512), init_b(ks[9], (1,))
        dist_w, dist_b = init_w(ks[10], (512, A), 512), init_b(ks[11], (A,))
        self.ref_params = dict(c1_w=c1_w, c1_b=c1_b, c2_w=c2_w, c2_b=c2_b,
                               c3_w=c3_w, c3_b=c3_b, fc_w=fc_w, fc_b=fc_b,
                               critic_w=critic_w, critic_b=critic_b,
                               dist_w=dist_w, dist_b=dist_b)

        # ---- kernel-layout parameters ----
        self.c1_stride, self.c2_stride, self.c3_stride = 4, 2, 1
        # /255 normalization folded into conv1 weights (no separate XLA pass)
        self.c1_taps, self.c1_khp, self.c1_kwp = _conv_weight_to_taps(c1_w / 255.0, 4)
        self.c2_taps, self.c2_khp, self.c2_kwp = _conv_weight_to_taps(c2_w, 2)
        self.c3_taps, self.c3_khp, self.c3_kwp = _conv_weight_to_taps(c3_w, 1)
        self.c1_bias = c1_b.reshape(1, -1)
        self.c2_bias = c2_b.reshape(1, -1)
        self.c3_bias = c3_b.reshape(1, -1)

        # fc: activations are kept NHWC, so permute the NCHW-flatten rows once.
        fc_w_nhwc = (fc_w.reshape(32, 7, 7, 512)
                     .transpose(1, 2, 0, 3).reshape(32 * 7 * 7, 512))
        self.fc_w = fc_w_nhwc.astype(jnp.bfloat16)
        self.fc_b = fc_b.reshape(1, -1)

        # fused head: cols [0, A) = dist logits, col A = critic value, rest 0-pad
        head_w = jnp.zeros((512, _HEAD_PAD), jnp.float32)
        head_w = head_w.at[:, :A].set(dist_w).at[:, A].set(critic_w[:, 0])
        head_b = jnp.zeros((1, _HEAD_PAD), jnp.float32)
        head_b = head_b.at[0, :A].set(dist_b).at[0, A].set(critic_b[0])
        self.head_w = head_w.astype(jnp.bfloat16)
        self.head_b = head_b

    # CNNBase conv stack (non-recurrent), NHWC bf16 activations; returns the
    # NHWC flatten that feeds the fused fc+head kernel.
    def _features_flat(self, inputs):
        x = _nchw_to_s2d_nhwc(inputs.astype(jnp.bfloat16), self.c1_stride)
        x = conv_s2d_relu(x, self.c1_taps, self.c1_bias, self.c1_khp, self.c1_kwp)
        x = conv_s2d_relu(_space_to_depth(x, self.c2_stride),
                          self.c2_taps, self.c2_bias, self.c2_khp, self.c2_kwp)
        x = conv_s2d_relu(_space_to_depth(x, self.c3_stride),
                          self.c3_taps, self.c3_bias, self.c3_khp, self.c3_kwp)
        # TODO(synk): conv3 could also be folded into the fc kernel (keep the
        # 9x9x64 slab in VMEM); left as follow-up since the HBM traffic saved
        # is only B*3 KiB.
        return x.reshape(x.shape[0], -1)        # NHWC flatten (fc_w rows permuted)

    def act(self, inputs, states, masks, deterministic=False, key=None):
        del masks  # unused in the non-recurrent CNNBase
        flat = self._features_flat(inputs)
        B = flat.shape[0]
        if deterministic or key is None:
            noise = jnp.zeros((B, _HEAD_PAD), jnp.float32)
        else:
            g = jax.random.gumbel(key, (B, self.num_actions), jnp.float32)
            noise = jnp.pad(g, ((0, 0), (0, _HEAD_PAD - self.num_actions)))
        value, action, action_log_probs = pallas_fc_head(
            flat, self.fc_w, self.fc_b, self.head_w, self.head_b,
            noise, self.num_actions)
        return value, action, action_log_probs, states

    def get_value(self, inputs, states, masks):
        value, _, _, _ = self.act(inputs, states, masks, deterministic=True)
        return value

    # TODO(synk): evaluate_actions (entropy + given-action log-probs) not implemented.


# ----------------------------------------------------------------------------
# Pure-JAX f32 reference (PyTorch-layout weights) for numeric cross-checking.
# ----------------------------------------------------------------------------
def reference_value_and_logsoftmax(params, obs):
    x = obs.astype(jnp.float32) / 255.0

    def conv(x, w, b, s):
        y = jax.lax.conv_general_dilated(
            x, w, (s, s), "VALID", dimension_numbers=("NCHW", "OIHW", "NCHW"))
        return jax.nn.relu(y + b[None, :, None, None])

    x = conv(x, params["c1_w"], params["c1_b"], 4)
    x = conv(x, params["c2_w"], params["c2_b"], 2)
    x = conv(x, params["c3_w"], params["c3_b"], 1)
    flat = x.reshape(x.shape[0], -1)                       # torch NCHW flatten
    feat = jax.nn.relu(flat @ params["fc_w"] + params["fc_b"])
    value = feat @ params["critic_w"] + params["critic_b"]
    logits = feat @ params["dist_w"] + params["dist_b"]
    return value, jax.nn.log_softmax(logits, axis=-1)


# ----------------------------------------------------------------------------
if __name__ == "__main__":
    key = jax.random.PRNGKey(0)
    k_param, k_obs, k_sample = jax.random.split(key, 3)

    # Atari-style observation implied by CNNBase (32*7*7 fc input): (4, 84, 84).
    B, C, H, W = 2, 4, 84, 84
    A = 6
    obs = jax.random.uniform(k_obs, (B, C, H, W), jnp.float32, 0.0, 255.0)
    states = jnp.zeros((B, 1), jnp.float32)
    masks = jnp.ones((B, 1), jnp.float32)

    policy = PallasPolicy((C, H, W), A, recurrent_policy=False, key=k_param)

    # deterministic (mode) and stochastic (gumbel-max sample) paths
    value, action, logp, out_states = policy.act(obs, states, masks,
                                                 deterministic=True)
    value_s, action_s, logp_s, _ = policy.act(obs, states, masks,
                                              deterministic=False, key=k_sample)
    jax.block_until_ready((value, action, logp, out_states,
                           value_s, action_s, logp_s))

    # shape / dtype / range checks
    assert value.shape == (B, 1) and value.dtype == jnp.float32
    assert action.shape == (B, 1) and action.dtype == jnp.int32
    assert logp.shape == (B, 1)
    assert bool(jnp.all((action >= 0) & (action < A)))
    assert bool(jnp.all((action_s >= 0) & (action_s < A)))
    assert bool(jnp.all(logp <= 1e-5)) and bool(jnp.all(logp_s <= 1e-5))
    assert out_states.shape == states.shape

    # numeric cross-check against a pure-JAX f32 reference of the same network
    ref_value, ref_logp_all = reference_value_and_logsoftmax(policy.ref_params, obs)
    assert bool(jnp.allclose(value, ref_value, rtol=0.1, atol=0.05))
    ref_logp_at = jnp.take_along_axis(ref_logp_all, action, axis=1)
    assert bool(jnp.allclose(logp, ref_logp_at, rtol=0.1, atol=0.05))
    ref_logp_at_s = jnp.take_along_axis(ref_logp_all, action_s, axis=1)
    assert bool(jnp.allclose(logp_s, ref_logp_at_s, rtol=0.1, atol=0.05))

    print("KERNEL_OK")
</pallas_src>

<mosaic_0001>
module attributes {stable_mosaic.version = 11 : i64} {
  func.func @_conv_img_kernel(%arg0: i32, %arg1: memref<1x21x21x64xbf16, #tpu.memory_space<vmem>>, %arg2: memref<4x64x32xbf16, #tpu.memory_space<vmem>>, %arg3: memref<1x32xf32, #tpu.memory_space<vmem>>, %arg4: memref<1x20x20x32xbf16, #tpu.memory_space<vmem>>) attributes {dimension_semantics = [#tpu.dimension_semantics<parallel>], iteration_bounds = array<i64: 2>, scalar_prefetch = 0 : i64, scratch_operands = 0 : i64, tpu.core_type = #tpu.core_type<tc>, window_params = [{transform_indices = @transform_0, window_bounds = array<i64: 1, 21, 21, 64>}, {pipeline_mode = #tpu.pipeline_mode<synchronous>, transform_indices = @transform_1, window_bounds = array<i64: 4, 64, 32>}, {pipeline_mode = #tpu.pipeline_mode<synchronous>, transform_indices = @transform_2, window_bounds = array<i64: 1, 32>}, {transform_indices = @transform_3, window_bounds = array<i64: 1, 20, 20, 32>}]} {
    %c0 = arith.constant 0 : index
    %c0_0 = arith.constant 0 : index
    %0 = vector.load %arg3[%c0, %c0_0] : memref<1x32xf32, #tpu.memory_space<vmem>>, vector<1x32xf32>
    %cst = arith.constant 0.000000e+00 : f32
    %1 = vector.broadcast %cst : f32 to vector<20x32xf32>
    %c0_1 = arith.constant 0 : index
    %c0_2 = arith.constant 0 : index
    %c0_3 = arith.constant 0 : index
    %c0_4 = arith.constant 0 : index
    %2 = vector.load %arg1[%c0_1, %c0_2, %c0_3, %c0_4] : memref<1x21x21x64xbf16, #tpu.memory_space<vmem>>, vector<1x1x21x64xbf16>
    %3 = vector.shape_cast %2 : vector<1x1x21x64xbf16> to vector<21x64xbf16>
    %4 = vector.extract_strided_slice %3 {offsets = [0, 0], sizes = [20, 64], strides = [1, 1]} : vector<21x64xbf16> to vector<20x64xbf16>
    %c0_5 = arith.constant 0 : index
    %c0_6 = arith.constant 0 : index
    %c0_7 = arith.constant 0 : index
    %5 = vector.load %arg2[%c0_5, %c0_6, %c0_7] : memref<4x64x32xbf16, #tpu.memory_space<vmem>>, vector<1x64x32xbf16>
    %6 = vector.shape_cast %5 : vector<1x64x32xbf16> to vector<64x32xbf16>
    %cst_8 = arith.constant dense<0.000000e+00> : vector<20x32xf32>
    %7 = tpu.matmul %4, %6, %cst_8 {dimension_numbers = #tpu.dot_dimension_numbers<[1], [0], [0], [1], [0, 0, 1, 1], [], []>} : vector<20x64xbf16>, vector<64x32xbf16>, vector<20x32xf32> -> vector<20x32xf32>
    %8 = arith.addf %1, %7 : vector<20x32xf32>
    %9 = vector.extract_strided_slice %3 {offsets = [1, 0], sizes = [20, 64], strides = [1, 1]} : vector<21x64xbf16> to vector<20x64xbf16>
    %c1 = arith.constant 1 : index
    %c0_9 = arith.constant 0 : index
    %c0_10 = arith.constant 0 : index
    %10 = vector.load %arg2[%c1, %c0_9, %c0_10] : memref<4x64x32xbf16, #tpu.memory_space<vmem>>, vector<1x64x32xbf16>
    %11 = vector.shape_cast %10 : vector<1x64x32xbf16> to vector<64x32xbf16>
    %cst_11 = arith.constant dense<0.000000e+00> : vector<20x32xf32>
    %12 = tpu.matmul %9, %11, %cst_11 {dimension_numbers = #tpu.dot_dimension_numbers<[1], [0], [0], [1], [0, 0, 1, 1], [], []>} : vector<20x64xbf16>, vector<64x32xbf16>, vector<20x32xf32> -> vector<20x32xf32>
    %13 = arith.addf %8, %12 : vector<20x32xf32>
    %c0_12 = arith.constant 0 : index
    %c1_13 = arith.constant 1 : index
    %c0_14 = arith.constant 0 : index
    %c0_15 = arith.constant 0 : index
    %14 = vector.load %arg1[%c0_12, %c1_13, %c0_14, %c0_15] : memref<1x21x21x64xbf16, #tpu.memory_space<vmem>>, vector<1x1x21x64xbf16>
    %15 = vector.shape_cast %14 : vector<1x1x21x64xbf16> to vector<21x64xbf16>
    %16 = vector.extract_strided_slice %15 {offsets = [0, 0], sizes = [20, 64], strides = [1, 1]} : vector<21x64xbf16> to vector<20x64xbf16>
    %c2 = arith.constant 2 : index
    %c0_16 = arith.constant 0 : index
    %c0_17 = arith.constant 0 : index
    %17 = vector.load %arg2[%c2, %c0_16, %c0_17] : memref<4x64x32xbf16, #tpu.memory_space<vmem>>, vector<1x64x32xbf16>
    %18 = vector.shape_cast %17 : vector<1x64x32xbf16> to vector<64x32xbf16>
    %cst_18 = arith.constant dense<0.000000e+00> : vector<20x32xf32>
    %19 = tpu.matmul %16, %18, %cst_18 {dimension_numbers = #tpu.dot_dimension_numbers<[1], [0], [0], [1], [0, 0, 1, 1], [], []>} : vector<20x64xbf16>, vector<64x32xbf16>, vector<20x32xf32> -> vector<20x32xf32>
    %20 = arith.addf %13, %19 : vector<20x32xf32>
    %21 = vector.extract_strided_slice %15 {offsets = [1, 0], sizes = [20, 64], strides = [1, 1]} : vector<21x64xbf16> to vector<20x64xbf16>
    %c3 = arith.constant 3 : index
    %c0_19 = arith.constant 0 : index
    %c0_20 = arith.constant 0 : index
    %22 = vector.load %arg2[%c3, %c0_19, %c0_20] : memref<4x64x32xbf16, #tpu.memory_space<vmem>>, vector<1x64x32xbf16>
    %23 = vector.shape_cast %22 : vector<1x64x32xbf16> to vector<64x32xbf16>
    %cst_21 = arith.constant dense<0.000000e+00> : vector<20x32xf32>
    %24 = tpu.matmul %21, %23, %cst_21 {dimension_numbers = #tpu.dot_dimension_numbers<[1], [0], [0], [1], [0, 0, 1, 1], [], []>} : vector<20x64xbf16>, vector<64x32xbf16>, vector<20x32xf32> -> vector<20x32xf32>
    %25 = arith.addf %20, %24 : vector<20x32xf32>
    %26 = vector.broadcast %0 : vector<1x32xf32> to vector<20x32xf32>
    %27 = arith.addf %25, %26 : vector<20x32xf32>
    %cst_22 = arith.constant 0.000000e+00 : f32
    %28 = vector.broadcast %cst_22 : f32 to vector<20x32xf32>
    %29 = arith.maximumf %27, %28 : vector<20x32xf32>
    %30 = arith.truncf %29 : vector<20x32xf32> to vector<20x32xbf16>
    %c0_23 = arith.constant 0 : index
    %c0_24 = arith.constant 0 : index
    %c0_25 = arith.constant 0 : index
    %c0_26 = arith.constant 0 : index
    %31 = vector.load %arg4[%c0_23, %c0_24, %c0_25, %c0_26] : memref<1x20x20x32xbf16, #tpu.memory_space<vmem>>, vector<1x1x20x32xbf16>
    %32 = vector.shape_cast %31 : vector<1x1x20x32xbf16> to vector<20x32xbf16>
    %33 = vector.shape_cast %30 : vector<20x32xbf16> to vector<1x1x20x32xbf16>
    tpu.vector_store %arg4[%c0_23, %c0_24, %c0_25, %c0_26], %33 {strides = array<i32>} : memref<1x20x20x32xbf16, #tpu.memory_space<vmem>>, vector<1x1x20x32xbf16>,
    %cst_27 = arith.constant 0.000000e+00 : f32
    %34 = vector.broadcast %cst_27 : f32 to vector<20x32xf32>
    %c0_28 = arith.constant 0 : index
    %c1_29 = arith.constant 1 : index
    %c0_30 = arith.constant 0 : index
    %c0_31 = arith.constant 0 : index
    %35 = vector.load %arg1[%c0_28, %c1_29, %c0_30, %c0_31] : memref<1x21x21x64xbf16, #tpu.memory_space<vmem>>, vector<1x1x21x64xbf16>
    %36 = vector.shape_cast %35 : vector<1x1x21x64xbf16> to vector<21x64xbf16>
    %37 = vector.extract_strided_slice %36 {offsets = [0, 0], sizes = [20, 64], strides = [1, 1]} : vector<21x64xbf16> to vector<20x64xbf16>
    %c0_32 = arith.constant 0 : index
    %c0_33 = arith.constant 0 : index
    %c0_34 = arith.constant 0 : index
    %38 = vector.load %arg2[%c0_32, %c0_33, %c0_34] : memref<4x64x32xbf16, #tpu.memory_space<vmem>>, vector<1x64x32xbf16>
    %39 = vector.shape_cast %38 : vector<1x64x32xbf16> to vector<64x32xbf16>
    %cst_35 = arith.constant dense<0.000000e+00> : vector<20x32xf32>
    %40 = tpu.matmul %37, %39, %cst_35 {dimension_numbers = #tpu.dot_dimension_numbers<[1], [0], [0], [1], [0, 0, 1, 1], [], []>} : vector<20x64xbf16>, vector<64x32xbf16>, vector<20x32xf32> -> vector<20x32xf32>
    %41 = arith.addf %34, %40 : vector<20x32xf32>
    %42 = vector.extract_strided_slice %36 {offsets = [1, 0], sizes = [20, 64], strides = [1, 1]} : vector<21x64xbf16> to vector<20x64xbf16>
    %c1_36 = arith.constant 1 : index
    %c0_37 = arith.constant 0 : index
    %c0_38 = arith.constant 0 : index
    %43 = vector.load %arg2[%c1_36, %c0_37, %c0_38] : memref<4x64x32xbf16, #tpu.memory_space<vmem>>, vector<1x64x32xbf16>
    %44 = vector.shape_cast %43 : vector<1x64x32xbf16> to vector<64x32xbf16>
    %cst_39 = arith.constant dense<0.000000e+00> : vector<20x32xf32>
    %45 = tpu.matmul %42, %44, %cst_39 {dimension_numbers = #tpu.dot_dimension_numbers<[1], [0], [0], [1], [0, 0, 1, 1], [], []>} : vector<20x64xbf16>, vector<64x32xbf16>, vector<20x32xf32> -> vector<20x32xf32>
    %46 = arith.addf %41, %45 : vector<20x32xf32>
    %c0_40 = arith.constant 0 : index
    %c2_41 = arith.constant 2 : index
    %c0_42 = arith.constant 0 : index
    %c0_43 = arith.constant 0 : index
    %47 = vector.load %arg1[%c0_40, %c2_41, %c0_42, %c0_43] : memref<1x21x21x64xbf16, #tpu.memory_space<vmem>>, vector<1x1x21x64xbf16>
    %48 = vector.shape_cast %47 : vector<1x1x21x64xbf16> to vector<21x64xbf16>
    %49 = vector.extract_strided_slice %48 {offsets = [0, 0], sizes = [20, 64], strides = [1, 1]} : vector<21x64xbf16> to vector<20x64xbf16>
    %c2_44 = arith.constant 2 : index
    %c0_45 = arith.constant 0 : index
    %c0_46 = arith.constant 0 : index
    %50 = vector.load %arg2[%c2_44, %c0_45, %c0_46] : memref<4x64x32xbf16, #tpu.memory_space<vmem>>, vector<1x64x32xbf16>
    %51 = vector.shape_cast %50 : vector<1x64x32xbf16> to vector<64x32xbf16>
    %cst_47 = arith.constant dense<0.000000e+00> : vector<20x32xf32>
    %52 = tpu.matmul %49, %51, %cst_47 {dimension_numbers = #tpu.dot_dimension_numbers<[1], [0], [0], [1], [0, 0, 1, 1], [], []>} : vector<20x64xbf16>, vector<64x32xbf16>, vector<20x32xf32> -> vector<20x32xf32>
    %53 = arith.addf %46, %52 : vector<20x32xf32>
    %54 = vector.extract_strided_slice %48 {offsets = [1, 0], sizes = [20, 64], strides = [1, 1]} : vector<21x64xbf16> to vector<20x64xbf16>
    %c3_48 = arith.constant 3 : index
    %c0_49 = arith.constant 0 : index
    %c0_50 = arith.constant 0 : index
    %55 = vector.load %arg2[%c3_48, %c0_49, %c0_50] : memref<4x64x32xbf16, #tpu.memory_space<vmem>>, vector<1x64x32xbf16>
    %56 = vector.shape_cast %55 : vector<1x64x32xbf16> to vector<64x32xbf16>
    %cst_51 = arith.constant dense<0.000000e+00> : vector<20x32xf32>
    %57 = tpu.matmul %54, %56, %cst_51 {dimension_numbers = #tpu.dot_dimension_numbers<[1], [0], [0], [1], [0, 0, 1, 1], [], []>} : vector<20x64xbf16>, vector<64x32xbf16>, vector<20x32xf32> -> vector<20x32xf32>
    %58 = arith.addf %53, %57 : vector<20x32xf32>
    %59 = vector.broadcast %0 : vector<1x32xf32> to vector<20x32xf32>
    %60 = arith.addf %58, %59 : vector<20x32xf32>
    %cst_52 = arith.constant 0.000000e+00 : f32
    %61 = vector.broadcast %cst_52 : f32 to vector<20x32xf32>
    %62 = arith.maximumf %60, %61 : vector<20x32xf32>
    %63 = arith.truncf %62 : vector<20x32xf32> to vector<20x32xbf16>
    %c0_53 = arith.constant 0 : index
    %c1_54 = arith.constant 1 : index
    %c0_55 = arith.constant 0 : index
    %c0_56 = arith.constant 0 : index
    %64 = vector.load %arg4[%c0_53, %c1_54, %c0_55, %c0_56] : memref<1x20x20x32xbf16, #tpu.memory_space<vmem>>, vector<1x1x20x32xbf16>
    %65 = vector.shape_cast %64 : vector<1x1x20x32xbf16> to vector<20x32xbf16>
    %66 = vector.shape_cast %63 : vector<20x32xbf16> to vector<1x1x20x32xbf16>
    tpu.vector_store %arg4[%c0_53, %c1_54, %c0_55, %c0_56], %66 {strides = array<i32>} : memref<1x20x20x32xbf16, #tpu.memory_space<vmem>>, vector<1x1x20x32xbf16>,
    %cst_57 = arith.constant 0.000000e+00 : f32
    %67 = vector.broadcast %cst_57 : f32 to vector<20x32xf32>
    %c0_58 = arith.constant 0 : index
    %c2_59 = arith.constant 2 : index
    %c0_60 = arith.constant 0 : index
    %c0_61 = arith.constant 0 : index
    %68 = vector.load %arg1[%c0_58, %c2_59, %c0_60, %c0_61] : memref<1x21x21x64xbf16, #tpu.memory_space<vmem>>, vector<1x1x21x64xbf16>
    %69 = vector.shape_cast %68 : vector<1x1x21x64xbf16> to vector<21x64xbf16>
    %70 = vector.extract_strided_slice %69 {offsets = [0, 0], sizes = [20, 64], strides = [1, 1]} : vector<21x64xbf16> to vector<20x64xbf16>
    %c0_62 = arith.constant 0 : index
    %c0_63 = arith.constant 0 : index
    %c0_64 = arith.constant 0 : index
    %71 = vector.load %arg2[%c0_62, %c0_63, %c0_64] : memref<4x64x32xbf16, #tpu.memory_space<vmem>>, vector<1x64x32xbf16>
    %72 = vector.shape_cast %71 : vector<1x64x32xbf16> to vector<64x32xbf16>
    %cst_65 = arith.constant dense<0.000000e+00> : vector<20x32xf32>
    %73 = tpu.matmul %70, %72, %cst_65 {dimension_numbers = #tpu.dot_dimension_numbers<[1], [0], [0], [1], [0, 0, 1, 1], [], []>} : vector<20x64xbf16>, vector<64x32xbf16>, vector<20x32xf32> -> vector<20x32xf32>
    %74 = arith.addf %67, %73 : vector<20x32xf32>
    %75 = vector.extract_strided_slice %69 {offsets = [1, 0], sizes = [20, 64], strides = [1, 1]} : vector<21x64xbf16> to vector<20x64xbf16>
    %c1_66 = arith.constant 1 : index
    %c0_67 = arith.constant 0 : index
    %c0_68 = arith.constant 0 : index
    %76 = vector.load %arg2[%c1_66, %c0_67, %c0_68] : memref<4x64x32xbf16, #tpu.memory_space<vmem>>, vector<1x64x32xbf16>
    %77 = vector.shape_cast %76 : vector<1x64x32xbf16> to vector<64x32xbf16>
    %cst_69 = arith.constant dense<0.000000e+00> : vector<20x32xf32>
    %78 = tpu.matmul %75, %77, %cst_69 {dimension_numbers = #tpu.dot_dimension_numbers<[1], [0], [0], [1], [0, 0, 1, 1], [], []>} : vector<20x64xbf16>, vector<64x32xbf16>, vector<20x32xf32> -> vector<20x32xf32>
    %79 = arith.addf %74, %78 : vector<20x32xf32>
    %c0_70 = arith.constant 0 : index
    %c3_71 = arith.constant 3 : index
    %c0_72 = arith.constant 0 : index
    %c0_73 = arith.constant 0 : index
    %80 = vector.load %arg1[%c0_70, %c3_71, %c0_72, %c0_73] : memref<1x21x21x64xbf16, #tpu.memory_space<vmem>>, vector<1x1x21x64xbf16>
    %81 = vector.shape_cast %80 : vector<1x1x21x64xbf16> to vector<21x64xbf16>
    %82 = vector.extract_strided_slice %81 {offsets = [0, 0], sizes = [20, 64], strides = [1, 1]} : vector<21x64xbf16> to vector<20x64xbf16>
    %c2_74 = arith.constant 2 : index
    %c0_75 = arith.constant 0 : index
    %c0_76 = arith.constant 0 : index
    %83 = vector.load %arg2[%c2_74, %c0_75, %c0_76] : memref<4x64x32xbf16, #tpu.memory_space<vmem>>, vector<1x64x32xbf16>
    %84 = vector.shape_cast %83 : vector<1x64x32xbf16> to vector<64x32xbf16>
    %cst_77 = arith.constant dense<0.000000e+00> : vector<20x32xf32>
    %85 = tpu.matmul %82, %84, %cst_77 {dimension_numbers = #tpu.dot_dimension_numbers<[1], [0], [0], [1], [0, 0, 1, 1], [], []>} : vector<20x64xbf16>, vector<64x32xbf16>, vector<20x32xf32> -> vector<20x32xf32>
    %86 = arith.addf %79, %85 : vector<20x32xf32>
    %87 = vector.extract_strided_slice %81 {offsets = [1, 0], sizes = [20, 64], strides = [1, 1]} : vector<21x64xbf16> to vector<20x64xbf16>
    %c3_78 = arith.constant 3 : index
    %c0_79 = arith.constant 0 : index
    %c0_80 = arith.constant 0 : index
    %88 = vector.load %arg2[%c3_78, %c0_79, %c0_80] : memref<4x64x32xbf16, #tpu.memory_space<vmem>>, vector<1x64x32xbf16>
    %89 = vector.shape_cast %88 : vector<1x64x32xbf16> to vector<64x32xbf16>
    %cst_81 = arith.constant dense<0.000000e+00> : vector<20x32xf32>
    %90 = tpu.matmul %87, %89, %cst_81 {dimension_numbers = #tpu.dot_dimension_numbers<[1], [0], [0], [1], [0, 0, 1, 1], [], []>} : vector<20x64xbf16>, vector<64x32xbf16>, vector<20x32xf32> -> vector<20x32xf32>
    %91 = arith.addf %86, %90 : vector<20x32xf32>
    %92 = vector.broadcast %0 : vector<1x32xf32> to vector<20x32xf32>
    %93 = arith.addf %91, %92 : vector<20x32xf32>
    %cst_82 = arith.constant 0.000000e+00 : f32
    %94 = vector.broadcast %cst_82 : f32 to vector<20x32xf32>
    %95 = arith.maximumf %93, %94 : vector<20x32xf32>
    %96 = arith.truncf %95 : vector<20x32xf32> to vector<20x32xbf16>
    %c0_83 = arith.constant 0 : index
    %c2_84 = arith.constant 2 : index
    %c0_85 = arith.constant 0 : index
    %c0_86 = arith.constant 0 : index
    %97 = vector.load %arg4[%c0_83, %c2_84, %c0_85, %c0_86] : memref<1x20x20x32xbf16, #tpu.memory_space<vmem>>, vector<1x1x20x32xbf16>
    %98 = vector.shape_cast %97 : vector<1x1x20x32xbf16> to vector<20x32xbf16>
    %99 = vector.shape_cast %96 : vector<20x32xbf16> to vector<1x1x20x32xbf16>
    tpu.vector_store %arg4[%c0_83, %c2_84, %c0_85, %c0_86], %99 {strides = array<i32>} : memref<1x20x20x32xbf16, #tpu.memory_space<vmem>>, vector<1x1x20x32xbf16>,
    %cst_87 = arith.constant 0.000000e+00 : f32
    %100 = vector.broadcast %cst_87 : f32 to vector<20x32xf32>
    %c0_88 = arith.constant 0 : index
    %c3_89 = arith.constant 3 : index
    %c0_90 = arith.constant 0 : index
    %c0_91 = arith.constant 0 : index
    %101 = vector.load %arg1[%c0_88, %c3_89, %c0_90, %c0_91] : memref<1x21x21x64xbf16, #tpu.memory_space<vmem>>, vector<1x1x21x64xbf16>
    %102 = vector.shape_cast %101 : vector<1x1x21x64xbf16> to vector<21x64xbf16>
    %103 = vector.extract_strided_slice %102 {offsets = [0, 0], sizes = [20, 64], strides = [1, 1]} : vector<21x64xbf16> to vector<20x64xbf16>
    %c0_92 = arith.constant 0 : index
    %c0_93 = arith.constant 0 : index
    %c0_94 = arith.constant 0 : index
    %104 = vector.load %arg2[%c0_92, %c0_93, %c0_94] : memref<4x64x32xbf16, #tpu.memory_space<vmem>>, vector<1x64x32xbf16>
    %105 = vector.shape_cast %104 : vector<1x64x32xbf16> to vector<64x32xbf16>
    %cst_95 = arith.constant dense<0.000000e+00> : vector<20x32xf32>
    %106 = tpu.matmul %103, %105, %cst_95 {dimension_numbers = #tpu.dot_dimension_numbers<[1], [0], [0], [1], [0, 0, 1, 1], [], []>} : vector<20x64xbf16>, vector<64x32xbf16>, vector<20x32xf32> -> vector<20x32xf32>
    %107 = arith.addf %100, %106 : vector<20x32xf32>
    %108 = vector.extract_strided_slice %102 {offsets = [1, 0], sizes = [20, 64], strides = [1, 1]} : vector<21x64xbf16> to vector<20x64xbf16>
    %c1_96 = arith.constant 1 : index
    %c0_97 = arith.constant 0 : index
    %c0_98 = arith.constant 0 : index
    %109 = vector.load %arg2[%c1_96, %c0_97, %c0_98] : memref<4x64x32xbf16, #tpu.memory_space<vmem>>, vector<1x64x32xbf16>
    %110 = vector.shape_cast %109 : vector<1x64x32xbf16> to vector<64x32xbf16>
    %cst_99 = arith.constant dense<0.000000e+00> : vector<20x32xf32>
    %111 = tpu.matmul %108, %110, %cst_99 {dimension_numbers = #tpu.dot_dimension_numbers<[1], [0], [0], [1], [0, 0, 1, 1], [], []>} : vector<20x64xbf16>, vector<64x32xbf16>, vector<20x32xf32> -> vector<20x32xf32>
    %112 = arith.addf %107, %111 : vector<20x32xf32>
    %c0_100 = arith.constant 0 : index
    %c4 = arith.constant 4 : index
    %c0_101 = arith.constant 0 : index
    %c0_102 = arith.constant 0 : index
    %113 = vector.load %arg1[%c0_100, %c4, %c0_101, %c0_102] : memref<1x21x21x64xbf16, #tpu.memory_space<vmem>>, vector<1x1x21x64xbf16>
    %114 = vector.shape_cast %113 : vector<1x1x21x64xbf16> to vector<21x64xbf16>
    %115 = vector.extract_strided_slice %114 {offsets = [0, 0], sizes = [20, 64], strides = [1, 1]} : vector<21x64xbf16> to vector<20x64xbf16>
    %c2_103 = arith.constant 2 : index
    %c0_104 = arith.constant 0 : index
    %c0_105 = arith.constant 0 : index
    %116 = vector.load %arg2[%c2_103, %c0_104, %c0_105] : memref<4x64x32xbf16, #tpu.memory_space<vmem>>, vector<1x64x32xbf16>
    %117 = vector.shape_cast %116 : vector<1x64x32xbf16> to vector<64x32xbf16>
    %cst_106 = arith.constant dense<0.000000e+00> : vector<20x32xf32>
    %118 = tpu.matmul %115, %117, %cst_106 {dimension_numbers = #tpu.dot_dimension_numbers<[1], [0], [0], [1], [0, 0, 1, 1], [], []>} : vector<20x64xbf16>, vector<64x32xbf16>, vector<20x32xf32> -> vector<20x32xf32>
    %119 = arith.addf %112, %118 : vector<20x32xf32>
    %120 = vector.extract_strided_slice %114 {offsets = [1, 0], sizes = [20, 64], strides = [1, 1]} : vector<21x64xbf16> to vector<20x64xbf16>
    %c3_107 = arith.constant 3 : index
    %c0_108 = arith.constant 0 : index
    %c0_109 = arith.constant 0 : index
    %121 = vector.load %arg2[%c3_107, %c0_108, %c0_109] : memref<4x64x32xbf16, #tpu.memory_space<vmem>>, vector<1x64x32xbf16>
    %122 = vector.shape_cast %121 : vector<1x64x32xbf16> to vector<64x32xbf16>
    %cst_110 = arith.constant dense<0.000000e+00> : vector<20x32xf32>
    %123 = tpu.matmul %120, %122, %cst_110 {dimension_numbers = #tpu.dot_dimension_numbers<[1], [0], [0], [1], [0, 0, 1, 1], [], []>} : vector<20x64xbf16>, vector<64x32xbf16>, vector<20x32xf32> -> vector<20x32xf32>
    %124 = arith.addf %119, %123 : vector<20x32xf32>
    %125 = vector.broadcast %0 : vector<1x32xf32> to vector<20x32xf32>
    %126 = arith.addf %124, %125 : vector<20x32xf32>
    %cst_111 = arith.constant 0.000000e+00 : f32
    %127 = vector.broadcast %cst_111 : f32 to vector<20x32xf32>
    %128 = arith.maximumf %126, %127 : vector<20x32xf32>
    %129 = arith.truncf %128 : vector<20x32xf32> to vector<20x32xbf16>
    %c0_112 = arith.constant 0 : index
    %c3_113 = arith.constant 3 : index
    %c0_114 = arith.constant 0 : index
    %c0_115 = arith.constant 0 : index
    %130 = vector.load %arg4[%c0_112, %c3_113, %c0_114, %c0_115] : memref<1x20x20x32xbf16, #tpu.memory_space<vmem>>, vector<1x1x20x32xbf16>
    %131 = vector.shape_cast %130 : vector<1x1x20x32xbf16> to vector<20x32xbf16>
    %132 = vector.shape_cast %129 : vector<20x32xbf16> to vector<1x1x20x32xbf16>
    tpu.vector_store %arg4[%c0_112, %c3_113, %c0_114, %c0_115], %132 {strides = array<i32>} : memref<1x20x20x32xbf16, #tpu.memory_space<vmem>>, vector<1x1x20x32xbf16>,
    %cst_116 = arith.constant 0.000000e+00 : f32
    %133 = vector.broadcast %cst_116 : f32 to vector<20x32xf32>
    %c0_117 = arith.constant 0 : index
    %c4_118 = arith.constant 4 : index
    %c0_119 = arith.constant 0 : index
    %c0_120 = arith.constant 0 : index
    %134 = vector.load %arg1[%c0_117, %c4_118, %c0_119, %c0_120] : memref<1x21x21x64xbf16, #tpu.memory_space<vmem>>, vector<1x1x21x64xbf16>
    %135 = vector.shape_cast %134 : vector<1x1x21x64xbf16> to vector<21x64xbf16>
    %136 = vector.extract_strided_slice %135 {offsets = [0, 0], sizes = [20, 64], strides = [1, 1]} : vector<21x64xbf16> to vector<20x64xbf16>
    %c0_121 = arith.constant 0 : index
    %c0_122 = arith.constant 0 : index
    %c0_123 = arith.constant 0 : index
    %137 = vector.load %arg2[%c0_121, %c0_122, %c0_123] : memref<4x64x32xbf16, #tpu.memory_space<vmem>>, vector<1x64x32xbf16>
    %138 = vector.shape_cast %137 : vector<1x64x32xbf16> to vector<64x32xbf16>
    %cst_124 = arith.constant dense<0.000000e+00> : vector<20x32xf32>
    %139 = tpu.matmul %136, %138, %cst_124 {dimension_numbers = #tpu.dot_dimension_numbers<[1], [0], [0], [1], [0, 0, 1, 1], [], []>} : vector<20x64xbf16>, vector<64x32xbf16>, vector<20x32xf32> -> vector<20x32xf32>
    %140 = arith.addf %133, %139 : vector<20x32xf32>
    %141 = vector.extract_strided_slice %135 {offsets = [1, 0], sizes = [20, 64], strides = [1, 1]} : vector<21x64xbf16> to vector<20x64xbf16>
    %c1_125 = arith.constant 1 : index
    %c0_126 = arith.constant 0 : index
    %c0_127 = arith.constant 0 : index
    %142 = vector.load %arg2[%c1_125, %c0_126, %c0_127] : memref<4x64x32xbf16, #tpu.memory_space<vmem>>, vector<1x64x32xbf16>
    %143 = vector.shape_cast %142 : vector<1x64x32xbf16> to vector<64x32xbf16>
    %cst_128 = arith.constant dense<0.000000e+00> : vector<20x32xf32>
    %144 = tpu.matmul %141, %143, %cst_128 {dimension_numbers = #tpu.dot_dimension_numbers<[1], [0], [0], [1], [0, 0, 1, 1], [], []>} : vector<20x64xbf16>, vector<64x32xbf16>, vector<20x32xf32> -> vector<20x32xf32>
    %145 = arith.addf %140, %144 : vector<20x32xf32>
    %c0_129 = arith.constant 0 : index
    %c5 = arith.constant 5 : index
    %c0_130 = arith.constant 0 : index
    %c0_131 = arith.constant 0 : index
    %146 = vector.load %arg1[%c0_129, %c5, %c0_130, %c0_131] : memref<1x21x21x64xbf16, #tpu.memory_space<vmem>>, vector<1x1x21x64xbf16>
    %147 = vector.shape_cast %146 : vector<1x1x21x64xbf16> to vector<21x64xbf16>
    %148 = vector.extract_strided_slice %147 {offsets = [0, 0], sizes = [20, 64], strides = [1, 1]} : vector<21x64xbf16> to vector<20x64xbf16>
    %c2_132 = arith.constant 2 : index
    %c0_133 = arith.constant 0 : index
    %c0_134 = arith.constant 0 : index
    %149 = vector.load %arg2[%c2_132, %c0_133, %c0_134] : memref<4x64x32xbf16, #tpu.memory_space<vmem>>, vector<1x64x32xbf16>
    %150 = vector.shape_cast %149 : vector<1x64x32xbf16> to vector<64x32xbf16>
    %cst_135 = arith.constant dense<0.000000e+00> : vector<20x32xf32>
    %151 = tpu.matmul %148, %150, %cst_135 {dimension_numbers = #tpu.dot_dimension_numbers<[1], [0], [0], [1], [0, 0, 1, 1], [], []>} : vector<20x64xbf16>, vector<64x32xbf16>, vector<20x32xf32> -> vector<20x32xf32>
    %152 = arith.addf %145, %151 : vector<20x32xf32>
    %153 = vector.extract_strided_slice %147 {offsets = [1, 0], sizes = [20, 64], strides = [1, 1]} : vector<21x64xbf16> to vector<20x64xbf16>
    %c3_136 = arith.constant 3 : index
    %c0_137 = arith.constant 0 : index
    %c0_138 = arith.constant 0 : index
    %154 = vector.load %arg2[%c3_136, %c0_137, %c0_138] : memref<4x64x32xbf16, #tpu.memory_space<vmem>>, vector<1x64x32xbf16>
    %155 = vector.shape_cast %154 : vector<1x64x32xbf16> to vector<64x32xbf16>
    %cst_139 = arith.constant dense<0.000000e+00> : vector<20x32xf32>
    %156 = tpu.matmul %153, %155, %cst_139 {dimension_numbers = #tpu.dot_dimension_numbers<[1], [0], [0], [1], [0, 0, 1, 1], [], []>} : vector<20x64xbf16>, vector<64x32xbf16>, vector<20x32xf32> -> vector<20x32xf32>
    %157 = arith.addf %152, %156 : vector<20x32xf32>
    %158 = vector.broadcast %0 : vector<1x32xf32> to vector<20x32xf32>
    %159 = arith.addf %157, %158 : vector<20x32xf32>
    %cst_140 = arith.constant 0.000000e+00 : f32
    %160 = vector.broadcast %cst_140 : f32 to vector<20x32xf32>
    %161 = arith.maximumf %159, %160 : vector<20x32xf32>
    %162 = arith.truncf %161 : vector<20x32xf32> to vector<20x32xbf16>
    %c0_141 = arith.constant 0 : index
    %c4_142 = arith.constant 4 : index
    %c0_143 = arith.constant 0 : index
    %c0_144 = arith.constant 0 : index
    %163 = vector.load %arg4[%c0_141, %c4_142, %c0_143, %c0_144] : memref<1x20x20x32xbf16, #tpu.memory_space<vmem>>, vector<1x1x20x32xbf16>
    %164 = vector.shape_cast %163 : vector<1x1x20x32xbf16> to vector<20x32xbf16>
    %165 = vector.shape_cast %162 : vector<20x32xbf16> to vector<1x1x20x32xbf16>
    tpu.vector_store %arg4[%c0_141, %c4_142, %c0_143, %c0_144], %165 {strides = array<i32>} : memref<1x20x20x32xbf16, #tpu.memory_space<vmem>>, vector<1x1x20x32xbf16>,
    %cst_145 = arith.constant 0.000000e+00 : f32
    %166 = vector.broadcast %cst_145 : f32 to vector<20x32xf32>
    %c0_146 = arith.constant 0 : index
    %c5_147 = arith.constant 5 : index
    %c0_148 = arith.constant 0 : index
    %c0_149 = arith.constant 0 : index
    %167 = vector.load %arg1[%c0_146, %c5_147, %c0_148, %c0_149] : memref<1x21x21x64xbf16, #tpu.memory_space<vmem>>, vector<1x1x21x64xbf16>
    %168 = vector.shape_cast %167 : vector<1x1x21x64xbf16> to vector<21x64xbf16>
    %169 = vector.extract_strided_slice %168 {offsets = [0, 0], sizes = [20, 64], strides = [1, 1]} : vector<21x64xbf16> to vector<20x64xbf16>
    %c0_150 = arith.constant 0 : index
    %c0_151 = arith.constant 0 : index
    %c0_152 = arith.constant 0 : index
    %170 = vector.load %arg2[%c0_150, %c0_151, %c0_152] : memref<4x64x32xbf16, #tpu.memory_space<vmem>>, vector<1x64x32xbf16>
    %171 = vector.shape_cast %170 : vector<1x64x32xbf16> to vector<64x32xbf16>
    %cst_153 = arith.constant dense<0.000000e+00> : vector<20x32xf32>
    %172 = tpu.matmul %169, %171, %cst_153 {dimension_numbers = #tpu.dot_dimension_numbers<[1], [0], [0], [1], [0, 0, 1, 1], [], []>} : vector<20x64xbf16>, vector<64x32xbf16>, vector<20x32xf32> -> vector<20x32xf32>
    %173 = arith.addf %166, %172 : vector<20x32xf32>
    %174 = vector.extract_strided_slice %168 {offsets = [1, 0], sizes = [20, 64], strides = [1, 1]} : vector<21x64xbf16> to vector<20x64xbf16>
    %c1_154 = arith.constant 1 : index
    %c0_155 = arith.constant 0 : index
    %c0_156 = arith.constant 0 : index
    %175 = vector.load %arg2[%c1_154, %c0_155, %c0_156] : memref<4x64x32xbf16, #tpu.memory_space<vmem>>, vector<1x64x32xbf16>
    %176 = vector.shape_cast %175 : vector<1x64x32xbf16> to vector<64x32xbf16>
    %cst_157 = arith.constant dense<0.000000e+00> : vector<20x32xf32>
    %177 = tpu.matmul %174, %176, %cst_157 {dimension_numbers = #tpu.dot_dimension_numbers<[1], [0], [0], [1], [0, 0, 1, 1], [], []>} : vector<20x64xbf16>, vector<64x32xbf16>, vector<20x32xf32> -> vector<20x32xf32>
    %178 = arith.addf %173, %177 : vector<20x32xf32>
    %c0_158 = arith.constant 0 : index
    %c6 = arith.constant 6 : index
    %c0_159 = arith.constant 0 : index
    %c0_160 = arith.constant 0 : index
    %179 = vector.load %arg1[%c0_158, %c6, %c0_159, %c0_160] : memref<1x21x21x64xbf16, #tpu.memory_space<vmem>>, vector<1x1x21x64xbf16>
    %180 = vector.shape_cast %179 : vector<1x1x21x64xbf16> to vector<21x64xbf16>
    %181 = vector.extract_strided_slice %180 {offsets = [0, 0], sizes = [20, 64], strides = [1, 1]} : vector<21x64xbf16> to vector<20x64xbf16>
    %c2_161 = arith.constant 2 : index
    %c0_162 = arith.constant 0 : index
    %c0_163 = arith.constant 0 : index
    %182 = vector.load %arg2[%c2_161, %c0_162, %c0_163] : memref<4x64x32xbf16, #tpu.memory_space<vmem>>, vector<1x64x32xbf16>
    %183 = vector.shape_cast %182 : vector<1x64x32xbf16> to vector<64x32xbf16>
    %cst_164 = arith.constant dense<0.000000e+00> : vector<20x32xf32>
    %184 = tpu.matmul %181, %183, %cst_164 {dimension_numbers = #tpu.dot_dimension_numbers<[1], [0], [0], [1], [0, 0, 1, 1], [], []>} : vector<20x64xbf16>, vector<64x32xbf16>, vector<20x32xf32> -> vector<20x32xf32>
    %185 = arith.addf %178, %184 : vector<20x32xf32>
    %186 = vector.extract_strided_slice %180 {offsets = [1, 0], sizes = [20, 64], strides = [1, 1]} : vector<21x64xbf16> to vector<20x64xbf16>
    %c3_165 = arith.constant 3 : index
    %c0_166 = arith.constant 0 : index
    %c0_167 = arith.constant 0 : index
    %187 = vector.load %arg2[%c3_165, %c0_166, %c0_167] : memref<4x64x32xbf16, #tpu.memory_space<vmem>>, vector<1x64x32xbf16>
    %188 = vector.shape_cast %187 : vector<1x64x32xbf16> to vector<64x32xbf16>
    %cst_168 = arith.constant dense<0.000000e+00> : vector<20x32xf32>
    %189 = tpu.matmul %186, %188, %cst_168 {dimension_numbers = #tpu.dot_dimension_numbers<[1], [0], [0], [1], [0, 0, 1, 1], [], []>} : vector<20x64xbf16>, vector<64x32xbf16>, vector<20x32xf32> -> vector<20x32xf32>
    %190 = arith.addf %185, %189 : vector<20x32xf32>
    %191 = vector.broadcast %0 : vector<1x32xf32> to vector<20x32xf32>
    %192 = arith.addf %190, %191 : vector<20x32xf32>
    %cst_169 = arith.constant 0.000000e+00 : f32
    %193 = vector.broadcast %cst_169 : f32 to vector<20x32xf32>
    %194 = arith.maximumf %192, %193 : vector<20x32xf32>
    %195 = arith.truncf %194 : vector<20x32xf32> to vector<20x32xbf16>
    %c0_170 = arith.constant 0 : index
    %c5_171 = arith.constant 5 : index
    %c0_172 = arith.constant 0 : index
    %c0_173 = arith.constant 0 : index
    %196 = vector.load %arg4[%c0_170, %c5_171, %c0_172, %c0_173] : memref<1x20x20x32xbf16, #tpu.memory_space<vmem>>, vector<1x1x20x32xbf16>
    %197 = vector.shape_cast %196 : vector<1x1x20x32xbf16> to vector<20x32xbf16>
    %198 = vector.shape_cast %195 : vector<20x32xbf16> to vector<1x1x20x32xbf16>
    tpu.vector_store %arg4[%c0_170, %c5_171, %c0_172, %c0_173], %198 {strides = array<i32>} : memref<1x20x20x32xbf16, #tpu.memory_space<vmem>>, vector<1x1x20x32xbf16>,
    %cst_174 = arith.constant 0.000000e+00 : f32
    %199 = vector.broadcast %cst_174 : f32 to vector<20x32xf32>
    %c0_175 = arith.constant 0 : index
    %c6_176 = arith.constant 6 : index
    %c0_177 = arith.constant 0 : index
    %c0_178 = arith.constant 0 : index
    %200 = vector.load %arg1[%c0_175, %c6_176, %c0_177, %c0_178] : memref<1x21x21x64xbf16, #tpu.memory_space<vmem>>, vector<1x1x21x64xbf16>
    %201 = vector.shape_cast %200 : vector<1x1x21x64xbf16> to vector<21x64xbf16>
    %202 = vector.extract_strided_slice %201 {offsets = [0, 0], sizes = [20, 64], strides = [1, 1]} : vector<21x64xbf16> to vector<20x64xbf16>
    %c0_179 = arith.constant 0 : index
    %c0_180 = arith.constant 0 : index
    %c0_181 = arith.constant 0 : index
    %203 = vector.load %arg2[%c0_179, %c0_180, %c0_181] : memref<4x64x32xbf16, #tpu.memory_space<vmem>>, vector<1x64x32xbf16>
    %204 = vector.shape_cast %203 : vector<1x64x32xbf16> to vector<64x32xbf16>
    %cst_182 = arith.constant dense<0.000000e+00> : vector<20x32xf32>
    %205 = tpu.matmul %202, %204, %cst_182 {dimension_numbers = #tpu.dot_dimension_numbers<[1], [0], [0], [1], [0, 0, 1, 1], [], []>} : vector<20x64xbf16>, vector<64x32xbf16>, vector<20x32xf32> -> vector<20x32xf32>
    %206 = arith.addf %199, %205 : vector<20x32xf32>
    %207 = vector.extract_strided_slice %201 {offsets = [1, 0], sizes = [20, 64], strides = [1, 1]} : vector<21x64xbf16> to vector<20x64xbf16>
    %c1_183 = arith.constant 1 : index
    %c0_184 = arith.constant 0 : index
    %c0_185 = arith.constant 0 : index
    %208 = vector.load %arg2[%c1_183, %c0_184, %c0_185] : memref<4x64x32xbf16, #tpu.memory_space<vmem>>, vector<1x64x32xbf16>
    %209 = vector.shape_cast %208 : vector<1x64x32xbf16> to vector<64x32xbf16>
    %cst_186 = arith.constant dense<0.000000e+00> : vector<20x32xf32>
    %210 = tpu.matmul %207, %209, %cst_186 {dimension_numbers = #tpu.dot_dimension_numbers<[1], [0], [0], [1], [0, 0, 1, 1], [], []>} : vector<20x64xbf16>, vector<64x32xbf16>, vector<20x32xf32> -> vector<20x32xf32>
    %211 = arith.addf %206, %210 : vector<20x32xf32>
    %c0_187 = arith.constant 0 : index
    %c7 = arith.constant 7 : index
    %c0_188 = arith.constant 0 : index
    %c0_189 = arith.constant 0 : index
    %212 = vector.load %arg1[%c0_187, %c7, %c0_188, %c0_189] : memref<1x21x21x64xbf16, #tpu.memory_space<vmem>>, vector<1x1x21x64xbf16>
    %213 = vector.shape_cast %212 : vector<1x1x21x64xbf16> to vector<21x64xbf16>
    %214 = vector.extract_strided_slice %213 {offsets = [0, 0], sizes = [20, 64], strides = [1, 1]} : vector<21x64xbf16> to vector<20x64xbf16>
    %c2_190 = arith.constant 2 : index
    %c0_191 = arith.constant 0 : index
    %c0_192 = arith.constant 0 : index
    %215 = vector.load %arg2[%c2_190, %c0_191, %c0_192] : memref<4x64x32xbf16, #tpu.memory_space<vmem>>, vector<1x64x32xbf16>
    %216 = vector.shape_cast %215 : vector<1x64x32xbf16> to vector<64x32xbf16>
    %cst_193 = arith.constant dense<0.000000e+00> : vector<20x32xf32>
    %217 = tpu.matmul %214, %216, %cst_193 {dimension_numbers = #tpu.dot_dimension_numbers<[1], [0], [0], [1], [0, 0, 1, 1], [], []>} : vector<20x64xbf16>, vector<64x32xbf16>, vector<20x32xf32> -> vector<20x32xf32>
    %218 = arith.addf %211, %217 : vector<20x32xf32>
    %219 = vector.extract_strided_slice %213 {offsets = [1, 0], sizes = [20, 64], strides = [1, 1]} : vector<21x64xbf16> to vector<20x64xbf16>
    %c3_194 = arith.constant 3 : index
    %c0_195 = arith.constant 0 : index
    %c0_196 = arith.constant 0 : index
    %220 = vector.load %arg2[%c3_194, %c0_195, %c0_196] : memref<4x64x32xbf16, #tpu.memory_space<vmem>>, vector<1x64x32xbf16>
    %221 = vector.shape_cast %220 : vector<1x64x32xbf16> to vector<64x32xbf16>
    %cst_197 = arith.constant dense<0.000000e+00> : vector<20x32xf32>
    %222 = tpu.matmul %219, %221, %cst_197 {dimension_numbers = #tpu.dot_dimension_numbers<[1], [0], [0], [1], [0, 0, 1, 1], [], []>} : vector<20x64xbf16>, vector<64x32xbf16>, vector<20x32xf32> -> vector<20x32xf32>
    %223 = arith.addf %218, %222 : vector<20x32xf32>
    %224 = vector.broadcast %0 : vector<1x32xf32> to vector<20x32xf32>
    %225 = arith.addf %223, %224 : vector<20x32xf32>
    %cst_198 = arith.constant 0.000000e+00 : f32
    %226 = vector.broadcast %cst_198 : f32 to vector<20x32xf32>
    %227 = arith.maximumf %225, %226 : vector<20x32xf32>
    %228 = arith.truncf %227 : vector<20x32xf32> to vector<20x32xbf16>
    %c0_199 = arith.constant 0 : index
    %c6_200 = arith.constant 6 : index
    %c0_201 = arith.constant 0 : index
    %c0_202 = arith.constant 0 : index
    %229 = vector.load %arg4[%c0_199, %c6_200, %c0_201, %c0_202] : memref<1x20x20x32xbf16, #tpu.memory_space<vmem>>, vector<1x1x20x32xbf16>
    %230 = vector.shape_cast %229 : vector<1x1x20x32xbf16> to vector<20x32xbf16>
    %231 = vector.shape_cast %228 : vector<20x32xbf16> to vector<1x1x20x32xbf16>
    tpu.vector_store %arg4[%c0_199, %c6_200, %c0_201, %c0_202], %231 {strides = array<i32>} : memref<1x20x20x32xbf16, #tpu.memory_space<vmem>>, vector<1x1x20x32xbf16>,
    %cst_203 = arith.constant 0.000000e+00 : f32
    %232 = vector.broadcast %cst_203 : f32 to vector<20x32xf32>
    %c0_204 = arith.constant 0 : index
    %c7_205 = arith.constant 7 : index
    %c0_206 = arith.constant 0 : index
    %c0_207 = arith.constant 0 : index
    %233 = vector.load %arg1[%c0_204, %c7_205, %c0_206, %c0_207] : memref<1x21x21x64xbf16, #tpu.memory_space<vmem>>, vector<1x1x21x64xbf16>
    %234 = vector.shape_cast %233 : vector<1x1x21x64xbf16> to vector<21x64xbf16>
    %235 = vector.extract_strided_slice %234 {offsets = [0, 0], sizes = [20, 64], strides = [1, 1]} : vector<21x64xbf16> to vector<20x64xbf16>
    %c0_208 = arith.constant 0 : index
    %c0_209 = arith.constant 0 : index
    %c0_210 = arith.constant 0 : index
    %236 = vector.load %arg2[%c0_208, %c0_209, %c0_210] : memref<4x64x32xbf16, #tpu.memory_space<vmem>>, vector<1x64x32xbf16>
    %237 = vector.shape_cast %236 : vector<1x64x32xbf16> to vector<64x32xbf16>
    %cst_211 = arith.constant dense<0.000000e+00> : vector<20x32xf32>
    %238 = tpu.matmul %235, %237, %cst_211 {dimension_numbers = #tpu.dot_dimension_numbers<[1], [0], [0], [1], [0, 0, 1, 1], [], []>} : vector<20x64xbf16>, vector<64x32xbf16>, vector<20x32xf32> -> vector<20x32xf32>
    %239 = arith.addf %232, %238 : vector<20x32xf32>
    %240 = vector.extract_strided_slice %234 {offsets = [1, 0], sizes = [20, 64], strides = [1, 1]} : vector<21x64xbf16> to vector<20x64xbf16>
    %c1_212 = arith.constant 1 : index
    %c0_213 = arith.constant 0 : index
    %c0_214 = arith.constant 0 : index
    %241 = vector.load %arg2[%c1_212, %c0_213, %c0_214] : memref<4x64x32xbf16, #tpu.memory_space<vmem>>, vector<1x64x32xbf16>
    %242 = vector.shape_cast %241 : vector<1x64x32xbf16> to vector<64x32xbf16>
    %cst_215 = arith.constant dense<0.000000e+00> : vector<20x32xf32>
    %243 = tpu.matmul %240, %242, %cst_215 {dimension_numbers = #tpu.dot_dimension_numbers<[1], [0], [0], [1], [0, 0, 1, 1], [], []>} : vector<20x64xbf16>, vector<64x32xbf16>, vector<20x32xf32> -> vector<20x32xf32>
    %244 = arith.addf %239, %243 : vector<20x32xf32>
    %c0_216 = arith.constant 0 : index
    %c8 = arith.constant 8 : index
    %c0_217 = arith.constant 0 : index
    %c0_218 = arith.constant 0 : index
    %245 = vector.load %arg1[%c0_216, %c8, %c0_217, %c0_218] : memref<1x21x21x64xbf16, #tpu.memory_space<vmem>>, vector<1x1x21x64xbf16>
    %246 = vector.shape_cast %245 : vector<1x1x21x64xbf16> to vector<21x64xbf16>
    %247 = vector.extract_strided_slice %246 {offsets = [0, 0], sizes = [20, 64], strides = [1, 1]} : vector<21x64xbf16> to vector<20x64xbf16>
    %c2_219 = arith.constant 2 : index
    %c0_220 = arith.constant 0 : index
    %c0_221 = arith.constant 0 : index
    %248 = vector.load %arg2[%c2_219, %c0_220, %c0_221] : memref<4x64x32xbf16, #tpu.memory_space<vmem>>, vector<1x64x32xbf16>
    %249 = vector.shape_cast %248 : vector<1x64x32xbf16> to vector<64x32xbf16>
    %cst_222 = arith.constant dense<0.000000e+00> : vector<20x32xf32>
    %250 = tpu.matmul %247, %249, %cst_222 {dimension_numbers = #tpu.dot_dimension_numbers<[1], [0], [0], [1], [0, 0, 1, 1], [], []>} : vector<20x64xbf16>, vector<64x32xbf16>, vector<20x32xf32> -> vector<20x32xf32>
    %251 = arith.addf %244, %250 : vector<20x32xf32>
    %252 = vector.extract_strided_slice %246 {offsets = [1, 0], sizes = [20, 64], strides = [1, 1]} : vector<21x64xbf16> to vector<20x64xbf16>
    %c3_223 = arith.constant 3 : index
    %c0_224 = arith.constant 0 : index
    %c0_225 = arith.constant 0 : index
    %253 = vector.load %arg2[%c3_223, %c0_224, %c0_225] : memref<4x64x32xbf16, #tpu.memory_space<vmem>>, vector<1x64x32xbf16>
    %254 = vector.shape_cast %253 : vector<1x64x32xbf16> to vector<64x32xbf16>
    %cst_226 = arith.constant dense<0.000000e+00> : vector<20x32xf32>
    %255 = tpu.matmul %252, %254, %cst_226 {dimension_numbers = #tpu.dot_dimension_numbers<[1], [0], [0], [1], [0, 0, 1, 1], [], []>} : vector<20x64xbf16>, vector<64x32xbf16>, vector<20x32xf32> -> vector<20x32xf32>
    %256 = arith.addf %251, %255 : vector<20x32xf32>
    %257 = vector.broadcast %0 : vector<1x32xf32> to vector<20x32xf32>
    %258 = arith.addf %256, %257 : vector<20x32xf32>
    %cst_227 = arith.constant 0.000000e+00 : f32
    %259 = vector.broadcast %cst_227 : f32 to vector<20x32xf32>
    %260 = arith.maximumf %258, %259 : vector<20x32xf32>
    %261 = arith.truncf %260 : vector<20x32xf32> to vector<20x32xbf16>
    %c0_228 = arith.constant 0 : index
    %c7_229 = arith.constant 7 : index
    %c0_230 = arith.constant 0 : index
    %c0_231 = arith.constant 0 : index
    %262 = vector.load %arg4[%c0_228, %c7_229, %c0_230, %c0_231] : memref<1x20x20x32xbf16, #tpu.memory_space<vmem>>, vector<1x1x20x32xbf16>
    %263 = vector.shape_cast %262 : vector<1x1x20x32xbf16> to vector<20x32xbf16>
    %264 = vector.shape_cast %261 : vector<20x32xbf16> to vector<1x1x20x32xbf16>
    tpu.vector_store %arg4[%c0_228, %c7_229, %c0_230, %c0_231], %264 {strides = array<i32>} : memref<1x20x20x32xbf16, #tpu.memory_space<vmem>>, vector<1x1x20x32xbf16>,
    %cst_232 = arith.constant 0.000000e+00 : f32
    %265 = vector.broadcast %cst_232 : f32 to vector<20x32xf32>
    %c0_233 = arith.constant 0 : index
    %c8_234 = arith.constant 8 : index
    %c0_235 = arith.constant 0 : index
    %c0_236 = arith.constant 0 : index
    %266 = vector.load %arg1[%c0_233, %c8_234, %c0_235, %c0_236] : memref<1x21x21x64xbf16, #tpu.memory_space<vmem>>, vector<1x1x21x64xbf16>
    %267 = vector.shape_cast %266 : vector<1x1x21x64xbf16> to vector<21x64xbf16>
    %268 = vector.extract_strided_slice %267 {offsets = [0, 0], sizes = [20, 64], strides = [1, 1]} : vector<21x64xbf16> to vector<20x64xbf16>
    %c0_237 = arith.constant 0 : index
    %c0_238 = arith.constant 0 : index
    %c0_239 = arith.constant 0 : index
    %269 = vector.load %arg2[%c0_237, %c0_238, %c0_239] : memref<4x64x32xbf16, #tpu.memory_space<vmem>>, vector<1x64x32xbf16>
    %270 = vector.shape_cast %269 : vector<1x64x32xbf16> to vector<64x32xbf16>
    %cst_240 = arith.constant dense<0.000000e+00> : vector<20x32xf32>
    %271 = tpu.matmul %268, %270, %cst_240 {dimension_numbers = #tpu.dot_dimension_numbers<[1], [0], [0], [1], [0, 0, 1, 1], [], []>} : vector<20x64xbf16>, vector<64x32xbf16>, vector<20x32xf32> -> vector<20x32xf32>
    %272 = arith.addf %265, %271 : vector<20x32xf32>
    %273 = vector.extract_strided_slice %267 {offsets = [1, 0], sizes = [20, 64], strides = [1, 1]} : vector<21x64xbf16> to vector<20x64xbf16>
    %c1_241 = arith.constant 1 : index
    %c0_242 = arith.constant 0 : index
    %c0_243 = arith.constant 0 : index
    %274 = vector.load %arg2[%c1_241, %c0_242, %c0_243] : memref<4x64x32xbf16, #tpu.memory_space<vmem>>, vector<1x64x32xbf16>
    %275 = vector.shape_cast %274 : vector<1x64x32xbf16> to vector<64x32xbf16>
    %cst_244 = arith.constant dense<0.000000e+00> : vector<20x32xf32>
    %276 = tpu.matmul %273, %275, %cst_244 {dimension_numbers = #tpu.dot_dimension_numbers<[1], [0], [0], [1], [0, 0, 1, 1], [], []>} : vector<20x64xbf16>, vector<64x32xbf16>, vector<20x32xf32> -> vector<20x32xf32>
    %277 = arith.addf %272, %276 : vector<20x32xf32>
    %c0_245 = arith.constant 0 : index
    %c9 = arith.constant 9 : index
    %c0_246 = arith.constant 0 : index
    %c0_247 = arith.constant 0 : index
    %278 = vector.load %arg1[%c0_245, %c9, %c0_246, %c0_247] : memref<1x21x21x64xbf16, #tpu.memory_space<vmem>>, vector<1x1x21x64xbf16>
    %279 = vector.shape_cast %278 : vector<1x1x21x64xbf16> to vector<21x64xbf16>
    %280 = vector.extract_strided_slice %279 {offsets = [0, 0], sizes = [20, 64], strides = [1, 1]} : vector<21x64xbf16> to vector<20x64xbf16>
    %c2_248 = arith.constant 2 : index
    %c0_249 = arith.constant 0 : index
    %c0_250 = arith.constant 0 : index
    %281 = vector.load %arg2[%c2_248, %c0_249, %c0_250] : memref<4x64x32xbf16, #tpu.memory_space<vmem>>, vector<1x64x32xbf16>
    %282 = vector.shape_cast %281 : vector<1x64x32xbf16> to vector<64x32xbf16>
    %cst_251 = arith.constant dense<0.000000e+00> : vector<20x32xf32>
    %283 = tpu.matmul %280, %282, %cst_251 {dimension_numbers = #tpu.dot_dimension_numbers<[1], [0], [0], [1], [0, 0, 1, 1], [], []>} : vector<20x64xbf16>, vector<64x32xbf16>, vector<20x32xf32> -> vector<20x32xf32>
    %284 = arith.addf %277, %283 : vector<20x32xf32>
    %285 = vector.extract_strided_slice %279 {offsets = [1, 0], sizes = [20, 64], strides = [1, 1]} : vector<21x64xbf16> to vector<20x64xbf16>
    %c3_252 = arith.constant 3 : index
    %c0_253 = arith.constant 0 : index
    %c0_254 = arith.constant 0 : index
    %286 = vector.load %arg2[%c3_252, %c0_253, %c0_254] : memref<4x64x32xbf16, #tpu.memory_space<vmem>>, vector<1x64x32xbf16>
    %287 = vector.shape_cast %286 : vector<1x64x32xbf16> to vector<64x32xbf16>
    %cst_255 = arith.constant dense<0.000000e+00> : vector<20x32xf32>
    %288 = tpu.matmul %285, %287, %cst_255 {dimension_numbers = #tpu.dot_dimension_numbers<[1], [0], [0], [1], [0, 0, 1, 1], [], []>} : vector<20x64xbf16>, vector<64x32xbf16>, vector<20x32xf32> -> vector<20x32xf32>
    %289 = arith.addf %284, %288 : vector<20x32xf32>
    %290 = vector.broadcast %0 : vector<1x32xf32> to vector<20x32xf32>
    %291 = arith.addf %289, %290 : vector<20x32xf32>
    %cst_256 = arith.constant 0.000000e+00 : f32
    %292 = vector.broadcast %cst_256 : f32 to vector<20x32xf32>
    %293 = arith.maximumf %291, %292 : vector<20x32xf32>
    %294 = arith.truncf %293 : vector<20x32xf32> to vector<20x32xbf16>
    %c0_257 = arith.constant 0 : index
    %c8_258 = arith.constant 8 : index
    %c0_259 = arith.constant 0 : index
    %c0_260 = arith.constant 0 : index
    %295 = vector.load %arg4[%c0_257, %c8_258, %c0_259, %c0_260] : memref<1x20x20x32xbf16, #tpu.memory_space<vmem>>, vector<1x1x20x32xbf16>
    %296 = vector.shape_cast %295 : vector<1x1x20x32xbf16> to vector<20x32xbf16>
    %297 = vector.shape_cast %294 : vector<20x32xbf16> to vector<1x1x20x32xbf16>
    tpu.vector_store %arg4[%c0_257, %c8_258, %c0_259, %c0_260], %297 {strides = array<i32>} : memref<1x20x20x32xbf16, #tpu.memory_space<vmem>>, vector<1x1x20x32xbf16>,
    %cst_261 = arith.constant 0.000000e+00 : f32
    %298 = vector.broadcast %cst_261 : f32 to vector<20x32xf32>
    %c0_262 = arith.constant 0 : index
    %c9_263 = arith.constant 9 : index
    %c0_264 = arith.constant 0 : index
    %c0_265 = arith.constant 0 : index
    %299 = vector.load %arg1[%c0_262, %c9_263, %c0_264, %c0_265] : memref<1x21x21x64xbf16, #tpu.memory_space<vmem>>, vector<1x1x21x64xbf16>
    %300 = vector.shape_cast %299 : vector<1x1x21x64xbf16> to vector<21x64xbf16>
    %301 = vector.extract_strided_slice %300 {offsets = [0, 0], sizes = [20, 64], strides = [1, 1]} : vector<21x64xbf16> to vector<20x64xbf16>
    %c0_266 = arith.constant 0 : index
    %c0_267 = arith.constant 0 : index
    %c0_268 = arith.constant 0 : index
    %302 = vector.load %arg2[%c0_266, %c0_267, %c0_268] : memref<4x64x32xbf16, #tpu.memory_space<vmem>>, vector<1x64x32xbf16>
    %303 = vector.shape_cast %302 : vector<1x64x32xbf16> to vector<64x32xbf16>
    %cst_269 = arith.constant dense<0.000000e+00> : vector<20x32xf32>
    %304 = tpu.matmul %301, %303, %cst_269 {dimension_numbers = #tpu.dot_dimension_numbers<[1], [0], [0], [1], [0, 0, 1, 1], [], []>} : vector<20x64xbf16>, vector<64x32xbf16>, vector<20x32xf32> -> vector<20x32xf32>
    %305 = arith.addf %298, %304 : vector<20x32xf32>
    %306 = vector.extract_strided_slice %300 {offsets = [1, 0], sizes = [20, 64], strides = [1, 1]} : vector<21x64xbf16> to vector<20x64xbf16>
    %c1_270 = arith.constant 1 : index
    %c0_271 = arith.constant 0 : index
    %c0_272 = arith.constant 0 : index
    %307 = vector.load %arg2[%c1_270, %c0_271, %c0_272] : memref<4x64x32xbf16, #tpu.memory_space<vmem>>, vector<1x64x32xbf16>
    %308 = vector.shape_cast %307 : vector<1x64x32xbf16> to vector<64x32xbf16>
    %cst_273 = arith.constant dense<0.000000e+00> : vector<20x32xf32>
    %309 = tpu.matmul %306, %308, %cst_273 {dimension_numbers = #tpu.dot_dimension_numbers<[1], [0], [0], [1], [0, 0, 1, 1], [], []>} : vector<20x64xbf16>, vector<64x32xbf16>, vector<20x32xf32> -> vector<20x32xf32>
    %310 = arith.addf %305, %309 : vector<20x32xf32>
    %c0_274 = arith.constant 0 : index
    %c10 = arith.constant 10 : index
    %c0_275 = arith.constant 0 : index
    %c0_276 = arith.constant 0 : index
    %311 = vector.load %arg1[%c0_274, %c10, %c0_275, %c0_276] : memref<1x21x21x64xbf16, #tpu.memory_space<vmem>>, vector<1x1x21x64xbf16>
    %312 = vector.shape_cast %311 : vector<1x1x21x64xbf16> to vector<21x64xbf16>
    %313 = vector.extract_strided_slice %312 {offsets = [0, 0], sizes = [20, 64], strides = [1, 1]} : vector<21x64xbf16> to vector<20x64xbf16>
    %c2_277 = arith.constant 2 : index
    %c0_278 = arith.constant 0 : index
    %c0_279 = arith.constant 0 : index
    %314 = vector.load %arg2[%c2_277, %c0_278, %c0_279] : memref<4x64x32xbf16, #tpu.memory_space<vmem>>, vector<1x64x32xbf16>
    %315 = vector.shape_cast %314 : vector<1x64x32xbf16> to vector<64x32xbf16>
    %cst_280 = arith.constant dense<0.000000e+00> : vector<20x32xf32>
    %316 = tpu.matmul %313, %315, %cst_280 {dimension_numbers = #tpu.dot_dimension_numbers<[1], [0], [0], [1], [0, 0, 1, 1], [], []>} : vector<20x64xbf16>, vector<64x32xbf16>, vector<20x32xf32> -> vector<20x32xf32>
    %317 = arith.addf %310, %316 : vector<20x32xf32>
    %318 = vector.extract_strided_slice %312 {offsets = [1, 0], sizes = [20, 64], strides = [1, 1]} : vector<21x64xbf16> to vector<20x64xbf16>
    %c3_281 = arith.constant 3 : index
    %c0_282 = arith.constant 0 : index
    %c0_283 = arith.constant 0 : index
    %319 = vector.load %arg2[%c3_281, %c0_282, %c0_283] : memref<4x64x32xbf16, #tpu.memory_space<vmem>>, vector<1x64x32xbf16>
    %320 = vector.shape_cast %319 : vector<1x64x32xbf16> to vector<64x32xbf16>
    %cst_284 = arith.constant dense<0.000000e+00> : vector<20x32xf32>
    %321 = tpu.matmul %318, %320, %cst_284 {dimension_numbers = #tpu.dot_dimension_numbers<[1], [0], [0], [1], [0, 0, 1, 1], [], []>} : vector<20x64xbf16>, vector<64x32xbf16>, vector<20x32xf32> -> vector<20x32xf32>
    %322 = arith.addf %317, %321 : vector<20x32xf32>
    %323 = vector.broadcast %0 : vector<1x32xf32> to vector<20x32xf32>
    %324 = arith.addf %322, %323 : vector<20x32xf32>
    %cst_285 = arith.constant 0.000000e+00 : f32
    %325 = vector.broadcast %cst_285 : f32 to vector<20x32xf32>
    %326 = arith.maximumf %324, %325 : vector<20x32xf32>
    %327 = arith.truncf %326 : vector<20x32xf32> to vector<20x32xbf16>
    %c0_286 = arith.constant 0 : index
    %c9_287 = arith.constant 9 : index
    %c0_288 = arith.constant 0 : index
    %c0_289 = arith.constant 0 : index
    %328 = vector.load %arg4[%c0_286, %c9_287, %c0_288, %c0_289] : memref<1x20x20x32xbf16, #tpu.memory_space<vmem>>, vector<1x1x20x32xbf16>
    %329 = vector.shape_cast %328 : vector<1x1x20x32xbf16> to vector<20x32xbf16>
    %330 = vector.shape_cast %327 : vector<20x32xbf16> to vector<1x1x20x32xbf16>
    tpu.vector_store %arg4[%c0_286, %c9_287, %c0_288, %c0_289], %330 {strides = array<i32>} : memref<1x20x20x32xbf16, #tpu.memory_space<vmem>>, vector<1x1x20x32xbf16>,
    %cst_290 = arith.constant 0.000000e+00 : f32
    %331 = vector.broadcast %cst_290 : f32 to vector<20x32xf32>
    %c0_291 = arith.constant 0 : index
    %c10_292 = arith.constant 10 : index
    %c0_293 = arith.constant 0 : index
    %c0_294 = arith.constant 0 : index
    %332 = vector.load %arg1[%c0_291, %c10_292, %c0_293, %c0_294] : memref<1x21x21x64xbf16, #tpu.memory_space<vmem>>, vector<1x1x21x64xbf16>
    %333 = vector.shape_cast %332 : vector<1x1x21x64xbf16> to vector<21x64xbf16>
    %334 = vector.extract_strided_slice %333 {offsets = [0, 0], sizes = [20, 64], strides = [1, 1]} : vector<21x64xbf16> to vector<20x64xbf16>
    %c0_295 = arith.constant 0 : index
    %c0_296 = arith.constant 0 : index
    %c0_297 = arith.constant 0 : index
    %335 = vector.load %arg2[%c0_295, %c0_296, %c0_297] : memref<4x64x32xbf16, #tpu.memory_space<vmem>>, vector<1x64x32xbf16>
    %336 = vector.shape_cast %335 : vector<1x64x32xbf16> to vector<64x32xbf16>
    %cst_298 = arith.constant dense<0.000000e+00> : vector<20x32xf32>
    %337 = tpu.matmul %334, %336, %cst_298 {dimension_numbers = #tpu.dot_dimension_numbers<[1], [0], [0], [1], [0, 0, 1, 1], [], []>} : vector<20x64xbf16>, vector<64x32xbf16>, vector<20x32xf32> -> vector<20x32xf32>
    %338 = arith.addf %331, %337 : vector<20x32xf32>
    %339 = vector.extract_strided_slice %333 {offsets = [1, 0], sizes = [20, 64], strides = [1, 1]} : vector<21x64xbf16> to vector<20x64xbf16>
    %c1_299 = arith.constant 1 : index
    %c0_300 = arith.constant 0 : index
    %c0_301 = arith.constant 0 : index
    %340 = vector.load %arg2[%c1_299, %c0_300, %c0_301] : memref<4x64x32xbf16, #tpu.memory_space<vmem>>, vector<1x64x32xbf16>
    %341 = vector.shape_cast %340 : vector<1x64x32xbf16> to vector<64x32xbf16>
    %cst_302 = arith.constant dense<0.000000e+00> : vector<20x32xf32>
    %342 = tpu.matmul %339, %341, %cst_302 {dimension_numbers = #tpu.dot_dimension_numbers<[1], [0], [0], [1], [0, 0, 1, 1], [], []>} : vector<20x64xbf16>, vector<64x32xbf16>, vector<20x32xf32> -> vector<20x32xf32>
    %343 = arith.addf %338, %342 : vector<20x32xf32>
    %c0_303 = arith.constant 0 : index
    %c11 = arith.constant 11 : index
    %c0_304 = arith.constant 0 : index
    %c0_305 = arith.constant 0 : index
    %344 = vector.load %arg1[%c0_303, %c11, %c0_304, %c0_305] : memref<1x21x21x64xbf16, #tpu.memory_space<vmem>>, vector<1x1x21x64xbf16>
    %345 = vector.shape_cast %344 : vector<1x1x21x64xbf16> to vector<21x64xbf16>
    %346 = vector.extract_strided_slice %345 {offsets = [0, 0], sizes = [20, 64], strides = [1, 1]} : vector<21x64xbf16> to vector<20x64xbf16>
    %c2_306 = arith.constant 2 : index
    %c0_307 = arith.constant 0 : index
    %c0_308 = arith.constant 0 : index
    %347 = vector.load %arg2[%c2_306, %c0_307, %c0_308] : memref<4x64x32xbf16, #tpu.memory_space<vmem>>, vector<1x64x32xbf16>
    %348 = vector.shape_cast %347 : vector<1x64x32xbf16> to vector<64x32xbf16>
    %cst_309 = arith.constant dense<0.000000e+00> : vector<20x32xf32>
    %349 = tpu.matmul %346, %348, %cst_309 {dimension_numbers = #tpu.dot_dimension_numbers<[1], [0], [0], [1], [0, 0, 1, 1], [], []>} : vector<20x64xbf16>, vector<64x32xbf16>, vector<20x32xf32> -> vector<20x32xf32>
    %350 = arith.addf %343, %349 : vector<20x32xf32>
    %351 = vector.extract_strided_slice %345 {offsets = [1, 0], sizes = [20, 64], strides = [1, 1]} : vector<21x64xbf16> to vector<20x64xbf16>
    %c3_310 = arith.constant 3 : index
    %c0_311 = arith.constant 0 : index
    %c0_312 = arith.constant 0 : index
    %352 = vector.load %arg2[%c3_310, %c0_311, %c0_312] : memref<4x64x32xbf16, #tpu.memory_space<vmem>>, vector<1x64x32xbf16>
    %353 = vector.shape_cast %352 : vector<1x64x32xbf16> to vector<64x32xbf16>
    %cst_313 = arith.constant dense<0.000000e+00> : vector<20x32xf32>
    %354 = tpu.matmul %351, %353, %cst_313 {dimension_numbers = #tpu.dot_dimension_numbers<[1], [0], [0], [1], [0, 0, 1, 1], [], []>} : vector<20x64xbf16>, vector<64x32xbf16>, vector<20x32xf32> -> vector<20x32xf32>
    %355 = arith.addf %350, %354 : vector<20x32xf32>
    %356 = vector.broadcast %0 : vector<1x32xf32> to vector<20x32xf32>
    %357 = arith.addf %355, %356 : vector<20x32xf32>
    %cst_314 = arith.constant 0.000000e+00 : f32
    %358 = vector.broadcast %cst_314 : f32 to vector<20x32xf32>
    %359 = arith.maximumf %357, %358 : vector<20x32xf32>
    %360 = arith.truncf %359 : vector<20x32xf32> to vector<20x32xbf16>
    %c0_315 = arith.constant 0 : index
    %c10_316 = arith.constant 10 : index
    %c0_317 = arith.constant 0 : index
    %c0_318 = arith.constant 0 : index
    %361 = vector.load %arg4[%c0_315, %c10_316, %c0_317, %c0_318] : memref<1x20x20x32xbf16, #tpu.memory_space<vmem>>, vector<1x1x20x32xbf16>
    %362 = vector.shape_cast %361 : vector<1x1x20x32xbf16> to vector<20x32xbf16>
    %363 = vector.shape_cast %360 : vector<20x32xbf16> to vector<1x1x20x32xbf16>
    tpu.vector_store %arg4[%c0_315, %c10_316, %c0_317, %c0_318], %363 {strides = array<i32>} : memref<1x20x20x32xbf16, #tpu.memory_space<vmem>>, vector<1x1x20x32xbf16>,
    %cst_319 = arith.constant 0.000000e+00 : f32
    %364 = vector.broadcast %cst_319 : f32 to vector<20x32xf32>
    %c0_320 = arith.constant 0 : index
    %c11_321 = arith.constant 11 : index
    %c0_322 = arith.constant 0 : index
    %c0_323 = arith.constant 0 : index
    %365 = vector.load %arg1[%c0_320, %c11_321, %c0_322, %c0_323] : memref<1x21x21x64xbf16, #tpu.memory_space<vmem>>, vector<1x1x21x64xbf16>
    %366 = vector.shape_cast %365 : vector<1x1x21x64xbf16> to vector<21x64xbf16>
    %367 = vector.extract_strided_slice %366 {offsets = [0, 0], sizes = [20, 64], strides = [1, 1]} : vector<21x64xbf16> to vector<20x64xbf16>
    %c0_324 = arith.constant 0 : index
    %c0_325 = arith.constant 0 : index
    %c0_326 = arith.constant 0 : index
    %368 = vector.load %arg2[%c0_324, %c0_325, %c0_326] : memref<4x64x32xbf16, #tpu.memory_space<vmem>>, vector<1x64x32xbf16>
    %369 = vector.shape_cast %368 : vector<1x64x32xbf16> to vector<64x32xbf16>
    %cst_327 = arith.constant dense<0.000000e+00> : vector<20x32xf32>
    %370 = tpu.matmul %367, %369, %cst_327 {dimension_numbers = #tpu.dot_dimension_numbers<[1], [0], [0], [1], [0, 0, 1, 1], [], []>} : vector<20x64xbf16>, vector<64x32xbf16>, vector<20x32xf32> -> vector<20x32xf32>
    %371 = arith.addf %364, %370 : vector<20x32xf32>
    %372 = vector.extract_strided_slice %366 {offsets = [1, 0], sizes = [20, 64], strides = [1, 1]} : vector<21x64xbf16> to vector<20x64xbf16>
    %c1_328 = arith.constant 1 : index
    %c0_329 = arith.constant 0 : index
    %c0_330 = arith.constant 0 : index
    %373 = vector.load %arg2[%c1_328, %c0_329, %c0_330] : memref<4x64x32xbf16, #tpu.memory_space<vmem>>, vector<1x64x32xbf16>
    %374 = vector.shape_cast %373 : vector<1x64x32xbf16> to vector<64x32xbf16>
    %cst_331 = arith.constant dense<0.000000e+00> : vector<20x32xf32>
    %375 = tpu.matmul %372, %374, %cst_331 {dimension_numbers = #tpu.dot_dimension_numbers<[1], [0], [0], [1], [0, 0, 1, 1], [], []>} : vector<20x64xbf16>, vector<64x32xbf16>, vector<20x32xf32> -> vector<20x32xf32>
    %376 = arith.addf %371, %375 : vector<20x32xf32>
    %c0_332 = arith.constant 0 : index
    %c12 = arith.constant 12 : index
    %c0_333 = arith.constant 0 : index
    %c0_334 = arith.constant 0 : index
    %377 = vector.load %arg1[%c0_332, %c12, %c0_333, %c0_334] : memref<1x21x21x64xbf16, #tpu.memory_space<vmem>>, vector<1x1x21x64xbf16>
    %378 = vector.shape_cast %377 : vector<1x1x21x64xbf16> to vector<21x64xbf16>
    %379 = vector.extract_strided_slice %378 {offsets = [0, 0], sizes = [20, 64], strides = [1, 1]} : vector<21x64xbf16> to vector<20x64xbf16>
    %c2_335 = arith.constant 2 : index
    %c0_336 = arith.constant 0 : index
    %c0_337 = arith.constant 0 : index
    %380 = vector.load %arg2[%c2_335, %c0_336, %c0_337] : memref<4x64x32xbf16, #tpu.memory_space<vmem>>, vector<1x64x32xbf16>
    %381 = vector.shape_cast %380 : vector<1x64x32xbf16> to vector<64x32xbf16>
    %cst_338 = arith.constant dense<0.000000e+00> : vector<20x32xf32>
    %382 = tpu.matmul %379, %381, %cst_338 {dimension_numbers = #tpu.dot_dimension_numbers<[1], [0], [0], [1], [0, 0, 1, 1], [], []>} : vector<20x64xbf16>, vector<64x32xbf16>, vector<20x32xf32> -> vector<20x32xf32>
    %383 = arith.addf %376, %382 : vector<20x32xf32>
    %384 = vector.extract_strided_slice %378 {offsets = [1, 0], sizes = [20, 64], strides = [1, 1]} : vector<21x64xbf16> to vector<20x64xbf16>
    %c3_339 = arith.constant 3 : index
    %c0_340 = arith.constant 0 : index
    %c0_341 = arith.constant 0 : index
    %385 = vector.load %arg2[%c3_339, %c0_340, %c0_341] : memref<4x64x32xbf16, #tpu.memory_space<vmem>>, vector<1x64x32xbf16>
    %386 = vector.shape_cast %385 : vector<1x64x32xbf16> to vector<64x32xbf16>
    %cst_342 = arith.constant dense<0.000000e+00> : vector<20x32xf32>
    %387 = tpu.matmul %384, %386, %cst_342 {dimension_numbers = #tpu.dot_dimension_numbers<[1], [0], [0], [1], [0, 0, 1, 1], [], []>} : vector<20x64xbf16>, vector<64x32xbf16>, vector<20x32xf32> -> vector<20x32xf32>
    %388 = arith.addf %383, %387 : vector<20x32xf32>
    %389 = vector.broadcast %0 : vector<1x32xf32> to vector<20x32xf32>
    %390 = arith.addf %388, %389 : vector<20x32xf32>
    %cst_343 = arith.constant 0.000000e+00 : f32
    %391 = vector.broadcast %cst_343 : f32 to vector<20x32xf32>
    %392 = arith.maximumf %390, %391 : vector<20x32xf32>
    %393 = arith.truncf %392 : vector<20x32xf32> to vector<20x32xbf16>
    %c0_344 = arith.constant 0 : index
    %c11_345 = arith.constant 11 : index
    %c0_346 = arith.constant 0 : index
    %c0_347 = arith.constant 0 : index
    %394 = vector.load %arg4[%c0_344, %c11_345, %c0_346, %c0_347] : memref<1x20x20x32xbf16, #tpu.memory_space<vmem>>, vector<1x1x20x32xbf16>
    %395 = vector.shape_cast %394 : vector<1x1x20x32xbf16> to vector<20x32xbf16>
    %396 = vector.shape_cast %393 : vector<20x32xbf16> to vector<1x1x20x32xbf16>
    tpu.vector_store %arg4[%c0_344, %c11_345, %c0_346, %c0_347], %396 {strides = array<i32>} : memref<1x20x20x32xbf16, #tpu.memory_space<vmem>>, vector<1x1x20x32xbf16>,
    %cst_348 = arith.constant 0.000000e+00 : f32
    %397 = vector.broadcast %cst_348 : f32 to vector<20x32xf32>
    %c0_349 = arith.constant 0 : index
    %c12_350 = arith.constant 12 : index
    %c0_351 = arith.constant 0 : index
    %c0_352 = arith.constant 0 : index
    %398 = vector.load %arg1[%c0_349, %c12_350, %c0_351, %c0_352] : memref<1x21x21x64xbf16, #tpu.memory_space<vmem>>, vector<1x1x21x64xbf16>
    %399 = vector.shape_cast %398 : vector<1x1x21x64xbf16> to vector<21x64xbf16>
    %400 = vector.extract_strided_slice %399 {offsets = [0, 0], sizes = [20, 64], strides = [1, 1]} : vector<21x64xbf16> to vector<20x64xbf16>
    %c0_353 = arith.constant 0 : index
    %c0_354 = arith.constant 0 : index
    %c0_355 = arith.constant 0 : index
    %401 = vector.load %arg2[%c0_353, %c0_354, %c0_355] : memref<4x64x32xbf16, #tpu.memory_space<vmem>>, vector<1x64x32xbf16>
    %402 = vector.shape_cast %401 : vector<1x64x32xbf16> to vector<64x32xbf16>
    %cst_356 = arith.constant dense<0.000000e+00> : vector<20x32xf32>
    %403 = tpu.matmul %400, %402, %cst_356 {dimension_numbers = #tpu.dot_dimension_numbers<[1], [0], [0], [1], [0, 0, 1, 1], [], []>} : vector<20x64xbf16>, vector<64x32xbf16>, vector<20x32xf32> -> vector<20x32xf32>
    %404 = arith.addf %397, %403 : vector<20x32xf32>
    %405 = vector.extract_strided_slice %399 {offsets = [1, 0], sizes = [20, 64], strides = [1, 1]} : vector<21x64xbf16> to vector<20x64xbf16>
    %c1_357 = arith.constant 1 : index
    %c0_358 = arith.constant 0 : index
    %c0_359 = arith.constant 0 : index
    %406 = vector.load %arg2[%c1_357, %c0_358, %c0_359] : memref<4x64x32xbf16, #tpu.memory_space<vmem>>, vector<1x64x32xbf16>
    %407 = vector.shape_cast %406 : vector<1x64x32xbf16> to vector<64x32xbf16>
    %cst_360 = arith.constant dense<0.000000e+00> : vector<20x32xf32>
    %408 = tpu.matmul %405, %407, %cst_360 {dimension_numbers = #tpu.dot_dimension_numbers<[1], [0], [0], [1], [0, 0, 1, 1], [], []>} : vector<20x64xbf16>, vector<64x32xbf16>, vector<20x32xf32> -> vector<20x32xf32>
    %409 = arith.addf %404, %408 : vector<20x32xf32>
    %c0_361 = arith.constant 0 : index
    %c13 = arith.constant 13 : index
    %c0_362 = arith.constant 0 : index
    %c0_363 = arith.constant 0 : index
    %410 = vector.load %arg1[%c0_361, %c13, %c0_362, %c0_363] : memref<1x21x21x64xbf16, #tpu.memory_space<vmem>>, vector<1x1x21x64xbf16>
    %411 = vector.shape_cast %410 : vector<1x1x21x64xbf16> to vector<21x64xbf16>
    %412 = vector.extract_strided_slice %411 {offsets = [0, 0], sizes = [20, 64], strides = [1, 1]} : vector<21x64xbf16> to vector<20x64xbf16>
    %c2_364 = arith.constant 2 : index
    %c0_365 = arith.constant 0 : index
    %c0_366 = arith.constant 0 : index
    %413 = vector.load %arg2[%c2_364, %c0_365, %c0_366] : memref<4x64x32xbf16, #tpu.memory_space<vmem>>, vector<1x64x32xbf16>
    %414 = vector.shape_cast %413 : vector<1x64x32xbf16> to vector<64x32xbf16>
    %cst_367 = arith.constant dense<0.000000e+00> : vector<20x32xf32>
    %415 = tpu.matmul %412, %414, %cst_367 {dimension_numbers = #tpu.dot_dimension_numbers<[1], [0], [0], [1], [0, 0, 1, 1], [], []>} : vector<20x64xbf16>, vector<64x32xbf16>, vector<20x32xf32> -> vector<20x32xf32>
    %416 = arith.addf %409, %415 : vector<20x32xf32>
    %417 = vector.extract_strided_slice %411 {offsets = [1, 0], sizes = [20, 64], strides = [1, 1]} : vector<21x64xbf16> to vector<20x64xbf16>
    %c3_368 = arith.constant 3 : index
    %c0_369 = arith.constant 0 : index
    %c0_370 = arith.constant 0 : index
    %418 = vector.load %arg2[%c3_368, %c0_369, %c0_370] : memref<4x64x32xbf16, #tpu.memory_space<vmem>>, vector<1x64x32xbf16>
    %419 = vector.shape_cast %418 : vector<1x64x32xbf16> to vector<64x32xbf16>
    %cst_371 = arith.constant dense<0.000000e+00> : vector<20x32xf32>
    %420 = tpu.matmul %417, %419, %cst_371 {dimension_numbers = #tpu.dot_dimension_numbers<[1], [0], [0], [1], [0, 0, 1, 1], [], []>} : vector<20x64xbf16>, vector<64x32xbf16>, vector<20x32xf32> -> vector<20x32xf32>
    %421 = arith.addf %416, %420 : vector<20x32xf32>
    %422 = vector.broadcast %0 : vector<1x32xf32> to vector<20x32xf32>
    %423 = arith.addf %421, %422 : vector<20x32xf32>
    %cst_372 = arith.constant 0.000000e+00 : f32
    %424 = vector.broadcast %cst_372 : f32 to vector<20x32xf32>
    %425 = arith.maximumf %423, %424 : vector<20x32xf32>
    %426 = arith.truncf %425 : vector<20x32xf32> to vector<20x32xbf16>
    %c0_373 = arith.constant 0 : index
    %c12_374 = arith.constant 12 : index
    %c0_375 = arith.constant 0 : index
    %c0_376 = arith.constant 0 : index
    %427 = vector.load %arg4[%c0_373, %c12_374, %c0_375, %c0_376] : memref<1x20x20x32xbf16, #tpu.memory_space<vmem>>, vector<1x1x20x32xbf16>
    %428 = vector.shape_cast %427 : vector<1x1x20x32xbf16> to vector<20x32xbf16>
    %429 = vector.shape_cast %426 : vector<20x32xbf16> to vector<1x1x20x32xbf16>
    tpu.vector_store %arg4[%c0_373, %c12_374, %c0_375, %c0_376], %429 {strides = array<i32>} : memref<1x20x20x32xbf16, #tpu.memory_space<vmem>>, vector<1x1x20x32xbf16>,
    %cst_377 = arith.constant 0.000000e+00 : f32
    %430 = vector.broadcast %cst_377 : f32 to vector<20x32xf32>
    %c0_378 = arith.constant 0 : index
    %c13_379 = arith.constant 13 : index
    %c0_380 = arith.constant 0 : index
    %c0_381 = arith.constant 0 : index
    %431 = vector.load %arg1[%c0_378, %c13_379, %c0_380, %c0_381] : memref<1x21x21x64xbf16, #tpu.memory_space<vmem>>, vector<1x1x21x64xbf16>
    %432 = vector.shape_cast %431 : vector<1x1x21x64xbf16> to vector<21x64xbf16>
    %433 = vector.extract_strided_slice %432 {offsets = [0, 0], sizes = [20, 64], strides = [1, 1]} : vector<21x64xbf16> to vector<20x64xbf16>
    %c0_382 = arith.constant 0 : index
    %c0_383 = arith.constant 0 : index
    %c0_384 = arith.constant 0 : index
    %434 = vector.load %arg2[%c0_382, %c0_383, %c0_384] : memref<4x64x32xbf16, #tpu.memory_space<vmem>>, vector<1x64x32xbf16>
    %435 = vector.shape_cast %434 : vector<1x64x32xbf16> to vector<64x32xbf16>
    %cst_385 = arith.constant dense<0.000000e+00> : vector<20x32xf32>
    %436 = tpu.matmul %433, %435, %cst_385 {dimension_numbers = #tpu.dot_dimension_numbers<[1], [0], [0], [1], [0, 0, 1, 1], [], []>} : vector<20x64xbf16>, vector<64x32xbf16>, vector<20x32xf32> -> vector<20x32xf32>
    %437 = arith.addf %430, %436 : vector<20x32xf32>
    %438 = vector.extract_strided_slice %432 {offsets = [1, 0], sizes = [20, 64], strides = [1, 1]} : vector<21x64xbf16> to vector<20x64xbf16>
    %c1_386 = arith.constant 1 : index
    %c0_387 = arith.constant 0 : index
    %c0_388 = arith.constant 0 : index
    %439 = vector.load %arg2[%c1_386, %c0_387, %c0_388] : memref<4x64x32xbf16, #tpu.memory_space<vmem>>, vector<1x64x32xbf16>
    %440 = vector.shape_cast %439 : vector<1x64x32xbf16> to vector<64x32xbf16>
    %cst_389 = arith.constant dense<0.000000e+00> : vector<20x32xf32>
    %441 = tpu.matmul %438, %440, %cst_389 {dimension_numbers = #tpu.dot_dimension_numbers<[1], [0], [0], [1], [0, 0, 1, 1], [], []>} : vector<20x64xbf16>, vector<64x32xbf16>, vector<20x32xf32> -> vector<20x32xf32>
    %442 = arith.addf %437, %441 : vector<20x32xf32>
    %c0_390 = arith.constant 0 : index
    %c14 = arith.constant 14 : index
    %c0_391 = arith.constant 0 : index
    %c0_392 = arith.constant 0 : index
    %443 = vector.load %arg1[%c0_390, %c14, %c0_391, %c0_392] : memref<1x21x21x64xbf16, #tpu.memory_space<vmem>>, vector<1x1x21x64xbf16>
    %444 = vector.shape_cast %443 : vector<1x1x21x64xbf16> to vector<21x64xbf16>
    %445 = vector.extract_strided_slice %444 {offsets = [0, 0], sizes = [20, 64], strides = [1, 1]} : vector<21x64xbf16> to vector<20x64xbf16>
    %c2_393 = arith.constant 2 : index
    %c0_394 = arith.constant 0 : index
    %c0_395 = arith.constant 0 : index
    %446 = vector.load %arg2[%c2_393, %c0_394, %c0_395] : memref<4x64x32xbf16, #tpu.memory_space<vmem>>, vector<1x64x32xbf16>
    %447 = vector.shape_cast %446 : vector<1x64x32xbf16> to vector<64x32xbf16>
    %cst_396 = arith.constant dense<0.000000e+00> : vector<20x32xf32>
    %448 = tpu.matmul %445, %447, %cst_396 {dimension_numbers = #tpu.dot_dimension_numbers<[1], [0], [0], [1], [0, 0, 1, 1], [], []>} : vector<20x64xbf16>, vector<64x32xbf16>, vector<20x32xf32> -> vector<20x32xf32>
    %449 = arith.addf %442, %448 : vector<20x32xf32>
    %450 = vector.extract_strided_slice %444 {offsets = [1, 0], sizes = [20, 64], strides = [1, 1]} : vector<21x64xbf16> to vector<20x64xbf16>
    %c3_397 = arith.constant 3 : index
    %c0_398 = arith.constant 0 : index
    %c0_399 = arith.constant 0 : index
    %451 = vector.load %arg2[%c3_397, %c0_398, %c0_399] : memref<4x64x32xbf16, #tpu.memory_space<vmem>>, vector<1x64x32xbf16>
    %452 = vector.shape_cast %451 : vector<1x64x32xbf16> to vector<64x32xbf16>
    %cst_400 = arith.constant dense<0.000000e+00> : vector<20x32xf32>
    %453 = tpu.matmul %450, %452, %cst_400 {dimension_numbers = #tpu.dot_dimension_numbers<[1], [0], [0], [1], [0, 0, 1, 1], [], []>} : vector<20x64xbf16>, vector<64x32xbf16>, vector<20x32xf32> -> vector<20x32xf32>
    %454 = arith.addf %449, %453 : vector<20x32xf32>
    %455 = vector.broadcast %0 : vector<1x32xf32> to vector<20x32xf32>
    %456 = arith.addf %454, %455 : vector<20x32xf32>
    %cst_401 = arith.constant 0.000000e+00 : f32
    %457 = vector.broadcast %cst_401 : f32 to vector<20x32xf32>
    %458 = arith.maximumf %456, %457 : vector<20x32xf32>
    %459 = arith.truncf %458 : vector<20x32xf32> to vector<20x32xbf16>
    %c0_402 = arith.constant 0 : index
    %c13_403 = arith.constant 13 : index
    %c0_404 = arith.constant 0 : index
    %c0_405 = arith.constant 0 : index
    %460 = vector.load %arg4[%c0_402, %c13_403, %c0_404, %c0_405] : memref<1x20x20x32xbf16, #tpu.memory_space<vmem>>, vector<1x1x20x32xbf16>
    %461 = vector.shape_cast %460 : vector<1x1x20x32xbf16> to vector<20x32xbf16>
    %462 = vector.shape_cast %459 : vector<20x32xbf16> to vector<1x1x20x32xbf16>
    tpu.vector_store %arg4[%c0_402, %c13_403, %c0_404, %c0_405], %462 {strides = array<i32>} : memref<1x20x20x32xbf16, #tpu.memory_space<vmem>>, vector<1x1x20x32xbf16>,
    %cst_406 = arith.constant 0.000000e+00 : f32
    %463 = vector.broadcast %cst_406 : f32 to vector<20x32xf32>
    %c0_407 = arith.constant 0 : index
    %c14_408 = arith.constant 14 : index
    %c0_409 = arith.constant 0 : index
    %c0_410 = arith.constant 0 : index
    %464 = vector.load %arg1[%c0_407, %c14_408, %c0_409, %c0_410] : memref<1x21x21x64xbf16, #tpu.memory_space<vmem>>, vector<1x1x21x64xbf16>
    %465 = vector.shape_cast %464 : vector<1x1x21x64xbf16> to vector<21x64xbf16>
    %466 = vector.extract_strided_slice %465 {offsets = [0, 0], sizes = [20, 64], strides = [1, 1]} : vector<21x64xbf16> to vector<20x64xbf16>
    %c0_411 = arith.constant 0 : index
    %c0_412 = arith.constant 0 : index
    %c0_413 = arith.constant 0 : index
    %467 = vector.load %arg2[%c0_411, %c0_412, %c0_413] : memref<4x64x32xbf16, #tpu.memory_space<vmem>>, vector<1x64x32xbf16>
    %468 = vector.shape_cast %467 : vector<1x64x32xbf16> to vector<64x32xbf16>
    %cst_414 = arith.constant dense<0.000000e+00> : vector<20x32xf32>
    %469 = tpu.matmul %466, %468, %cst_414 {dimension_numbers = #tpu.dot_dimension_numbers<[1], [0], [0], [1], [0, 0, 1, 1], [], []>} : vector<20x64xbf16>, vector<64x32xbf16>, vector<20x32xf32> -> vector<20x32xf32>
    %470 = arith.addf %463, %469 : vector<20x32xf32>
    %471 = vector.extract_strided_slice %465 {offsets = [1, 0], sizes = [20, 64], strides = [1, 1]} : vector<21x64xbf16> to vector<20x64xbf16>
    %c1_415 = arith.constant 1 : index
    %c0_416 = arith.constant 0 : index
    %c0_417 = arith.constant 0 : index
    %472 = vector.load %arg2[%c1_415, %c0_416, %c0_417] : memref<4x64x32xbf16, #tpu.memory_space<vmem>>, vector<1x64x32xbf16>
    %473 = vector.shape_cast %472 : vector<1x64x32xbf16> to vector<64x32xbf16>
    %cst_418 = arith.constant dense<0.000000e+00> : vector<20x32xf32>
    %474 = tpu.matmul %471, %473, %cst_418 {dimension_numbers = #tpu.dot_dimension_numbers<[1], [0], [0], [1], [0, 0, 1, 1], [], []>} : vector<20x64xbf16>, vector<64x32xbf16>, vector<20x32xf32> -> vector<20x32xf32>
    %475 = arith.addf %470, %474 : vector<20x32xf32>
    %c0_419 = arith.constant 0 : index
    %c15 = arith.constant 15 : index
    %c0_420 = arith.constant 0 : index
    %c0_421 = arith.constant 0 : index
    %476 = vector.load %arg1[%c0_419, %c15, %c0_420, %c0_421] : memref<1x21x21x64xbf16, #tpu.memory_space<vmem>>, vector<1x1x21x64xbf16>
    %477 = vector.shape_cast %476 : vector<1x1x21x64xbf16> to vector<21x64xbf16>
    %478 = vector.extract_strided_slice %477 {offsets = [0, 0], sizes = [20, 64], strides = [1, 1]} : vector<21x64xbf16> to vector<20x64xbf16>
    %c2_422 = arith.constant 2 : index
    %c0_423 = arith.constant 0 : index
    %c0_424 = arith.constant 0 : index
    %479 = vector.load %arg2[%c2_422, %c0_423, %c0_424] : memref<4x64x32xbf16, #tpu.memory_space<vmem>>, vector<1x64x32xbf16>
    %480 = vector.shape_cast %479 : vector<1x64x32xbf16> to vector<64x32xbf16>
    %cst_425 = arith.constant dense<0.000000e+00> : vector<20x32xf32>
    %481 = tpu.matmul %478, %480, %cst_425 {dimension_numbers = #tpu.dot_dimension_numbers<[1], [0], [0], [1], [0, 0, 1, 1], [], []>} : vector<20x64xbf16>, vector<64x32xbf16>, vector<20x32xf32> -> vector<20x32xf32>
    %482 = arith.addf %475, %481 : vector<20x32xf32>
    %483 = vector.extract_strided_slice %477 {offsets = [1, 0], sizes = [20, 64], strides = [1, 1]} : vector<21x64xbf16> to vector<20x64xbf16>
    %c3_426 = arith.constant 3 : index
    %c0_427 = arith.constant 0 : index
    %c0_428 = arith.constant 0 : index
    %484 = vector.load %arg2[%c3_426, %c0_427, %c0_428] : memref<4x64x32xbf16, #tpu.memory_space<vmem>>, vector<1x64x32xbf16>
    %485 = vector.shape_cast %484 : vector<1x64x32xbf16> to vector<64x32xbf16>
    %cst_429 = arith.constant dense<0.000000e+00> : vector<20x32xf32>
    %486 = tpu.matmul %483, %485, %cst_429 {dimension_numbers = #tpu.dot_dimension_numbers<[1], [0], [0], [1], [0, 0, 1, 1], [], []>} : vector<20x64xbf16>, vector<64x32xbf16>, vector<20x32xf32> -> vector<20x32xf32>
    %487 = arith.addf %482, %486 : vector<20x32xf32>
    %488 = vector.broadcast %0 : vector<1x32xf32> to vector<20x32xf32>
    %489 = arith.addf %487, %488 : vector<20x32xf32>
    %cst_430 = arith.constant 0.000000e+00 : f32
    %490 = vector.broadcast %cst_430 : f32 to vector<20x32xf32>
    %491 = arith.maximumf %489, %490 : vector<20x32xf32>
    %492 = arith.truncf %491 : vector<20x32xf32> to vector<20x32xbf16>
    %c0_431 = arith.constant 0 : index
    %c14_432 = arith.constant 14 : index
    %c0_433 = arith.constant 0 : index
    %c0_434 = arith.constant 0 : index
    %493 = vector.load %arg4[%c0_431, %c14_432, %c0_433, %c0_434] : memref<1x20x20x32xbf16, #tpu.memory_space<vmem>>, vector<1x1x20x32xbf16>
    %494 = vector.shape_cast %493 : vector<1x1x20x32xbf16> to vector<20x32xbf16>
    %495 = vector.shape_cast %492 : vector<20x32xbf16> to vector<1x1x20x32xbf16>
    tpu.vector_store %arg4[%c0_431, %c14_432, %c0_433, %c0_434], %495 {strides = array<i32>} : memref<1x20x20x32xbf16, #tpu.memory_space<vmem>>, vector<1x1x20x32xbf16>,
    %cst_435 = arith.constant 0.000000e+00 : f32
    %496 = vector.broadcast %cst_435 : f32 to vector<20x32xf32>
    %c0_436 = arith.constant 0 : index
    %c15_437 = arith.constant 15 : index
    %c0_438 = arith.constant 0 : index
    %c0_439 = arith.constant 0 : index
    %497 = vector.load %arg1[%c0_436, %c15_437, %c0_438, %c0_439] : memref<1x21x21x64xbf16, #tpu.memory_space<vmem>>, vector<1x1x21x64xbf16>
    %498 = vector.shape_cast %497 : vector<1x1x21x64xbf16> to vector<21x64xbf16>
    %499 = vector.extract_strided_slice %498 {offsets = [0, 0], sizes = [20, 64], strides = [1, 1]} : vector<21x64xbf16> to vector<20x64xbf16>
    %c0_440 = arith.constant 0 : index
    %c0_441 = arith.constant 0 : index
    %c0_442 = arith.constant 0 : index
    %500 = vector.load %arg2[%c0_440, %c0_441, %c0_442] : memref<4x64x32xbf16, #tpu.memory_space<vmem>>, vector<1x64x32xbf16>
    %501 = vector.shape_cast %500 : vector<1x64x32xbf16> to vector<64x32xbf16>
    %cst_443 = arith.constant dense<0.000000e+00> : vector<20x32xf32>
    %502 = tpu.matmul %499, %501, %cst_443 {dimension_numbers = #tpu.dot_dimension_numbers<[1], [0], [0], [1], [0, 0, 1, 1], [], []>} : vector<20x64xbf16>, vector<64x32xbf16>, vector<20x32xf32> -> vector<20x32xf32>
    %503 = arith.addf %496, %502 : vector<20x32xf32>
    %504 = vector.extract_strided_slice %498 {offsets = [1, 0], sizes = [20, 64], strides = [1, 1]} : vector<21x64xbf16> to vector<20x64xbf16>
    %c1_444 = arith.constant 1 : index
    %c0_445 = arith.constant 0 : index
    %c0_446 = arith.constant 0 : index
    %505 = vector.load %arg2[%c1_444, %c0_445, %c0_446] : memref<4x64x32xbf16, #tpu.memory_space<vmem>>, vector<1x64x32xbf16>
    %506 = vector.shape_cast %505 : vector<1x64x32xbf16> to vector<64x32xbf16>
    %cst_447 = arith.constant dense<0.000000e+00> : vector<20x32xf32>
    %507 = tpu.matmul %504, %506, %cst_447 {dimension_numbers = #tpu.dot_dimension_numbers<[1], [0], [0], [1], [0, 0, 1, 1], [], []>} : vector<20x64xbf16>, vector<64x32xbf16>, vector<20x32xf32> -> vector<20x32xf32>
    %508 = arith.addf %503, %507 : vector<20x32xf32>
    %c0_448 = arith.constant 0 : index
    %c16 = arith.constant 16 : index
    %c0_449 = arith.constant 0 : index
    %c0_450 = arith.constant 0 : index
    %509 = vector.load %arg1[%c0_448, %c16, %c0_449, %c0_450] : memref<1x21x21x64xbf16, #tpu.memory_space<vmem>>, vector<1x1x21x64xbf16>
    %510 = vector.shape_cast %509 : vector<1x1x21x64xbf16> to vector<21x64xbf16>
    %511 = vector.extract_strided_slice %510 {offsets = [0, 0], sizes = [20, 64], strides = [1, 1]} : vector<21x64xbf16> to vector<20x64xbf16>
    %c2_451 = arith.constant 2 : index
    %c0_452 = arith.constant 0 : index
    %c0_453 = arith.constant 0 : index
    %512 = vector.load %arg2[%c2_451, %c0_452, %c0_453] : memref<4x64x32xbf16, #tpu.memory_space<vmem>>, vector<1x64x32xbf16>
    %513 = vector.shape_cast %512 : vector<1x64x32xbf16> to vector<64x32xbf16>
    %cst_454 = arith.constant dense<0.000000e+00> : vector<20x32xf32>
    %514 = tpu.matmul %511, %513, %cst_454 {dimension_numbers = #tpu.dot_dimension_numbers<[1], [0], [0], [1], [0, 0, 1, 1], [], []>} : vector<20x64xbf16>, vector<64x32xbf16>, vector<20x32xf32> -> vector<20x32xf32>
    %515 = arith.addf %508, %514 : vector<20x32xf32>
    %516 = vector.extract_strided_slice %510 {offsets = [1, 0], sizes = [20, 64], strides = [1, 1]} : vector<21x64xbf16> to vector<20x64xbf16>
    %c3_455 = arith.constant 3 : index
    %c0_456 = arith.constant 0 : index
    %c0_457 = arith.constant 0 : index
    %517 = vector.load %arg2[%c3_455, %c0_456, %c0_457] : memref<4x64x32xbf16, #tpu.memory_space<vmem>>, vector<1x64x32xbf16>
    %518 = vector.shape_cast %517 : vector<1x64x32xbf16> to vector<64x32xbf16>
    %cst_458 = arith.constant dense<0.000000e+00> : vector<20x32xf32>
    %519 = tpu.matmul %516, %518, %cst_458 {dimension_numbers = #tpu.dot_dimension_numbers<[1], [0], [0], [1], [0, 0, 1, 1], [], []>} : vector<20x64xbf16>, vector<64x32xbf16>, vector<20x32xf32> -> vector<20x32xf32>
    %520 = arith.addf %515, %519 : vector<20x32xf32>
    %521 = vector.broadcast %0 : vector<1x32xf32> to vector<20x32xf32>
    %522 = arith.addf %520, %521 : vector<20x32xf32>
    %cst_459 = arith.constant 0.000000e+00 : f32
    %523 = vector.broadcast %cst_459 : f32 to vector<20x32xf32>
    %524 = arith.maximumf %522, %523 : vector<20x32xf32>
    %525 = arith.truncf %524 : vector<20x32xf32> to vector<20x32xbf16>
    %c0_460 = arith.constant 0 : index
    %c15_461 = arith.constant 15 : index
    %c0_462 = arith.constant 0 : index
    %c0_463 = arith.constant 0 : index
    %526 = vector.load %arg4[%c0_460, %c15_461, %c0_462, %c0_463] : memref<1x20x20x32xbf16, #tpu.memory_space<vmem>>, vector<1x1x20x32xbf16>
    %527 = vector.shape_cast %526 : vector<1x1x20x32xbf16> to vector<20x32xbf16>
    %528 = vector.shape_cast %525 : vector<20x32xbf16> to vector<1x1x20x32xbf16>
    tpu.vector_store %arg4[%c0_460, %c15_461, %c0_462, %c0_463], %528 {strides = array<i32>} : memref<1x20x20x32xbf16, #tpu.memory_space<vmem>>, vector<1x1x20x32xbf16>,
    %cst_464 = arith.constant 0.000000e+00 : f32
    %529 = vector.broadcast %cst_464 : f32 to vector<20x32xf32>
    %c0_465 = arith.constant 0 : index
    %c16_466 = arith.constant 16 : index
    %c0_467 = arith.constant 0 : index
    %c0_468 = arith.constant 0 : index
    %530 = vector.load %arg1[%c0_465, %c16_466, %c0_467, %c0_468] : memref<1x21x21x64xbf16, #tpu.memory_space<vmem>>, vector<1x1x21x64xbf16>
    %531 = vector.shape_cast %530 : vector<1x1x21x64xbf16> to vector<21x64xbf16>
    %532 = vector.extract_strided_slice %531 {offsets = [0, 0], sizes = [20, 64], strides = [1, 1]} : vector<21x64xbf16> to vector<20x64xbf16>
    %c0_469 = arith.constant 0 : index
    %c0_470 = arith.constant 0 : index
    %c0_471 = arith.constant 0 : index
    %533 = vector.load %arg2[%c0_469, %c0_470, %c0_471] : memref<4x64x32xbf16, #tpu.memory_space<vmem>>, vector<1x64x32xbf16>
    %534 = vector.shape_cast %533 : vector<1x64x32xbf16> to vector<64x32xbf16>
    %cst_472 = arith.constant dense<0.000000e+00> : vector<20x32xf32>
    %535 = tpu.matmul %532, %534, %cst_472 {dimension_numbers = #tpu.dot_dimension_numbers<[1], [0], [0], [1], [0, 0, 1, 1], [], []>} : vector<20x64xbf16>, vector<64x32xbf16>, vector<20x32xf32> -> vector<20x32xf32>
    %536 = arith.addf %529, %535 : vector<20x32xf32>
    %537 = vector.extract_strided_slice %531 {offsets = [1, 0], sizes = [20, 64], strides = [1, 1]} : vector<21x64xbf16> to vector<20x64xbf16>
    %c1_473 = arith.constant 1 : index
    %c0_474 = arith.constant 0 : index
    %c0_475 = arith.constant 0 : index
    %538 = vector.load %arg2[%c1_473, %c0_474, %c0_475] : memref<4x64x32xbf16, #tpu.memory_space<vmem>>, vector<1x64x32xbf16>
    %539 = vector.shape_cast %538 : vector<1x64x32xbf16> to vector<64x32xbf16>
    %cst_476 = arith.constant dense<0.000000e+00> : vector<20x32xf32>
    %540 = tpu.matmul %537, %539, %cst_476 {dimension_numbers = #tpu.dot_dimension_numbers<[1], [0], [0], [1], [0, 0, 1, 1], [], []>} : vector<20x64xbf16>, vector<64x32xbf16>, vector<20x32xf32> -> vector<20x32xf32>
    %541 = arith.addf %536, %540 : vector<20x32xf32>
    %c0_477 = arith.constant 0 : index
    %c17 = arith.constant 17 : index
    %c0_478 = arith.constant 0 : index
    %c0_479 = arith.constant 0 : index
    %542 = vector.load %arg1[%c0_477, %c17, %c0_478, %c0_479] : memref<1x21x21x64xbf16, #tpu.memory_space<vmem>>, vector<1x1x21x64xbf16>
    %543 = vector.shape_cast %542 : vector<1x1x21x64xbf16> to vector<21x64xbf16>
    %544 = vector.extract_strided_slice %543 {offsets = [0, 0], sizes = [20, 64], strides = [1, 1]} : vector<21x64xbf16> to vector<20x64xbf16>
    %c2_480 = arith.constant 2 : index
    %c0_481 = arith.constant 0 : index
    %c0_482 = arith.constant 0 : index
    %545 = vector.load %arg2[%c2_480, %c0_481, %c0_482] : memref<4x64x32xbf16, #tpu.memory_space<vmem>>, vector<1x64x32xbf16>
    %546 = vector.shape_cast %545 : vector<1x64x32xbf16> to vector<64x32xbf16>
    %cst_483 = arith.constant dense<0.000000e+00> : vector<20x32xf32>
    %547 = tpu.matmul %544, %546, %cst_483 {dimension_numbers = #tpu.dot_dimension_numbers<[1], [0], [0], [1], [0, 0, 1, 1], [], []>} : vector<20x64xbf16>, vector<64x32xbf16>, vector<20x32xf32> -> vector<20x32xf32>
    %548 = arith.addf %541, %547 : vector<20x32xf32>
    %549 = vector.extract_strided_slice %543 {offsets = [1, 0], sizes = [20, 64], strides = [1, 1]} : vector<21x64xbf16> to vector<20x64xbf16>
    %c3_484 = arith.constant 3 : index
    %c0_485 = arith.constant 0 : index
    %c0_486 = arith.constant 0 : index
    %550 = vector.load %arg2[%c3_484, %c0_485, %c0_486] : memref<4x64x32xbf16, #tpu.memory_space<vmem>>, vector<1x64x32xbf16>
    %551 = vector.shape_cast %550 : vector<1x64x32xbf16> to vector<64x32xbf16>
    %cst_487 = arith.constant dense<0.000000e+00> : vector<20x32xf32>
    %552 = tpu.matmul %549, %551, %cst_487 {dimension_numbers = #tpu.dot_dimension_numbers<[1], [0], [0], [1], [0, 0, 1, 1], [], []>} : vector<20x64xbf16>, vector<64x32xbf16>, vector<20x32xf32> -> vector<20x32xf32>
    %553 = arith.addf %548, %552 : vector<20x32xf32>
    %554 = vector.broadcast %0 : vector<1x32xf32> to vector<20x32xf32>
    %555 = arith.addf %553, %554 : vector<20x32xf32>
    %cst_488 = arith.constant 0.000000e+00 : f32
    %556 = vector.broadcast %cst_488 : f32 to vector<20x32xf32>
    %557 = arith.maximumf %555, %556 : vector<20x32xf32>
    %558 = arith.truncf %557 : vector<20x32xf32> to vector<20x32xbf16>
    %c0_489 = arith.constant 0 : index
    %c16_490 = arith.constant 16 : index
    %c0_491 = arith.constant 0 : index
    %c0_492 = arith.constant 0 : index
    %559 = vector.load %arg4[%c0_489, %c16_490, %c0_491, %c0_492] : memref<1x20x20x32xbf16, #tpu.memory_space<vmem>>, vector<1x1x20x32xbf16>
    %560 = vector.shape_cast %559 : vector<1x1x20x32xbf16> to vector<20x32xbf16>
    %561 = vector.shape_cast %558 : vector<20x32xbf16> to vector<1x1x20x32xbf16>
    tpu.vector_store %arg4[%c0_489, %c16_490, %c0_491, %c0_492], %561 {strides = array<i32>} : memref<1x20x20x32xbf16, #tpu.memory_space<vmem>>, vector<1x1x20x32xbf16>,
    %cst_493 = arith.constant 0.000000e+00 : f32
    %562 = vector.broadcast %cst_493 : f32 to vector<20x32xf32>
    %c0_494 = arith.constant 0 : index
    %c17_495 = arith.constant 17 : index
    %c0_496 = arith.constant 0 : index
    %c0_497 = arith.constant 0 : index
    %563 = vector.load %arg1[%c0_494, %c17_495, %c0_496, %c0_497] : memref<1x21x21x64xbf16, #tpu.memory_space<vmem>>, vector<1x1x21x64xbf16>
    %564 = vector.shape_cast %563 : vector<1x1x21x64xbf16> to vector<21x64xbf16>
    %565 = vector.extract_strided_slice %564 {offsets = [0, 0], sizes = [20, 64], strides = [1, 1]} : vector<21x64xbf16> to vector<20x64xbf16>
    %c0_498 = arith.constant 0 : index
    %c0_499 = arith.constant 0 : index
    %c0_500 = arith.constant 0 : index
    %566 = vector.load %arg2[%c0_498, %c0_499, %c0_500] : memref<4x64x32xbf16, #tpu.memory_space<vmem>>, vector<1x64x32xbf16>
    %567 = vector.shape_cast %566 : vector<1x64x32xbf16> to vector<64x32xbf16>
    %cst_501 = arith.constant dense<0.000000e+00> : vector<20x32xf32>
    %568 = tpu.matmul %565, %567, %cst_501 {dimension_numbers = #tpu.dot_dimension_numbers<[1], [0], [0], [1], [0, 0, 1, 1], [], []>} : vector<20x64xbf16>, vector<64x32xbf16>, vector<20x32xf32> -> vector<20x32xf32>
    %569 = arith.addf %562, %568 : vector<20x32xf32>
    %570 = vector.extract_strided_slice %564 {offsets = [1, 0], sizes = [20, 64], strides = [1, 1]} : vector<21x64xbf16> to vector<20x64xbf16>
    %c1_502 = arith.constant 1 : index
    %c0_503 = arith.constant 0 : index
    %c0_504 = arith.constant 0 : index
    %571 = vector.load %arg2[%c1_502, %c0_503, %c0_504] : memref<4x64x32xbf16, #tpu.memory_space<vmem>>, vector<1x64x32xbf16>
    %572 = vector.shape_cast %571 : vector<1x64x32xbf16> to vector<64x32xbf16>
    %cst_505 = arith.constant dense<0.000000e+00> : vector<20x32xf32>
    %573 = tpu.matmul %570, %572, %cst_505 {dimension_numbers = #tpu.dot_dimension_numbers<[1], [0], [0], [1], [0, 0, 1, 1], [], []>} : vector<20x64xbf16>, vector<64x32xbf16>, vector<20x32xf32> -> vector<20x32xf32>
    %574 = arith.addf %569, %573 : vector<20x32xf32>
    %c0_506 = arith.constant 0 : index
    %c18 = arith.constant 18 : index
    %c0_507 = arith.constant 0 : index
    %c0_508 = arith.constant 0 : index
    %575 = vector.load %arg1[%c0_506, %c18, %c0_507, %c0_508] : memref<1x21x21x64xbf16, #tpu.memory_space<vmem>>, vector<1x1x21x64xbf16>
    %576 = vector.shape_cast %575 : vector<1x1x21x64xbf16> to vector<21x64xbf16>
    %577 = vector.extract_strided_slice %576 {offsets = [0, 0], sizes = [20, 64], strides = [1, 1]} : vector<21x64xbf16> to vector<20x64xbf16>
    %c2_509 = arith.constant 2 : index
    %c0_510 = arith.constant 0 : index
    %c0_511 = arith.constant 0 : index
    %578 = vector.load %arg2[%c2_509, %c0_510, %c0_511] : memref<4x64x32xbf16, #tpu.memory_space<vmem>>, vector<1x64x32xbf16>
    %579 = vector.shape_cast %578 : vector<1x64x32xbf16> to vector<64x32xbf16>
    %cst_512 = arith.constant dense<0.000000e+00> : vector<20x32xf32>
    %580 = tpu.matmul %577, %579, %cst_512 {dimension_numbers = #tpu.dot_dimension_numbers<[1], [0], [0], [1], [0, 0, 1, 1], [], []>} : vector<20x64xbf16>, vector<64x32xbf16>, vector<20x32xf32> -> vector<20x32xf32>
    %581 = arith.addf %574, %580 : vector<20x32xf32>
    %582 = vector.extract_strided_slice %576 {offsets = [1, 0], sizes = [20, 64], strides = [1, 1]} : vector<21x64xbf16> to vector<20x64xbf16>
    %c3_513 = arith.constant 3 : index
    %c0_514 = arith.constant 0 : index
    %c0_515 = arith.constant 0 : index
    %583 = vector.load %arg2[%c3_513, %c0_514, %c0_515] : memref<4x64x32xbf16, #tpu.memory_space<vmem>>, vector<1x64x32xbf16>
    %584 = vector.shape_cast %583 : vector<1x64x32xbf16> to vector<64x32xbf16>
    %cst_516 = arith.constant dense<0.000000e+00> : vector<20x32xf32>
    %585 = tpu.matmul %582, %584, %cst_516 {dimension_numbers = #tpu.dot_dimension_numbers<[1], [0], [0], [1], [0, 0, 1, 1], [], []>} : vector<20x64xbf16>, vector<64x32xbf16>, vector<20x32xf32> -> vector<20x32xf32>
    %586 = arith.addf %581, %585 : vector<20x32xf32>
    %587 = vector.broadcast %0 : vector<1x32xf32> to vector<20x32xf32>
    %588 = arith.addf %586, %587 : vector<20x32xf32>
    %cst_517 = arith.constant 0.000000e+00 : f32
    %589 = vector.broadcast %cst_517 : f32 to vector<20x32xf32>
    %590 = arith.maximumf %588, %589 : vector<20x32xf32>
    %591 = arith.truncf %590 : vector<20x32xf32> to vector<20x32xbf16>
    %c0_518 = arith.constant 0 : index
    %c17_519 = arith.constant 17 : index
    %c0_520 = arith.constant 0 : index
    %c0_521 = arith.constant 0 : index
    %592 = vector.load %arg4[%c0_518, %c17_519, %c0_520, %c0_521] : memref<1x20x20x32xbf16, #tpu.memory_space<vmem>>, vector<1x1x20x32xbf16>
    %593 = vector.shape_cast %592 : vector<1x1x20x32xbf16> to vector<20x32xbf16>
    %594 = vector.shape_cast %591 : vector<20x32xbf16> to vector<1x1x20x32xbf16>
    tpu.vector_store %arg4[%c0_518, %c17_519, %c0_520, %c0_521], %594 {strides = array<i32>} : memref<1x20x20x32xbf16, #tpu.memory_space<vmem>>, vector<1x1x20x32xbf16>,
    %cst_522 = arith.constant 0.000000e+00 : f32
    %595 = vector.broadcast %cst_522 : f32 to vector<20x32xf32>
    %c0_523 = arith.constant 0 : index
    %c18_524 = arith.constant 18 : index
    %c0_525 = arith.constant 0 : index
    %c0_526 = arith.constant 0 : index
    %596 = vector.load %arg1[%c0_523, %c18_524, %c0_525, %c0_526] : memref<1x21x21x64xbf16, #tpu.memory_space<vmem>>, vector<1x1x21x64xbf16>
    %597 = vector.shape_cast %596 : vector<1x1x21x64xbf16> to vector<21x64xbf16>
    %598 = vector.extract_strided_slice %597 {offsets = [0, 0], sizes = [20, 64], strides = [1, 1]} : vector<21x64xbf16> to vector<20x64xbf16>
    %c0_527 = arith.constant 0 : index
    %c0_528 = arith.constant 0 : index
    %c0_529 = arith.constant 0 : index
    %599 = vector.load %arg2[%c0_527, %c0_528, %c0_529] : memref<4x64x32xbf16, #tpu.memory_space<vmem>>, vector<1x64x32xbf16>
    %600 = vector.shape_cast %599 : vector<1x64x32xbf16> to vector<64x32xbf16>
    %cst_530 = arith.constant dense<0.000000e+00> : vector<20x32xf32>
    %601 = tpu.matmul %598, %600, %cst_530 {dimension_numbers = #tpu.dot_dimension_numbers<[1], [0], [0], [1], [0, 0, 1, 1], [], []>} : vector<20x64xbf16>, vector<64x32xbf16>, vector<20x32xf32> -> vector<20x32xf32>
    %602 = arith.addf %595, %601 : vector<20x32xf32>
    %603 = vector.extract_strided_slice %597 {offsets = [1, 0], sizes = [20, 64], strides = [1, 1]} : vector<21x64xbf16> to vector<20x64xbf16>
    %c1_531 = arith.constant 1 : index
    %c0_532 = arith.constant 0 : index
    %c0_533 = arith.constant 0 : index
    %604 = vector.load %arg2[%c1_531, %c0_532, %c0_533] : memref<4x64x32xbf16, #tpu.memory_space<vmem>>, vector<1x64x32xbf16>
    %605 = vector.shape_cast %604 : vector<1x64x32xbf16> to vector<64x32xbf16>
    %cst_534 = arith.constant dense<0.000000e+00> : vector<20x32xf32>
    %606 = tpu.matmul %603, %605, %cst_534 {dimension_numbers = #tpu.dot_dimension_numbers<[1], [0], [0], [1], [0, 0, 1, 1], [], []>} : vector<20x64xbf16>, vector<64x32xbf16>, vector<20x32xf32> -> vector<20x32xf32>
    %607 = arith.addf %602, %606 : vector<20x32xf32>
    %c0_535 = arith.constant 0 : index
    %c19 = arith.constant 19 : index
    %c0_536 = arith.constant 0 : index
    %c0_537 = arith.constant 0 : index
    %608 = vector.load %arg1[%c0_535, %c19, %c0_536, %c0_537] : memref<1x21x21x64xbf16, #tpu.memory_space<vmem>>, vector<1x1x21x64xbf16>
    %609 = vector.shape_cast %608 : vector<1x1x21x64xbf16> to vector<21x64xbf16>
    %610 = vector.extract_strided_slice %609 {offsets = [0, 0], sizes = [20, 64], strides = [1, 1]} : vector<21x64xbf16> to vector<20x64xbf16>
    %c2_538 = arith.constant 2 : index
    %c0_539 = arith.constant 0 : index
    %c0_540 = arith.constant 0 : index
    %611 = vector.load %arg2[%c2_538, %c0_539, %c0_540] : memref<4x64x32xbf16, #tpu.memory_space<vmem>>, vector<1x64x32xbf16>
    %612 = vector.shape_cast %611 : vector<1x64x32xbf16> to vector<64x32xbf16>
    %cst_541 = arith.constant dense<0.000000e+00> : vector<20x32xf32>
    %613 = tpu.matmul %610, %612, %cst_541 {dimension_numbers = #tpu.dot_dimension_numbers<[1], [0], [0], [1], [0, 0, 1, 1], [], []>} : vector<20x64xbf16>, vector<64x32xbf16>, vector<20x32xf32> -> vector<20x32xf32>
    %614 = arith.addf %607, %613 : vector<20x32xf32>
    %615 = vector.extract_strided_slice %609 {offsets = [1, 0], sizes = [20, 64], strides = [1, 1]} : vector<21x64xbf16> to vector<20x64xbf16>
    %c3_542 = arith.constant 3 : index
    %c0_543 = arith.constant 0 : index
    %c0_544 = arith.constant 0 : index
    %616 = vector.load %arg2[%c3_542, %c0_543, %c0_544] : memref<4x64x32xbf16, #tpu.memory_space<vmem>>, vector<1x64x32xbf16>
    %617 = vector.shape_cast %616 : vector<1x64x32xbf16> to vector<64x32xbf16>
    %cst_545 = arith.constant dense<0.000000e+00> : vector<20x32xf32>
    %618 = tpu.matmul %615, %617, %cst_545 {dimension_numbers = #tpu.dot_dimension_numbers<[1], [0], [0], [1], [0, 0, 1, 1], [], []>} : vector<20x64xbf16>, vector<64x32xbf16>, vector<20x32xf32> -> vector<20x32xf32>
    %619 = arith.addf %614, %618 : vector<20x32xf32>
    %620 = vector.broadcast %0 : vector<1x32xf32> to vector<20x32xf32>
    %621 = arith.addf %619, %620 : vector<20x32xf32>
    %cst_546 = arith.constant 0.000000e+00 : f32
    %622 = vector.broadcast %cst_546 : f32 to vector<20x32xf32>
    %623 = arith.maximumf %621, %622 : vector<20x32xf32>
    %624 = arith.truncf %623 : vector<20x32xf32> to vector<20x32xbf16>
    %c0_547 = arith.constant 0 : index
    %c18_548 = arith.constant 18 : index
    %c0_549 = arith.constant 0 : index
    %c0_550 = arith.constant 0 : index
    %625 = vector.load %arg4[%c0_547, %c18_548, %c0_549, %c0_550] : memref<1x20x20x32xbf16, #tpu.memory_space<vmem>>, vector<1x1x20x32xbf16>
    %626 = vector.shape_cast %625 : vector<1x1x20x32xbf16> to vector<20x32xbf16>
    %627 = vector.shape_cast %624 : vector<20x32xbf16> to vector<1x1x20x32xbf16>
    tpu.vector_store %arg4[%c0_547, %c18_548, %c0_549, %c0_550], %627 {strides = array<i32>} : memref<1x20x20x32xbf16, #tpu.memory_space<vmem>>, vector<1x1x20x32xbf16>,
    %cst_551 = arith.constant 0.000000e+00 : f32
    %628 = vector.broadcast %cst_551 : f32 to vector<20x32xf32>
    %c0_552 = arith.constant 0 : index
    %c19_553 = arith.constant 19 : index
    %c0_554 = arith.constant 0 : index
    %c0_555 = arith.constant 0 : index
    %629 = vector.load %arg1[%c0_552, %c19_553, %c0_554, %c0_555] : memref<1x21x21x64xbf16, #tpu.memory_space<vmem>>, vector<1x1x21x64xbf16>
    %630 = vector.shape_cast %629 : vector<1x1x21x64xbf16> to vector<21x64xbf16>
    %631 = vector.extract_strided_slice %630 {offsets = [0, 0], sizes = [20, 64], strides = [1, 1]} : vector<21x64xbf16> to vector<20x64xbf16>
    %c0_556 = arith.constant 0 : index
    %c0_557 = arith.constant 0 : index
    %c0_558 = arith.constant 0 : index
    %632 = vector.load %arg2[%c0_556, %c0_557, %c0_558] : memref<4x64x32xbf16, #tpu.memory_space<vmem>>, vector<1x64x32xbf16>
    %633 = vector.shape_cast %632 : vector<1x64x32xbf16> to vector<64x32xbf16>
    %cst_559 = arith.constant dense<0.000000e+00> : vector<20x32xf32>
    %634 = tpu.matmul %631, %633, %cst_559 {dimension_numbers = #tpu.dot_dimension_numbers<[1], [0], [0], [1], [0, 0, 1, 1], [], []>} : vector<20x64xbf16>, vector<64x32xbf16>, vector<20x32xf32> -> vector<20x32xf32>
    %635 = arith.addf %628, %634 : vector<20x32xf32>
    %636 = vector.extract_strided_slice %630 {offsets = [1, 0], sizes = [20, 64], strides = [1, 1]} : vector<21x64xbf16> to vector<20x64xbf16>
    %c1_560 = arith.constant 1 : index
    %c0_561 = arith.constant 0 : index
    %c0_562 = arith.constant 0 : index
    %637 = vector.load %arg2[%c1_560, %c0_561, %c0_562] : memref<4x64x32xbf16, #tpu.memory_space<vmem>>, vector<1x64x32xbf16>
    %638 = vector.shape_cast %637 : vector<1x64x32xbf16> to vector<64x32xbf16>
    %cst_563 = arith.constant dense<0.000000e+00> : vector<20x32xf32>
    %639 = tpu.matmul %636, %638, %cst_563 {dimension_numbers = #tpu.dot_dimension_numbers<[1], [0], [0], [1], [0, 0, 1, 1], [], []>} : vector<20x64xbf16>, vector<64x32xbf16>, vector<20x32xf32> -> vector<20x32xf32>
    %640 = arith.addf %635, %639 : vector<20x32xf32>
    %c0_564 = arith.constant 0 : index
    %c20 = arith.constant 20 : index
    %c0_565 = arith.constant 0 : index
    %c0_566 = arith.constant 0 : index
    %641 = vector.load %arg1[%c0_564, %c20, %c0_565, %c0_566] : memref<1x21x21x64xbf16, #tpu.memory_space<vmem>>, vector<1x1x21x64xbf16>
    %642 = vector.shape_cast %641 : vector<1x1x21x64xbf16> to vector<21x64xbf16>
    %643 = vector.extract_strided_slice %642 {offsets = [0, 0], sizes = [20, 64], strides = [1, 1]} : vector<21x64xbf16> to vector<20x64xbf16>
    %c2_567 = arith.constant 2 : index
    %c0_568 = arith.constant 0 : index
    %c0_569 = arith.constant 0 : index
    %644 = vector.load %arg2[%c2_567, %c0_568, %c0_569] : memref<4x64x32xbf16, #tpu.memory_space<vmem>>, vector<1x64x32xbf16>
    %645 = vector.shape_cast %644 : vector<1x64x32xbf16> to vector<64x32xbf16>
    %cst_570 = arith.constant dense<0.000000e+00> : vector<20x32xf32>
    %646 = tpu.matmul %643, %645, %cst_570 {dimension_numbers = #tpu.dot_dimension_numbers<[1], [0], [0], [1], [0, 0, 1, 1], [], []>} : vector<20x64xbf16>, vector<64x32xbf16>, vector<20x32xf32> -> vector<20x32xf32>
    %647 = arith.addf %640, %646 : vector<20x32xf32>
    %648 = vector.extract_strided_slice %642 {offsets = [1, 0], sizes = [20, 64], strides = [1, 1]} : vector<21x64xbf16> to vector<20x64xbf16>
    %c3_571 = arith.constant 3 : index
    %c0_572 = arith.constant 0 : index
    %c0_573 = arith.constant 0 : index
    %649 = vector.load %arg2[%c3_571, %c0_572, %c0_573] : memref<4x64x32xbf16, #tpu.memory_space<vmem>>, vector<1x64x32xbf16>
    %650 = vector.shape_cast %649 : vector<1x64x32xbf16> to vector<64x32xbf16>
    %cst_574 = arith.constant dense<0.000000e+00> : vector<20x32xf32>
    %651 = tpu.matmul %648, %650, %cst_574 {dimension_numbers = #tpu.dot_dimension_numbers<[1], [0], [0], [1], [0, 0, 1, 1], [], []>} : vector<20x64xbf16>, vector<64x32xbf16>, vector<20x32xf32> -> vector<20x32xf32>
    %652 = arith.addf %647, %651 : vector<20x32xf32>
    %653 = vector.broadcast %0 : vector<1x32xf32> to vector<20x32xf32>
    %654 = arith.addf %652, %653 : vector<20x32xf32>
    %cst_575 = arith.constant 0.000000e+00 : f32
    %655 = vector.broadcast %cst_575 : f32 to vector<20x32xf32>
    %656 = arith.maximumf %654, %655 : vector<20x32xf32>
    %657 = arith.truncf %656 : vector<20x32xf32> to vector<20x32xbf16>
    %c0_576 = arith.constant 0 : index
    %c19_577 = arith.constant 19 : index
    %c0_578 = arith.constant 0 : index
    %c0_579 = arith.constant 0 : index
    %658 = vector.load %arg4[%c0_576, %c19_577, %c0_578, %c0_579] : memref<1x20x20x32xbf16, #tpu.memory_space<vmem>>, vector<1x1x20x32xbf16>
    %659 = vector.shape_cast %658 : vector<1x1x20x32xbf16> to vector<20x32xbf16>
    %660 = vector.shape_cast %657 : vector<20x32xbf16> to vector<1x1x20x32xbf16>
    tpu.vector_store %arg4[%c0_576, %c19_577, %c0_578, %c0_579], %660 {strides = array<i32>} : memref<1x20x20x32xbf16, #tpu.memory_space<vmem>>, vector<1x1x20x32xbf16>,
    return
  }
  func.func @transform_0(%arg0: i32) -> (i32, i32, i32, i32) {
    %c0_i32 = arith.constant 0 : i32
    %c0_i32_0 = arith.constant 0 : i32
    %c0_i32_1 = arith.constant 0 : i32
    %c0_i32_2 = arith.constant 0 : i32
    return %arg0, %c0_i32, %c0_i32_0, %c0_i32_1 : i32, i32, i32, i32
  }
  func.func @transform_1(%arg0: i32) -> (i32, i32, i32) {
    %c0_i32 = arith.constant 0 : i32
    %c0_i32_0 = arith.constant 0 : i32
    %c0_i32_1 = arith.constant 0 : i32
    %c0_i32_2 = arith.constant 0 : i32
    return %c0_i32, %c0_i32_0, %c0_i32_1 : i32, i32, i32
  }
  func.func @transform_2(%arg0: i32) -> (i32, i32) {
    %c0_i32 = arith.constant 0 : i32
    %c0_i32_0 = arith.constant 0 : i32
    %c0_i32_1 = arith.constant 0 : i32
    return %c0_i32, %c0_i32_0 : i32, i32
  }
  func.func @transform_3(%arg0: i32) -> (i32, i32, i32, i32) {
    %c0_i32 = arith.constant 0 : i32
    %c0_i32_0 = arith.constant 0 : i32
    %c0_i32_1 = arith.constant 0 : i32
    %c0_i32_2 = arith.constant 0 : i32
    return %arg0, %c0_i32, %c0_i32_0, %c0_i32_1 : i32, i32, i32, i32
  }
}

</mosaic_0001>

<bundles_post_ra>
// kernel: tpu_custom_call.1
= control target key start
LH: loop header
LB: loop body
LE: loop exit
PB: predicated region body
PF: predicated region fallthrough
CT: control target
= control target key end

     0   :  { %s8742_s12 = smov 0   ;;  %s10522_s0 = inlined_call_operand.vmem [shape: bf16[2,21,21,64], index: 0, kind: input, shape index: {}]   ;;  %s10523_s1 = inlined_call_operand.vmem [shape: bf16[4,64,32], index: 1, kind: input, shape index: {}]   ;;  %s10524_s2 = inlined_call_operand.vmem [shape: f32[1,32], index: 2, kind: input, shape index: {}]   ;;  %s10525_s3 = inlined_call_operand.vmem [shape: bf16[2,20,20,32], index: 3, kind: output, shape index: {}]  }
   0x1 LB: > { %s6077_s13 = sadd.s32 4294967295, %s8720_s12   ;;  %p6081_p0 = scmp.ge.s32.totalorder %s8720_s12, 1  ;;  %s8720_s12 = sphi %s8742_s12, %s13_s12  }
   0x2   : > { %p137_p1 = scmp.lt.s32.totalorder %s8720_s12, 3 }
   0x4   : > { %p138_p2 = pnand %p6081_p0, %p137_p1 }
   0x5   : > { %p161_p3 = scmp.lt.s32.totalorder (!%p138_p2), %s6077_s13, 1 }
   0x6   : > { %141 = sbr.rel (%p138_p2) target bundleno = 796 (0x31c), region = 32 }
   0xb   : > { %v8348_v0 = vld [vmem:[%s10523_s1 + $0x38] sm:$0xff]  ;;  %v8347_v4 = vld [vmem:[%s10523_s1 + $0x30] sm:$0xff]  ;;  %s10527_s13 = smov (!%p161_p3, %s6077_s13), 1  ;;  %v8346_v8 = vld [vmem:[%s10523_s1 + $0x28] sm:$0xff]  ;;  %vm201_vm0 = vsmask.f32 7424 }
   0xc   : > { %v8344_v1 = vld [vmem:[%s10523_s1 + $0x18] sm:$0xff]  ;;  %252 = vmatpush.bf16.msra.mxu0 %v8348_v0  ;;  %v8343_v5 = vld [vmem:[%s10523_s1 + $0x10] sm:$0xff]  ;;  %s8700_s30 = smul.u32 252, %s10527_s13  ;;  %v8342_v9 = vld [vmem:[%s10523_s1 + $0x8] sm:$0xff]  ;;  %vm241_vm1 = vcmask 523264   ;;  %vm469_vm2 = vcmask 257024  }
   0xd   : > { %v8353_v2 = vld [vmem:[%s10523_s1 + $0x58] sm:$0xff]  ;;  %298 = vmatpush.bf16.msra.mxu1 %v8344_v1  ;;  %v8352_v6 = vld [vmem:[%s10523_s1 + $0x50] sm:$0xff]  ;;  %v8351_v10 = vld [vmem:[%s10523_s1 + $0x48] sm:$0xff]  ;;  %s8701_s23 = smul.u32 240, %s10527_s13  ;;  %vm472_vm3 = vcmask 254976  }
   0xe   : > { %v8357_v3 = vld [vmem:[%s10523_s1 + $0x78] sm:$0xff]  ;;  %367 = vmatpush.bf16.msra.mxu2 %v8353_v2  ;;  %v8356_v7 = vld [vmem:[%s10523_s1 + $0x70] sm:$0xff]  ;;  %v8355_v11 = vld [vmem:[%s10523_s1 + $0x68] sm:$0xff]  ;;  %s8792_s16 = scalar_lea.vmem %s10522_s0, %s8700_s30 }
   0xf   : > { %440 = vmatpush.bf16.msra.mxu3 %v8357_v3  ;;  %v8340_v12 = vld [vmem:[%s8792_s16] sm:$0xff]  ;;  %v175_v13 = vld [vmem:[%s8792_s16 + $0x8] sm:$0x7]  ;;  %v8349_v14 = vld [vmem:[%s8792_s16 + $0xc] sm:$0xff]  ;;  %s9163_s26 = scalar_lea.vmem %s10525_s3, %s8701_s23 }
  0x10   : > { %253 = vmatpush.bf16.msra.mxu0 %v8347_v4  ;;  %v198_v15 = vunpack.c.l.b16 %v175_v13  ;;  %v6134_v16 = vld [vmem:[%s8792_s16 + $0x14] sm:$0x7]  ;;  %v203_v17 = vshrl.u32 %v8340_v12, 16  ;;  %v205_v18 = vshll.u32 %v8340_v12, 16  ;;  %v395_v19 = vshll.u32 %v8349_v14, 16  ;;  %v8345_v21 = vld [vmem:[%s10523_s1 + $0x20] sm:$0xff] }
  0x11   : > { %299 = vmatpush.bf16.msra.mxu1 %v8343_v5  ;;  %v330_v20 = vunpack.c.l.b16 %v6134_v16  ;;  %v8341_v22 = vld [vmem:[%s10523_s1] sm:$0xff]  ;;  %v393_v24 = vshrl.u32 %v8349_v14, 16  ;;  %v8371_v31 = vld [vmem:[%s10523_s1 + $0x58] sm:$0xff]  ;;  %v8370_v41 = vld [vmem:[%s10523_s1 + $0x50] sm:$0xff] }
  0x12   : > { %368 = vmatpush.bf16.msra.mxu2 %v8352_v6  ;;  %v8804_v23 = vpack.c.b16 %v198_v15, %v198_v15  ;;  %v8350_v25 = vld [vmem:[%s10523_s1 + $0x40] sm:$0xff]  ;;  %v207_v27 = vrot.slane %v205_v18, 1  ;;  %v397_v29 = vrot.slane %v395_v19, 1  ;;  %v8375_v32 = vld [vmem:[%s10523_s1 + $0x78] sm:$0xff]  ;;  %v8374_v42 = vld [vmem:[%s10523_s1 + $0x70] sm:$0xff] }
  0x13   : > { %441 = vmatpush.bf16.msra.mxu3 %v8356_v7  ;;  %v8354_v26 = vld [vmem:[%s10523_s1 + $0x60] sm:$0xff]  ;;  %v8812_v28 = vpack.c.b16 %v330_v20, %v330_v20  ;;  %v8366_v38 = vld [vmem:[%s10523_s1 + $0x38] sm:$0xff]  ;;  %v8365_v44 = vld [vmem:[%s10523_s1 + $0x30] sm:$0xff] }
  0x14   : > { %254 = vmatpush.bf16.msra.mxu0 %v8346_v8  ;;  %v210_v30 = vshll.u32 %v8804_v23, 16  ;;  %v208_v33 = vor.u32 %v207_v27, %v203_v17  ;;  %v398_v34 = vor.u32 %v397_v29, %v393_v24  ;;  %v8362_v39 = vld [vmem:[%s10523_s1 + $0x18] sm:$0xff]  ;;  %v8361_v45 = vld [vmem:[%s10523_s1 + $0x10] sm:$0xff]  ;;  %v8369_v46 = vld [vmem:[%s10523_s1 + $0x48] sm:$0xff]  ;;  %v214_v52 = vshrl.u32 %v8804_v23, 16 }
  0x15   : > { %300 = vmatpush.bf16.msra.mxu1 %v8342_v9  ;;  %v399_v35 = vshll.u32 %v8812_v28, 16  ;;  %v8373_v47 = vld [vmem:[%s10523_s1 + $0x68] sm:$0xff]  ;;  %v8368_v50 = vld [vmem:[%s10523_s1 + $0x40] sm:$0xff]  ;;  %v8389_v53 = vld [vmem:[%s10523_s1 + $0x58] sm:$0xff]  ;;  %v403_v55 = vshrl.u32 %v8812_v28, 16 }
  0x16   : > { %369 = vmatpush.bf16.msra.mxu2 %v8351_v10  ;;  %v212_v36 = vrot.slane %v210_v30, 1  ;;  %v8364_v48 = vld [vmem:[%s10523_s1 + $0x28] sm:$0xff]  ;;  %v8372_v51 = vld [vmem:[%s10523_s1 + $0x60] sm:$0xff]  ;;  %v8393_v54 = vld [vmem:[%s10523_s1 + $0x78] sm:$0xff] }
  0x17   : > { %442 = vmatpush.bf16.msra.mxu3 %v8355_v11  ;;  %v401_v37 = vrot.slane %v399_v35, 1  ;;  %v8360_v49 = vld [vmem:[%s10523_s1 + $0x8] sm:$0xff]  ;;  %v8363_v56 = vld [vmem:[%s10523_s1 + $0x20] sm:$0xff]  ;;  %v6193_v58 = vld [vmem:[%s8792_s16 + $0x14] sm:$0x7] }
  0x18   : > { %255 = vmatpush.bf16.msra.mxu0 %v8345_v21  ;;  %v213_v40 = vsel %vm201_vm0, %v208_v33, %v212_v36  ;;  %v8359_v57 = vld [vmem:[%s10523_s1] sm:$0xff]  ;;  %v8384_v60 = vld [vmem:[%s10523_s1 + $0x38] sm:$0xff]  ;;  %v216_v62 = vor.u32 %v214_v52, %v212_v36  ;;  %v8358_v0 = vld [vmem:[%s8792_s16 + $0xc] sm:$0xff]  ;;  %v498_v1 = vunpack.c.l.b16 %v6193_v58 }
  0x19   : > { %301 = vmatpush.bf16.msra.mxu1 %v8341_v22  ;;  %v402_v43 = vsel %vm201_vm0, %v398_v34, %v401_v37  ;;  %v6244_v59 = vld [vmem:[%s8792_s16 + $0x20] sm:$0x7]  ;;  %v8380_v61 = vld [vmem:[%s10523_s1 + $0x18] sm:$0xff]  ;;  %v405_v63 = vor.u32 %v403_v55, %v401_v37  ;;  %v8388_v4 = vld [vmem:[%s10523_s1 + $0x50] sm:$0xff]  ;;  %v504_v9 = vshll.u32 %v8358_v0, 16  ;;  %v502_v16 = vshrl.u32 %v8358_v0, 16 }
  0x1a   : > { %370 = vmatpush.bf16.msra.mxu2 %v8350_v25  ;;  %v8367_v2 = vld [vmem:[%s8792_s16 + $0x18] sm:$0xff]  ;;  %v627_v3 = vunpack.c.l.b16 %v6244_v59  ;;  %v8392_v5 = vld [vmem:[%s10523_s1 + $0x70] sm:$0xff]  ;;  %v8906_v8 = vpack.c.b16 %v498_v1, %v498_v1  ;;  %v8391_v13 = vld [vmem:[%s10523_s1 + $0x68] sm:$0xff] }
  0x1b   : > { %443 = vmatpush.bf16.msra.mxu3 %v8354_v26  ;;  %6112 = vmatmul.msk.bf16.vlgmr.msra.gmra.mxu0 %vm241_vm1, %v213_v40  ;;  %v8383_v6 = vld [vmem:[%s10523_s1 + $0x30] sm:$0xff]  ;;  %v691_v11 = vshll.u32 %v8367_v2, 16  ;;  %v8378_v15 = vld [vmem:[%s10523_s1 + $0x8] sm:$0xff]  ;;  %v506_v17 = vrot.slane %v504_v9, 1  ;;  %v689_v19 = vshrl.u32 %v8367_v2, 16  ;;  %v8386_v22 = vld [vmem:[%s10523_s1 + $0x40] sm:$0xff] }
  0x1c   : > { %6130 = vmatmul.msk.bf16.vlgmr.msra.gmra.mxu1 %vm241_vm1, %v8340_v12  ;;  %550 = vmatpush.bf16.msrb.mxu0 %v8366_v38  ;;  %v8379_v7 = vld [vmem:[%s10523_s1 + $0x10] sm:$0xff]  ;;  %v8908_v10 = vpack.c.b16 %v627_v3, %v627_v3  ;;  %v8387_v12 = vld [vmem:[%s10523_s1 + $0x48] sm:$0xff]  ;;  %v509_v18 = vshll.u32 %v8906_v8, 16  ;;  %v8381_v24 = vld [vmem:[%s10523_s1 + $0x20] sm:$0xff]  ;;  %v513_v40 = vshrl.u32 %v8906_v8, 16 }
  0x1d   : > { %6163 = vmatmul.msk.bf16.vlgmr.msra.gmra.mxu2 %vm241_vm1, %v8349_v14  ;;  %596 = vmatpush.bf16.msrb.mxu1 %v8362_v39  ;;  %v8382_v14 = vld [vmem:[%s10523_s1 + $0x28] sm:$0xff]  ;;  %v693_v20 = vrot.slane %v691_v11, 1  ;;  %v8377_v25 = vld [vmem:[%s10523_s1] sm:$0xff]  ;;  %v507_v26 = vor.u32 %v506_v17, %v502_v16  ;;  %v8411_v33 = vld [vmem:[%s10523_s1 + $0x78] sm:$0xff] }
  0x1e   : > { %664 = vmatpush.bf16.msrb.mxu2 %v8371_v31  ;;  %6189 = vmatmul.msk.bf16.vlgmr.msra.gmra.mxu3 %vm241_vm1, %v402_v43  ;;  %v695_v21 = vshll.u32 %v8908_v10, 16  ;;  %v511_v27 = vrot.slane %v509_v18, 1  ;;  %v8402_v34 = vld [vmem:[%s10523_s1 + $0x38] sm:$0xff]  ;;  %v8406_v36 = vld [vmem:[%s10523_s1 + $0x50] sm:$0xff]  ;;  %v6357_v43 = vld [vmem:[%s8792_s16 + $0x2c] sm:$0x7] }
  0x1f   : > { %736 = vmatpush.bf16.msrb.mxu3 %v8375_v32  ;;  %v8407_v32 = vld [vmem:[%s10523_s1 + $0x58] sm:$0xff]  ;;  %v8410_v37 = vld [vmem:[%s10523_s1 + $0x70] sm:$0xff]  ;;  %v8405_v52 = vld [vmem:[%s10523_s1 + $0x48] sm:$0xff] }
  0x20   : > { %551 = vmatpush.bf16.msrb.mxu0 %v8365_v44  ;;  %v697_v29 = vrot.slane %v695_v21, 1  ;;  %v512_v30 = vsel %vm201_vm0, %v507_v26, %v511_v27  ;;  %v8398_v35 = vld [vmem:[%s10523_s1 + $0x18] sm:$0xff]  ;;  %v8401_v38 = vld [vmem:[%s10523_s1 + $0x30] sm:$0xff]  ;;  %v515_v44 = vor.u32 %v513_v40, %v511_v27  ;;  %v8404_v58 = vld [vmem:[%s10523_s1 + $0x40] sm:$0xff] }
  0x21   : > { %597 = vmatpush.bf16.msrb.mxu1 %v8361_v45  ;;  %v8397_v39 = vld [vmem:[%s10523_s1 + $0x10] sm:$0xff]  ;;  %v8408_v59 = vld [vmem:[%s10523_s1 + $0x60] sm:$0xff]  ;;  %v8429_v11 = vld [vmem:[%s10523_s1 + $0x78] sm:$0xff] }
  0x22   : > { %665 = vmatpush.bf16.msrb.mxu2 %v8370_v41  ;;  %v699_v41 = vshrl.u32 %v8908_v10, 16  ;;  %v8419_v16 = vld [vmem:[%s10523_s1 + $0x30] sm:$0xff]  ;;  %v6470_v21 = vld [vmem:[%s8792_s16 + $0x38] sm:$0x7] }
  0x23   : > { %737 = vmatpush.bf16.msrb.mxu3 %v8374_v42  ;;  %v6306_v42 = vld [vmem:[%s8792_s16 + $0x20] sm:$0x7]  ;;  %v8415_v17 = vld [vmem:[%s10523_s1 + $0x10] sm:$0xff]  ;;  %v1211_v27 = vunpack.c.l.b16 %v6470_v21 }
  0x24   : > { %552 = vmatpush.bf16.msrb.mxu0 %v8364_v48  ;;  %v701_v45 = vor.u32 %v699_v41, %v697_v29  ;;  %v8385_v48 = vld [vmem:[%s8792_s16 + $0x24] sm:$0xff]  ;;  %v8403_v26 = vld [vmem:[%s8792_s16 + $0x30] sm:$0xff] }
  0x25   : > { %598 = vmatpush.bf16.msrb.mxu1 %v8360_v49  ;;  %v919_v49 = vunpack.c.l.b16 %v6357_v43  ;;  %v981_v1 = vshrl.u32 %v8385_v48, 16  ;;  %v1273_v43 = vshrl.u32 %v8403_v26, 16 }
  0x26   : > { %666 = vmatpush.bf16.msrb.mxu2 %v8369_v46  ;;  %v8376_v46 = vld [vmem:[%s8792_s16 + $0x18] sm:$0xff] }
  0x27   : > { %738 = vmatpush.bf16.msrb.mxu3 %v8373_v47  ;;  %v790_v47 = vunpack.c.l.b16 %v6306_v42  ;;  %v921_v55 = vpack.c.b16 %v919_v49, %v919_v49 }
  0x28   : > { %553 = vmatpush.bf16.msrb.mxu0 %v8363_v56  ;;  %v983_v56 = vshll.u32 %v8385_v48, 16 }
  0x29   : > { %599 = vmatpush.bf16.msrb.mxu1 %v8359_v57  ;;  %v8396_v57 = vld [vmem:[%s10523_s1 + $0x8] sm:$0xff]  ;;  %v987_v3 = vshll.u32 %v921_v55, 16 }
  0x2a   : > { %667 = vmatpush.bf16.msrb.mxu2 %v8368_v50  ;;  %v8978_v50 = vpack.c.b16 %v790_v47, %v790_v47 }
  0x2b   : > { %739 = vmatpush.bf16.msrb.mxu3 %v8372_v51  ;;  %6113 = vmatmul.msk.bf16.gmra.mxu0 %vm241_vm1, %v216_v62  ;;  %v796_v51 = vshll.u32 %v8376_v46, 16  ;;  %v794_v62 = vshrl.u32 %v8376_v46, 16 }
  0x2c   : > { %842 = vmatpush.bf16.msra.mxu0 %v8384_v60  ;;  %6131 = vmatmul.msk.bf16.gmra.mxu1 %vm241_vm1, %v8804_v23  ;;  %v8390_v23 = vld [vmem:[%s10523_s1 + $0x60] sm:$0xff]  ;;  %v805_v18 = vshrl.u32 %v8978_v50, 16 }
  0x2d   : > { %888 = vmatpush.bf16.msra.mxu1 %v8380_v61  ;;  %6164 = vmatmul.msk.bf16.gmra.mxu2 %vm241_vm1, %v8812_v28  ;;  %v694_v28 = vor.u32 %v693_v20, %v689_v19  ;;  %v8399_v60 = vld [vmem:[%s10523_s1 + $0x20] sm:$0xff]  ;;  %v991_v19 = vshrl.u32 %v921_v55, 16  ;;  %v6419_v20 = vld [vmem:[%s8792_s16 + $0x2c] sm:$0x7] }
  0x2e   : > { %956 = vmatpush.bf16.msra.mxu2 %v8389_v53  ;;  %6190 = vmatmul.msk.bf16.gmra.mxu3 %vm241_vm1, %v405_v63  ;;  %v8409_v53 = vld [vmem:[%s10523_s1 + $0x68] sm:$0xff]  ;;  %v8395_v61 = vld [vmem:[%s10523_s1] sm:$0xff]  ;;  %v798_v63 = vrot.slane %v796_v51, 1 }
  0x2f   : > { %1028 = vmatpush.bf16.msra.mxu3 %v8393_v54  ;;  %v698_v31 = vsel %vm201_vm0, %v694_v28, %v697_v29  ;;  %v8400_v54 = vld [vmem:[%s10523_s1 + $0x28] sm:$0xff] }
  0x30   : > { %843 = vmatpush.bf16.msra.mxu0 %v8383_v6 }
  0x31   : > { %889 = vmatpush.bf16.msra.mxu1 %v8379_v7  ;;  %v989_v7 = vrot.slane %v987_v3, 1  ;;  %v8446_v3 = vld [vmem:[%s10523_s1 + $0x70] sm:$0xff] }
  0x32   : > { %957 = vmatpush.bf16.msra.mxu2 %v8388_v4  ;;  %v799_v4 = vor.u32 %v798_v63, %v794_v62  ;;  %v8421_v62 = vld [vmem:[%s8792_s16 + $0x3c] sm:$0xff] }
  0x33   : > { %1029 = vmatpush.bf16.msra.mxu3 %v8392_v5 }
  0x34   : > { %844 = vmatpush.bf16.msra.mxu0 %v8382_v14  ;;  %v8424_v14 = vld [vmem:[%s10523_s1 + $0x50] sm:$0xff] }
  0x35   : > { %890 = vmatpush.bf16.msra.mxu1 %v8378_v15  ;;  %v8428_v15 = vld [vmem:[%s10523_s1 + $0x70] sm:$0xff] }
  0x36   : > { %958 = vmatpush.bf16.msra.mxu2 %v8387_v12  ;;  %v8420_v12 = vld [vmem:[%s10523_s1 + $0x38] sm:$0xff] }
  0x37   : > { %1030 = vmatpush.bf16.msra.mxu3 %v8391_v13  ;;  %v8416_v13 = vld [vmem:[%s10523_s1 + $0x18] sm:$0xff] }
  0x38   : > { %845 = vmatpush.bf16.msra.mxu0 %v8381_v24  ;;  %v8394_v24 = vld [vmem:[%s8792_s16 + $0x24] sm:$0xff] }
  0x39   : > { %891 = vmatpush.bf16.msra.mxu1 %v8377_v25  ;;  %v1082_v25 = vunpack.c.l.b16 %v6419_v20  ;;  %v1088_v29 = vshll.u32 %v8394_v24, 16  ;;  %v1086_v40 = vshrl.u32 %v8394_v24, 16 }
  0x3a   : > { %959 = vmatpush.bf16.msra.mxu2 %v8386_v22 }
  0x3b   : > { %1031 = vmatpush.bf16.msra.mxu3 %v8390_v23  ;;  %6222 = vmatmul.msk.bf16.vlgmr.msrb.gmra.mxu0 %vm241_vm1, %v512_v30  ;;  %v993_v23 = vor.u32 %v991_v19, %v989_v7  ;;  %v1084_v28 = vpack.c.b16 %v1082_v25, %v1082_v25  ;;  %v8423_v30 = vld [vmem:[%s10523_s1 + $0x48] sm:$0xff]  ;;  %v1090_v41 = vrot.slane %v1088_v29, 1  ;;  %v8444_v25 = vld [vmem:[%s10523_s1 + $0x60] sm:$0xff] }
  0x3c   : > { %6240 = vmatmul.msk.bf16.vlgmr.msrb.gmra.mxu1 %vm241_vm1, %v8358_v0  ;;  %1134 = vmatpush.bf16.msrb.mxu0 %v8402_v34  ;;  %v801_v0 = vshll.u32 %v8978_v50, 16  ;;  %v1275_v34 = vshll.u32 %v8403_v26, 16  ;;  %v8432_v19 = vld [vmem:[%s10523_s1 + $0x8] sm:$0xff] }
  0x3d   : > { %6273 = vmatmul.msk.bf16.vlgmr.msrb.gmra.mxu2 %vm241_vm1, %v8367_v2  ;;  %1180 = vmatpush.bf16.msrb.mxu1 %v8398_v35  ;;  %v985_v2 = vrot.slane %v983_v56, 1  ;;  %v8414_v35 = vld [vmem:[%s10523_s1 + $0x8] sm:$0xff]  ;;  %v1093_v42 = vshll.u32 %v1084_v28, 16  ;;  %v6532_v56 = vld [vmem:[%s8792_s16 + $0x38] sm:$0x7] }
  0x3e   : > { %6299 = vmatmul.msk.bf16.vlgmr.msrb.gmra.mxu3 %vm241_vm1, %v698_v31  ;;  %1248 = vmatpush.bf16.msrb.mxu2 %v8407_v32  ;;  %v803_v5 = vrot.slane %v801_v0, 1  ;;  %v8427_v31 = vld [vmem:[%s10523_s1 + $0x68] sm:$0xff]  ;;  %v8438_v0 = vld [vmem:[%s10523_s1 + $0x38] sm:$0xff] }
  0x3f   : > { %1320 = vmatpush.bf16.msrb.mxu3 %v8411_v33  ;;  %v986_v6 = vor.u32 %v985_v2, %v981_v1  ;;  %v8418_v32 = vld [vmem:[%s10523_s1 + $0x28] sm:$0xff]  ;;  %v1213_v33 = vpack.c.b16 %v1211_v27, %v1211_v27  ;;  %v1095_v47 = vrot.slane %v1093_v42, 1  ;;  %v8434_v1 = vld [vmem:[%s10523_s1 + $0x18] sm:$0xff]  ;;  %v8442_v2 = vld [vmem:[%s10523_s1 + $0x50] sm:$0xff] }
  0x40   : > { %1135 = vmatpush.bf16.msrb.mxu0 %v8401_v38  ;;  %v807_v22 = vor.u32 %v805_v18, %v803_v5  ;;  %v8417_v38 = vld [vmem:[%s10523_s1 + $0x20] sm:$0xff]  ;;  %v8436_v18 = vld [vmem:[%s10523_s1 + $0x28] sm:$0xff] }
  0x41   : > { %1181 = vmatpush.bf16.msrb.mxu1 %v8397_v39  ;;  %v990_v9 = vsel %vm201_vm0, %v986_v6, %v989_v7  ;;  %v8413_v39 = vld [vmem:[%s10523_s1] sm:$0xff]  ;;  %v1567_v7 = vshll.u32 %v8421_v62, 16 }
  0x42   : > { %1249 = vmatpush.bf16.msrb.mxu2 %v8406_v36  ;;  %v8422_v36 = vld [vmem:[%s10523_s1 + $0x40] sm:$0xff] }
  0x43   : > { %1321 = vmatpush.bf16.msrb.mxu3 %v8410_v37  ;;  %v8426_v37 = vld [vmem:[%s10523_s1 + $0x60] sm:$0xff] }
  0x44   : > { %1136 = vmatpush.bf16.msrb.mxu0 %v8400_v54  ;;  %v1097_v54 = vshrl.u32 %v1084_v28, 16 }
  0x45   : > { %1182 = vmatpush.bf16.msrb.mxu1 %v8396_v57  ;;  %v6583_v57 = vld [vmem:[%s8792_s16 + $0x44] sm:$0x7] }
  0x46   : > { %1250 = vmatpush.bf16.msrb.mxu2 %v8405_v52  ;;  %v8443_v52 = vld [vmem:[%s10523_s1 + $0x58] sm:$0xff]  ;;  %v1503_v63 = vunpack.c.l.b16 %v6583_v57 }
  0x47   : > { %1322 = vmatpush.bf16.msrb.mxu3 %v8409_v53  ;;  %v8447_v53 = vld [vmem:[%s10523_s1 + $0x78] sm:$0xff] }
  0x48   : > { %1137 = vmatpush.bf16.msrb.mxu0 %v8399_v60  ;;  %v8412_v60 = vld [vmem:[%s8792_s16 + $0x30] sm:$0xff]  ;;  %v9103_v6 = vpack.c.b16 %v1503_v63, %v1503_v63  ;;  %v9166_v57 = vld [vmem:[%s8792_s16 + $0x3c] sm:$0xff] }
  0x49   : > { %1183 = vmatpush.bf16.msrb.mxu1 %v8395_v61  ;;  %v1374_v61 = vunpack.c.l.b16 %v6532_v56  ;;  %v8452_v63 = vld [vmem:[%s10523_s1 + $0x18] sm:$0xff] }
  0x4a   : > { %1251 = vmatpush.bf16.msrb.mxu2 %v8404_v58  ;;  %v1099_v58 = vor.u32 %v1097_v54, %v1095_v47 }
  0x4b   : > { %6223 = vmatmul.msk.bf16.gmra.mxu0 %vm241_vm1, %v515_v44  ;;  %1323 = vmatpush.bf16.msrb.mxu3 %v8408_v59  ;;  %v1277_v44 = vrot.slane %v1275_v34, 1  ;;  %v8465_v34 = vld [vmem:[%s10523_s1 + $0x78] sm:$0xff] }
  0x4c   : > { %6241 = vmatmul.msk.bf16.gmra.mxu1 %vm241_vm1, %v8906_v8  ;;  %v804_v8 = vsel %vm201_vm0, %v799_v4, %v803_v5  ;;  %v9101_v4 = vpack.c.b16 %v1374_v61, %v1374_v61  ;;  %v1380_v5 = vshll.u32 %v8412_v60, 16 }
  0x4d   : > { %6274 = vmatmul.msk.bf16.gmra.mxu2 %vm241_vm1, %v8908_v10  ;;  %v8425_v10 = vld [vmem:[%s10523_s1 + $0x58] sm:$0xff] }
  0x4e   : > { %6300 = vmatmul.msk.bf16.gmra.mxu3 %vm241_vm1, %v701_v45  ;;  %v1279_v45 = vshll.u32 %v1213_v33, 16  ;;  %v1389_v42 = vshrl.u32 %v9101_v4, 16 }
  0x50   : > { %v1281_v49 = vrot.slane %v1279_v45, 1  ;;  %v6645_v45 = vld [vmem:[%s8792_s16 + $0x44] sm:$0x7] }
  0x5b   : > { %6335 = vmatmul.msk.bf16.vlgmr.msra.gmra.mxu0 %vm241_vm1, %v804_v8  ;;  %v8437_v8 = vld [vmem:[%s10523_s1 + $0x30] sm:$0xff] }
  0x5c   : > { %6353 = vmatmul.msk.bf16.vlgmr.msra.gmra.mxu1 %vm241_vm1, %v8376_v46  ;;  %1426 = vmatpush.bf16.msra.mxu0 %v8420_v12  ;;  %v1091_v46 = vor.u32 %v1090_v41, %v1086_v40  ;;  %v1385_v12 = vshll.u32 %v9101_v4, 16 }
  0x5d   : > { %6386 = vmatmul.msk.bf16.vlgmr.msra.gmra.mxu2 %vm241_vm1, %v8385_v48  ;;  %1472 = vmatpush.bf16.msra.mxu1 %v8416_v13  ;;  %v1278_v48 = vor.u32 %v1277_v44, %v1273_v43  ;;  %v1565_v13 = vshrl.u32 %v8421_v62, 16  ;;  %v1575_v44 = vshrl.u32 %v9103_v6, 16 }
  0x5e   : > { %6412 = vmatmul.msk.bf16.vlgmr.msra.gmra.mxu3 %vm241_vm1, %v990_v9  ;;  %1540 = vmatpush.bf16.msra.mxu2 %v8425_v10  ;;  %v8433_v9 = vld [vmem:[%s10523_s1 + $0x10] sm:$0xff]  ;;  %v1378_v10 = vshrl.u32 %v8412_v60, 16  ;;  %v1387_v21 = vrot.slane %v1385_v12, 1 }
  0x5f   : > { %1612 = vmatpush.bf16.msra.mxu3 %v8429_v11  ;;  %v1282_v51 = vsel %vm201_vm0, %v1278_v48, %v1281_v49  ;;  %v1382_v11 = vrot.slane %v1380_v5, 1  ;;  %v6696_v48 = vld [vmem:[%s8792_s16 + $0x50] sm:$0x7] }
  0x60   : > { %1427 = vmatpush.bf16.msra.mxu0 %v8419_v16  ;;  %v8441_v16 = vld [vmem:[%s10523_s1 + $0x48] sm:$0xff]  ;;  %v8455_v12 = vld [vmem:[%s10523_s1 + $0x30] sm:$0xff] }
  0x61   : > { %1473 = vmatpush.bf16.msra.mxu1 %v8415_v17  ;;  %v8445_v17 = vld [vmem:[%s10523_s1 + $0x68] sm:$0xff]  ;;  %v1383_v20 = vor.u32 %v1382_v11, %v1378_v10 }
  0x62   : > { %1541 = vmatpush.bf16.msra.mxu2 %v8424_v14  ;;  %v1569_v14 = vrot.slane %v1567_v7, 1  ;;  %v1672_v7 = vshll.u32 %v9166_v57, 16 }
  0x63   : > { %1613 = vmatpush.bf16.msra.mxu3 %v8428_v15  ;;  %v1571_v15 = vshll.u32 %v9103_v6, 16  ;;  %v1388_v29 = vsel %vm201_vm0, %v1383_v20, %v1387_v21 }
  0x64   : > { %1428 = vmatpush.bf16.msra.mxu0 %v8418_v32 }
  0x65   : > { %1474 = vmatpush.bf16.msra.mxu1 %v8414_v35 }
  0x66   : > { %1542 = vmatpush.bf16.msra.mxu2 %v8423_v30  ;;  %v8431_v30 = vld [vmem:[%s10523_s1] sm:$0xff] }
  0x67   : > { %1614 = vmatpush.bf16.msra.mxu3 %v8427_v31 }
  0x68   : > { %1429 = vmatpush.bf16.msra.mxu0 %v8417_v38  ;;  %v9152_v38 = vld [vmem:[%s10524_s2] ss:$0 sm:$0xff] }
  0x69   : > { %1475 = vmatpush.bf16.msra.mxu1 %v8413_v39 }
  0x6a   : > { %1543 = vmatpush.bf16.msra.mxu2 %v8422_v36 }
  0x6b   : > { %6336 = vmatmul.msk.bf16.gmra.mxu0 %vm241_vm1, %v807_v22  ;;  %1615 = vmatpush.bf16.msra.mxu3 %v8426_v37  ;;  %v1570_v22 = vor.u32 %v1569_v14, %v1565_v13  ;;  %v8451_v13 = vld [vmem:[%s10523_s1 + $0x10] sm:$0xff] }
  0x6c   : > { %6354 = vmatmul.msk.bf16.gmra.mxu1 %vm241_vm1, %v8978_v50  ;;  %v1096_v50 = vsel %vm201_vm0, %v1091_v46, %v1095_v47 }
  0x6d   : > { %6387 = vmatmul.msk.bf16.gmra.mxu2 %vm241_vm1, %v921_v55  ;;  %v1283_v55 = vshrl.u32 %v1213_v33, 16 }
  0x6e   : > { %6413 = vmatmul.msk.bf16.gmra.mxu3 %vm241_vm1, %v993_v23  ;;  %v1573_v23 = vrot.slane %v1571_v15, 1 }
  0x6f   : > { %v1285_v59 = vor.u32 %v1283_v55, %v1281_v49 }
  0x70   : > { %v1574_v31 = vsel %vm201_vm0, %v1570_v22, %v1573_v23  ;;  %v1577_v56 = vor.u32 %v1575_v44, %v1573_v23  ;;  %v8449_v44 = vld [vmem:[%s10523_s1] sm:$0xff] }
  0x7b   : > { %6448 = vmatmul.msk.bf16.vlgmr.msrb.gmra.mxu0 %vm241_vm1, %v1096_v50 }
  0x7c   : > { %6466 = vmatmul.msk.bf16.vlgmr.msrb.gmra.mxu1 %vm241_vm1, %v8394_v24  ;;  %1718 = vmatpush.bf16.msrb.mxu0 %v8438_v0  ;;  %v8440_v24 = vld [vmem:[%s10523_s1 + $0x40] sm:$0xff]  ;;  %v8460_v0 = vld [vmem:[%s10523_s1 + $0x50] sm:$0xff] }
  0x7d   : > { %6499 = vmatmul.msk.bf16.vlgmr.msrb.gmra.mxu2 %vm241_vm1, %v8403_v26  ;;  %1764 = vmatpush.bf16.msrb.mxu1 %v8434_v1  ;;  %v8435_v26 = vld [vmem:[%s10523_s1 + $0x20] sm:$0xff]  ;;  %v8464_v1 = vld [vmem:[%s10523_s1 + $0x70] sm:$0xff] }
  0x7e   : > { %6525 = vmatmul.msk.bf16.vlgmr.msrb.gmra.mxu3 %vm241_vm1, %v1282_v51  ;;  %1832 = vmatpush.bf16.msrb.mxu2 %v8443_v52  ;;  %v1391_v51 = vor.u32 %v1389_v42, %v1387_v21 }
  0x7f   : > { %1904 = vmatpush.bf16.msrb.mxu3 %v8447_v53 }
  0x80   : > { %1719 = vmatpush.bf16.msrb.mxu0 %v8437_v8 }
  0x81   : > { %1765 = vmatpush.bf16.msrb.mxu1 %v8433_v9 }
  0x82   : > { %1833 = vmatpush.bf16.msrb.mxu2 %v8442_v2 }
  0x83   : > { %1905 = vmatpush.bf16.msrb.mxu3 %v8446_v3 }
  0x84   : > { %1720 = vmatpush.bf16.msrb.mxu0 %v8436_v18  ;;  %v1674_v18 = vrot.slane %v1672_v7, 1 }
  0x85   : > { %1766 = vmatpush.bf16.msrb.mxu1 %v8432_v19 }
  0x86   : > { %1834 = vmatpush.bf16.msrb.mxu2 %v8441_v16 }
  0x87   : > { %1906 = vmatpush.bf16.msrb.mxu3 %v8445_v17 }
  0x88   : > { %1721 = vmatpush.bf16.msrb.mxu0 %v8435_v26  ;;  %v8454_v26 = vld [vmem:[%s10523_s1 + $0x28] sm:$0xff] }
  0x89   : > { %1767 = vmatpush.bf16.msrb.mxu1 %v8431_v30 }
  0x8a   : > { %1835 = vmatpush.bf16.msrb.mxu2 %v8440_v24  ;;  %v8459_v24 = vld [vmem:[%s10523_s1 + $0x48] sm:$0xff] }
  0x8b   : > { %6449 = vmatmul.msk.bf16.gmra.mxu0 %vm241_vm1, %v1099_v58  ;;  %1907 = vmatpush.bf16.msrb.mxu3 %v8444_v25  ;;  %v1666_v58 = vunpack.c.l.b16 %v6645_v45  ;;  %v8463_v25 = vld [vmem:[%s10523_s1 + $0x68] sm:$0xff] }
  0x8c   : > { %6467 = vmatmul.msk.bf16.gmra.mxu1 %vm241_vm1, %v1084_v28 }
  0x8d   : > { %6500 = vmatmul.msk.bf16.gmra.mxu2 %vm241_vm1, %v1213_v33  ;;  %v8461_v33 = vld [vmem:[%s10523_s1 + $0x58] sm:$0xff]  ;;  %v9192_v5 = vpack.c.b16 %v1666_v58, %v1666_v58  ;;  %v6758_v58 = vld [vmem:[%s8792_s16 + $0x50] sm:$0x7] }
  0x8e   : > { %6526 = vmatmul.msk.bf16.gmra.mxu3 %vm241_vm1, %v1285_v59  ;;  %v9169_v59 = vld [vmem:[%s8792_s16 + $0x48] sm:$0xff] }
  0x8f   : > { %v1677_v19 = vshll.u32 %v9192_v5, 16  ;;  %v1857_v20 = vshrl.u32 %v9169_v59, 16 }
  0x91   : > { %v1679_v30 = vrot.slane %v1677_v19, 1 }
  0x98   : > { %v257_v27 = vpop.f32.mrf.mxu0 }
  0x99   : > { %v303_v28 = vpop.f32.mrf.mxu1 }
  0x9a   : > { %v304_v32 = vadd.f32 %v303_v28, %v257_v27  ;;  %v8450_v27 = vld [vmem:[%s10523_s1 + $0x8] sm:$0xff] }
  0x9b   : > { %6561 = vmatmul.msk.bf16.vlgmr.msra.gmra.mxu0 %vm241_vm1, %v1388_v29 }
  0x9c   : > { %6579 = vmatmul.msk.bf16.vlgmr.msra.gmra.mxu1 %vm241_vm1, %v8412_v60  ;;  %v1795_v60 = vunpack.c.l.b16 %v6696_v48  ;;  %v8483_v48 = vld [vmem:[%s10523_s1 + $0x78] sm:$0xff] }
  0x9d   : > { %6612 = vmatmul.msk.bf16.vlgmr.msra.gmra.mxu2 %vm241_vm1, %v8421_v62  ;;  %v8456_v62 = vld [vmem:[%s10523_s1 + $0x38] sm:$0xff]  ;;  %2056 = vmatpush.bf16.msra.mxu1 %v8452_v63 }
  0x9e   : > { %6638 = vmatmul.msk.bf16.vlgmr.msra.gmra.mxu3 %vm241_vm1, %v1574_v31  ;;  %2124 = vmatpush.bf16.msra.mxu2 %v8461_v33  ;;  %v9195_v8 = vpack.c.b16 %v1795_v60, %v1795_v60 }
  0x9f   : > { %2196 = vmatpush.bf16.msra.mxu3 %v8465_v34  ;;  %2010 = vmatpush.bf16.msra.mxu0 %v8456_v62 }
  0xa0   : > { %v372_v35 = vpop.f32.mrf.mxu2  ;;  %v259_v39 = vpop.f32.mrf.mxu0  ;;  %v1863_v22 = vshll.u32 %v9195_v8, 16 }
  0xa1   : > { %v445_v36 = vpop.f32.mrf.mxu3  ;;  %v381_v37 = vadd.f32 %v372_v35, %v304_v32  ;;  %v305_v40 = vpop.f32.mrf.mxu1  ;;  %2057 = vmatpush.bf16.msra.mxu1 %v8451_v13  ;;  %v8474_v13 = vld [vmem:[%s10523_s1 + $0x38] sm:$0xff] }
  0xa2   : > { %v306_v47 = vadd.f32 %v305_v40, %v259_v39  ;;  %2125 = vmatpush.bf16.msra.mxu2 %v8460_v0  ;;  %v1865_v32 = vrot.slane %v1863_v22, 1  ;;  %v8453_v39 = vld [vmem:[%s10523_s1 + $0x20] sm:$0xff] }
  0xa3   : > { %v454_v41 = vadd.f32 %v445_v36, %v381_v37  ;;  %2197 = vmatpush.bf16.msra.mxu3 %v8464_v1  ;;  %2011 = vmatpush.bf16.msra.mxu0 %v8455_v12  ;;  %v8458_v36 = vld [vmem:[%s10523_s1 + $0x40] sm:$0xff] }
  0xa4   : > { %v8462_v37 = vld [vmem:[%s10523_s1 + $0x60] sm:$0xff] }
  0xa5   : > { %v460_v43 = vadd.f32 %v9152_v38, %v454_v41  ;;  %2058 = vmatpush.bf16.msra.mxu1 %v8450_v27 }
  0xa6   : > { %2126 = vmatpush.bf16.msra.mxu2 %v8459_v24 }
  0xa7   : > { %v463_v46 = vmax.f32 %v460_v43, 0.0  ;;  %2198 = vmatpush.bf16.msra.mxu3 %v8463_v25  ;;  %2012 = vmatpush.bf16.msra.mxu0 %v8454_v26  ;;  %v8473_v25 = vld [vmem:[%s10523_s1 + $0x30] sm:$0xff] }
  0xa8   : > { %v374_v49 = vpop.f32.mrf.mxu2  ;;  %v262_v54 = vpop.f32.mrf.mxu0  ;;  %v8469_v26 = vld [vmem:[%s10523_s1 + $0x10] sm:$0xff] }
  0xa9   : > { %v447_v50 = vpop.f32.mrf.mxu3  ;;  %v466_v52 = vpack.c.bf16 %v463_v46, %v463_v46  ;;  %v382_v53 = vadd.f32 %v374_v49, %v306_v47  ;;  %v308_v55 = vpop.f32.mrf.mxu1  ;;  %2059 = vmatpush.bf16.msra.mxu1 %v8449_v44  ;;  %v8479_v47 = vld [vmem:[%s10523_s1 + $0x58] sm:$0xff] }
  0xaa   : > { %v309_v3 = vadd.f32 %v308_v55, %v262_v54  ;;  %2127 = vmatpush.bf16.msra.mxu2 %v8458_v36  ;;  %v1681_v55 = vshrl.u32 %v9192_v5, 16 }
  0xab   : > { %470 = vst.msk [vmem:[%s9163_s26] sm:$0xf] %vm469_vm2, %v466_v52  ;;  %v455_v61 = vadd.f32 %v447_v50, %v382_v53  ;;  %6562 = vmatmul.msk.bf16.gmra.mxu0 %vm241_vm1, %v1391_v51  ;;  %2199 = vmatpush.bf16.msra.mxu3 %v8462_v37  ;;  %v8477_v37 = vld [vmem:[%s10523_s1 + $0x48] sm:$0xff] }
  0xac   : > { %6580 = vmatmul.msk.bf16.gmra.mxu1 %vm241_vm1, %v9101_v4  ;;  %v1859_v4 = vshll.u32 %v9169_v59, 16  ;;  %2013 = vmatpush.bf16.msra.mxu0 %v8453_v39  ;;  %v1683_v0 = vor.u32 %v1681_v55, %v1679_v30  ;;  %v8481_v39 = vld [vmem:[%s10523_s1 + $0x68] sm:$0xff] }
  0xad   : > { %v461_v2 = vadd.f32 %v9152_v38, %v455_v61  ;;  %6613 = vmatmul.msk.bf16.gmra.mxu2 %vm241_vm1, %v9103_v6  ;;  %v1670_v6 = vshrl.u32 %v9166_v57, 16  ;;  %v6809_v61 = vld [vmem:[%s8792_s16 + $0x5c] sm:$0x7] }
  0xae   : > { %6639 = vmatmul.msk.bf16.gmra.mxu3 %vm241_vm1, %v1577_v56  ;;  %v1861_v21 = vrot.slane %v1859_v4, 1 }
  0xaf   : > { %v464_v9 = vmax.f32 %v461_v2, 0.0  ;;  %v1675_v29 = vor.u32 %v1674_v18, %v1670_v6  ;;  %v2087_v6 = vunpack.c.l.b16 %v6809_v61  ;;  %v8501_v61 = vld [vmem:[%s10523_s1 + $0x78] sm:$0xff] }
  0xb0   : > { %v377_v10 = vpop.f32.mrf.mxu2  ;;  %v264_v16 = vpop.f32.mrf.mxu0  ;;  %v1862_v31 = vor.u32 %v1861_v21, %v1857_v20 }
  0xb1   : > { %v450_v11 = vpop.f32.mrf.mxu3  ;;  %v467_v14 = vpack.c.bf16 %v464_v9, %v464_v9  ;;  %v383_v15 = vadd.f32 %v377_v10, %v309_v3  ;;  %v310_v17 = vpop.f32.mrf.mxu1  ;;  %v1680_v43 = vsel %vm201_vm0, %v1675_v29, %v1679_v30  ;;  %v9257_v9 = vld [vmem:[%s8792_s16 + $0x48] sm:$0xff]  ;;  %v1958_v10 = vunpack.c.l.b16 %v6758_v58  ;;  %v8482_v16 = vld [vmem:[%s10523_s1 + $0x70] sm:$0xff] }
  0xb2   : > { %v1866_v45 = vsel %vm201_vm0, %v1862_v31, %v1865_v32  ;;  %v1964_v20 = vshll.u32 %v9257_v9, 16  ;;  %v9286_v21 = vpack.c.b16 %v2087_v6, %v2087_v6 }
  0xb3   : > { %471 = vst.msk [vmem:[%s9163_s26 + $0x4] sm:$0xf] %vm469_vm2, %v467_v14  ;;  %v456_v23 = vadd.f32 %v450_v11, %v383_v15  ;;  %v9260_v11 = vld [vmem:[%s8792_s16 + $0x54] sm:$0xff]  ;;  %v9283_v19 = vpack.c.b16 %v1958_v10, %v1958_v10  ;;  %v6871_v10 = vld [vmem:[%s8792_s16 + $0x5c] sm:$0x7] }
  0xb4   : > { %v8470_v14 = vld [vmem:[%s10523_s1 + $0x18] sm:$0xff]  ;;  %v8478_v15 = vld [vmem:[%s10523_s1 + $0x50] sm:$0xff]  ;;  %v1966_v31 = vrot.slane %v1964_v20, 1 }
  0xb5   : > { %v462_v28 = vadd.f32 %v9152_v38, %v456_v23 }
  0xb7   : > { %v465_v33 = vmax.f32 %v462_v28, 0.0 }
  0xb8   : > { %v379_v34 = vpop.f32.mrf.mxu2  ;;  %v555_v41 = vpop.f32.mrf.mxu0 }
  0xb9   : > { %v452_v35 = vpop.f32.mrf.mxu3  ;;  %v468_v40 = vpack.c.bf16 %v465_v33, %v465_v33  ;;  %v601_v42 = vpop.f32.mrf.mxu1  ;;  %v2149_v33 = vshrl.u32 %v9260_v11, 16 }
  0xba   : > { %v602_v46 = vadd.f32 %v601_v42, %v555_v41  ;;  %v2155_v35 = vshll.u32 %v9286_v21, 16  ;;  %v8468_v41 = vld [vmem:[%s10523_s1 + $0x8] sm:$0xff] }
  0xbb   : > { %473 = vst.msk [vmem:[%s9163_s26 + $0x8] sm:$0x3] %vm472_vm3, %v468_v40  ;;  %6674 = vmatmul.msk.bf16.vlgmr.msrb.gmra.mxu0 %vm241_vm1, %v1680_v43  ;;  %v8472_v40 = vld [vmem:[%s10523_s1 + $0x28] sm:$0xff] }
  0xbc   : > { %6692 = vmatmul.msk.bf16.vlgmr.msrb.gmra.mxu1 %vm241_vm1, %v9166_v57  ;;  %v1867_v57 = vshrl.u32 %v9195_v8, 16  ;;  %2302 = vmatpush.bf16.msrb.mxu0 %v8474_v13 }
  0xbd   : > { %6725 = vmatmul.msk.bf16.vlgmr.msrb.gmra.mxu2 %vm241_vm1, %v9169_v59  ;;  %2348 = vmatpush.bf16.msrb.mxu1 %v8470_v14 }
  0xbe   : > { %6751 = vmatmul.msk.bf16.vlgmr.msrb.gmra.mxu3 %vm241_vm1, %v1866_v45  ;;  %2416 = vmatpush.bf16.msrb.mxu2 %v8479_v47  ;;  %v1869_v4 = vor.u32 %v1867_v57, %v1865_v32  ;;  %v1969_v32 = vshll.u32 %v9283_v19, 16  ;;  %v8467_v57 = vld [vmem:[%s10523_s1] sm:$0xff] }
  0xbf   : > { %2488 = vmatpush.bf16.msrb.mxu3 %v8483_v48 }
  0xc0   : > { %v669_v49 = vpop.f32.mrf.mxu2  ;;  %v557_v52 = vpop.f32.mrf.mxu0  ;;  %2303 = vmatpush.bf16.msrb.mxu0 %v8473_v25  ;;  %v1971_v44 = vrot.slane %v1969_v32, 1 }
  0xc1   : > { %v741_v50 = vpop.f32.mrf.mxu3  ;;  %v678_v51 = vadd.f32 %v669_v49, %v602_v46  ;;  %v603_v53 = vpop.f32.mrf.mxu1  ;;  %2349 = vmatpush.bf16.msrb.mxu1 %v8469_v26  ;;  %v2157_v46 = vrot.slane %v2155_v35, 1  ;;  %v8492_v26 = vld [vmem:[%s10523_s1 + $0x38] sm:$0xff] }
  0xc2   : > { %v604_v60 = vadd.f32 %v603_v53, %v557_v52  ;;  %2417 = vmatpush.bf16.msrb.mxu2 %v8478_v15  ;;  %v8471_v52 = vld [vmem:[%s10523_s1 + $0x20] sm:$0xff] }
  0xc3   : > { %v750_v54 = vadd.f32 %v741_v50, %v678_v51  ;;  %2489 = vmatpush.bf16.msrb.mxu3 %v8482_v16  ;;  %v8476_v50 = vld [vmem:[%s10523_s1 + $0x40] sm:$0xff] }
  0xc4   : > { %2304 = vmatpush.bf16.msrb.mxu0 %v8472_v40  ;;  %v8480_v51 = vld [vmem:[%s10523_s1 + $0x60] sm:$0xff]  ;;  %v8487_v40 = vld [vmem:[%s10523_s1 + $0x10] sm:$0xff] }
  0xc5   : > { %v753_v56 = vadd.f32 %v9152_v38, %v750_v54  ;;  %2350 = vmatpush.bf16.msrb.mxu1 %v8468_v41 }
  0xc6   : > { %2418 = vmatpush.bf16.msrb.mxu2 %v8477_v37 }
  0xc7   : > { %v756_v59 = vmax.f32 %v753_v56, 0.0  ;;  %2490 = vmatpush.bf16.msrb.mxu3 %v8481_v39  ;;  %v8491_v39 = vld [vmem:[%s10523_s1 + $0x30] sm:$0xff] }
  0xc8   : > { %v671_v62 = vpop.f32.mrf.mxu2  ;;  %v560_v3 = vpop.f32.mrf.mxu0  ;;  %2305 = vmatpush.bf16.msrb.mxu0 %v8471_v52  ;;  %v8499_v52 = vld [vmem:[%s10523_s1 + $0x68] sm:$0xff] }
  0xc9   : > { %v743_v63 = vpop.f32.mrf.mxu3  ;;  %v759_v1 = vpack.c.bf16 %v756_v59, %v756_v59  ;;  %v679_v2 = vadd.f32 %v671_v62, %v604_v60  ;;  %v606_v7 = vpop.f32.mrf.mxu1  ;;  %2351 = vmatpush.bf16.msrb.mxu1 %v8467_v57  ;;  %v8497_v60 = vld [vmem:[%s10523_s1 + $0x58] sm:$0xff] }
  0xca   : > { %v607_v18 = vadd.f32 %v606_v7, %v560_v3  ;;  %2419 = vmatpush.bf16.msrb.mxu2 %v8476_v50  ;;  %v1973_v7 = vshrl.u32 %v9283_v19, 16 }
  0xcb   : > { %6301 = vst.msk [vmem:[%s9163_s26 + $0xc] sm:$0xf] %vm469_vm2, %v759_v1  ;;  %v751_v12 = vadd.f32 %v743_v63, %v679_v2  ;;  %6675 = vmatmul.msk.bf16.gmra.mxu0 %vm241_vm1, %v1683_v0  ;;  %2491 = vmatpush.bf16.msrb.mxu3 %v8480_v51  ;;  %v8495_v51 = vld [vmem:[%s10523_s1 + $0x48] sm:$0xff] }
  0xcc   : > { %6693 = vmatmul.msk.bf16.gmra.mxu1 %vm241_vm1, %v9192_v5  ;;  %v2151_v5 = vshll.u32 %v9260_v11, 16  ;;  %v1975_v15 = vor.u32 %v1973_v7, %v1971_v44 }
  0xcd   : > { %v754_v17 = vadd.f32 %v9152_v38, %v751_v12  ;;  %6726 = vmatmul.msk.bf16.gmra.mxu2 %vm241_vm1, %v9195_v8  ;;  %v1962_v8 = vshrl.u32 %v9257_v9, 16  ;;  %v6922_v12 = vld [vmem:[%s8792_s16 + $0x68] sm:$0x7] }
  0xce   : > { %6752 = vmatmul.msk.bf16.gmra.mxu3 %vm241_vm1, %v1869_v4  ;;  %v2153_v34 = vrot.slane %v2151_v5, 1 }
  0xcf   : > { %v757_v22 = vmax.f32 %v754_v17, 0.0  ;;  %v1967_v43 = vor.u32 %v1966_v31, %v1962_v8  ;;  %v2379_v8 = vunpack.c.l.b16 %v6922_v12  ;;  %v8519_v12 = vld [vmem:[%s10523_s1 + $0x78] sm:$0xff] }
  0xd0   : > { %v674_v23 = vpop.f32.mrf.mxu2  ;;  %v562_v29 = vpop.f32.mrf.mxu0  ;;  %v2154_v45 = vor.u32 %v2153_v34, %v2149_v33 }
  0xd1   : > { %v746_v24 = vpop.f32.mrf.mxu3  ;;  %v760_v27 = vpack.c.bf16 %v757_v22, %v757_v22  ;;  %v680_v28 = vadd.f32 %v674_v23, %v607_v18  ;;  %v608_v30 = vpop.f32.mrf.mxu1  ;;  %v1972_v56 = vsel %vm201_vm0, %v1967_v43, %v1971_v44  ;;  %v9348_v22 = vld [vmem:[%s8792_s16 + $0x54] sm:$0xff]  ;;  %v2250_v23 = vunpack.c.l.b16 %v6871_v10 }
  0xd2   : > { %v2158_v58 = vsel %vm201_vm0, %v2154_v45, %v2157_v46  ;;  %v8500_v29 = vld [vmem:[%s10523_s1 + $0x70] sm:$0xff]  ;;  %v2256_v33 = vshll.u32 %v9348_v22, 16  ;;  %v9377_v34 = vpack.c.b16 %v2379_v8, %v2379_v8 }
  0xd3   : > { %6302 = vst.msk [vmem:[%s9163_s26 + $0x10] sm:$0xf] %vm469_vm2, %v760_v27  ;;  %v752_v36 = vadd.f32 %v746_v24, %v680_v28  ;;  %v9351_v24 = vld [vmem:[%s8792_s16 + $0x60] sm:$0xff]  ;;  %v8488_v27 = vld [vmem:[%s10523_s1 + $0x18] sm:$0xff]  ;;  %v8496_v28 = vld [vmem:[%s10523_s1 + $0x50] sm:$0xff]  ;;  %v9374_v32 = vpack.c.b16 %v2250_v23, %v2250_v23 }
  0xd4   : > { %v2258_v45 = vrot.slane %v2256_v33, 1  ;;  %v6984_v23 = vld [vmem:[%s8792_s16 + $0x68] sm:$0x7] }
  0xd5   : > { %v755_v42 = vadd.f32 %v9152_v38, %v752_v36 }
  0xd7   : > { %v758_v47 = vmax.f32 %v755_v42, 0.0 }
  0xd8   : > { %v676_v48 = vpop.f32.mrf.mxu2  ;;  %v847_v54 = vpop.f32.mrf.mxu0 }
  0xd9   : > { %v748_v49 = vpop.f32.mrf.mxu3  ;;  %v761_v53 = vpack.c.bf16 %v758_v47, %v758_v47  ;;  %v893_v55 = vpop.f32.mrf.mxu1  ;;  %v2441_v47 = vshrl.u32 %v9351_v24, 16 }
  0xda   : > { %v894_v59 = vadd.f32 %v893_v55, %v847_v54  ;;  %v2447_v49 = vshll.u32 %v9377_v34, 16  ;;  %v8486_v54 = vld [vmem:[%s10523_s1 + $0x8] sm:$0xff] }
  0xdb   : > { %6303 = vst.msk [vmem:[%s9163_s26 + $0x14] sm:$0x3] %vm472_vm3, %v761_v53  ;;  %6787 = vmatmul.msk.bf16.vlgmr.msra.gmra.mxu0 %vm241_vm1, %v1972_v56  ;;  %v8490_v53 = vld [vmem:[%s10523_s1 + $0x28] sm:$0xff] }
  0xdc   : > { %6805 = vmatmul.msk.bf16.vlgmr.msra.gmra.mxu1 %vm241_vm1, %v9257_v9  ;;  %v2159_v9 = vshrl.u32 %v9286_v21, 16  ;;  %2594 = vmatpush.bf16.msra.mxu0 %v8492_v26 }
  0xdd   : > { %6838 = vmatmul.msk.bf16.vlgmr.msra.gmra.mxu2 %vm241_vm1, %v9260_v11  ;;  %2640 = vmatpush.bf16.msra.mxu1 %v8488_v27 }
  0xde   : > { %6864 = vmatmul.msk.bf16.vlgmr.msra.gmra.mxu3 %vm241_vm1, %v2158_v58  ;;  %2708 = vmatpush.bf16.msra.mxu2 %v8497_v60  ;;  %v2161_v5 = vor.u32 %v2159_v9, %v2157_v46  ;;  %v2261_v46 = vshll.u32 %v9374_v32, 16  ;;  %v8485_v9 = vld [vmem:[%s10523_s1] sm:$0xff] }
  0xdf   : > { %2780 = vmatpush.bf16.msra.mxu3 %v8501_v61 }
  0xe0   : > { %v961_v62 = vpop.f32.mrf.mxu2  ;;  %v849_v1 = vpop.f32.mrf.mxu0  ;;  %2595 = vmatpush.bf16.msra.mxu0 %v8491_v39  ;;  %v2263_v57 = vrot.slane %v2261_v46, 1 }
  0xe1   : > { %v1033_v63 = vpop.f32.mrf.mxu3  ;;  %v970_v0 = vadd.f32 %v961_v62, %v894_v59  ;;  %v895_v2 = vpop.f32.mrf.mxu1  ;;  %2641 = vmatpush.bf16.msra.mxu1 %v8487_v40  ;;  %v2449_v59 = vrot.slane %v2447_v49, 1  ;;  %v8510_v40 = vld [vmem:[%s10523_s1 + $0x38] sm:$0xff] }
  0xe2   : > { %v896_v6 = vadd.f32 %v895_v2, %v849_v1  ;;  %2709 = vmatpush.bf16.msra.mxu2 %v8496_v28  ;;  %v8489_v1 = vld [vmem:[%s10523_s1 + $0x20] sm:$0xff] }
  0xe3   : > { %v1042_v3 = vadd.f32 %v1033_v63, %v970_v0  ;;  %2781 = vmatpush.bf16.msra.mxu3 %v8500_v29  ;;  %v8494_v63 = vld [vmem:[%s10523_s1 + $0x40] sm:$0xff] }
  0xe4   : > { %2596 = vmatpush.bf16.msra.mxu0 %v8490_v53  ;;  %v8498_v0 = vld [vmem:[%s10523_s1 + $0x60] sm:$0xff]  ;;  %v8505_v53 = vld [vmem:[%s10523_s1 + $0x10] sm:$0xff] }
  0xe5   : > { %v1045_v4 = vadd.f32 %v9152_v38, %v1042_v3  ;;  %2642 = vmatpush.bf16.msra.mxu1 %v8486_v54 }
  0xe6   : > { %2710 = vmatpush.bf16.msra.mxu2 %v8495_v51 }
  0xe7   : > { %v1048_v11 = vmax.f32 %v1045_v4, 0.0  ;;  %2782 = vmatpush.bf16.msra.mxu3 %v8499_v52  ;;  %v8509_v52 = vld [vmem:[%s10523_s1 + $0x30] sm:$0xff] }
  0xe8   : > { %v963_v13 = vpop.f32.mrf.mxu2  ;;  %v852_v18 = vpop.f32.mrf.mxu0  ;;  %2597 = vmatpush.bf16.msra.mxu0 %v8489_v1  ;;  %v8517_v1 = vld [vmem:[%s10523_s1 + $0x68] sm:$0xff] }
  0xe9   : > { %v1035_v14 = vpop.f32.mrf.mxu3  ;;  %v1051_v16 = vpack.c.bf16 %v1048_v11, %v1048_v11  ;;  %v971_v17 = vadd.f32 %v963_v13, %v896_v6  ;;  %v898_v20 = vpop.f32.mrf.mxu1  ;;  %2643 = vmatpush.bf16.msra.mxu1 %v8485_v9  ;;  %v8515_v6 = vld [vmem:[%s10523_s1 + $0x58] sm:$0xff] }
  0xea   : > { %v899_v31 = vadd.f32 %v898_v20, %v852_v18  ;;  %2711 = vmatpush.bf16.msra.mxu2 %v8494_v63  ;;  %v2265_v20 = vshrl.u32 %v9374_v32, 16 }
  0xeb   : > { %6414 = vst.msk [vmem:[%s9163_s26 + $0x18] sm:$0xf] %vm469_vm2, %v1051_v16  ;;  %v1043_v25 = vadd.f32 %v1035_v14, %v971_v17  ;;  %6788 = vmatmul.msk.bf16.gmra.mxu0 %vm241_vm1, %v1975_v15  ;;  %2783 = vmatpush.bf16.msra.mxu3 %v8498_v0  ;;  %v8513_v0 = vld [vmem:[%s10523_s1 + $0x48] sm:$0xff] }
  0xec   : > { %6806 = vmatmul.msk.bf16.gmra.mxu1 %vm241_vm1, %v9283_v19  ;;  %v2443_v19 = vshll.u32 %v9351_v24, 16  ;;  %v2267_v28 = vor.u32 %v2265_v20, %v2263_v57 }
  0xed   : > { %v1046_v30 = vadd.f32 %v9152_v38, %v1043_v25  ;;  %6839 = vmatmul.msk.bf16.gmra.mxu2 %vm241_vm1, %v9286_v21  ;;  %v2254_v21 = vshrl.u32 %v9348_v22, 16  ;;  %v7035_v25 = vld [vmem:[%s8792_s16 + $0x74] sm:$0x7] }
  0xee   : > { %6865 = vmatmul.msk.bf16.gmra.mxu3 %vm241_vm1, %v2161_v5  ;;  %v2445_v48 = vrot.slane %v2443_v19, 1 }
  0xef   : > { %v1049_v35 = vmax.f32 %v1046_v30, 0.0  ;;  %v2259_v56 = vor.u32 %v2258_v45, %v2254_v21  ;;  %v2671_v21 = vunpack.c.l.b16 %v7035_v25  ;;  %v8537_v25 = vld [vmem:[%s10523_s1 + $0x78] sm:$0xff] }
  0xf0   : > { %v966_v36 = vpop.f32.mrf.mxu2  ;;  %v854_v43 = vpop.f32.mrf.mxu0  ;;  %v2446_v58 = vor.u32 %v2445_v48, %v2441_v47 }
  0xf1   : > { %v1038_v37 = vpop.f32.mrf.mxu3  ;;  %v1052_v41 = vpack.c.bf16 %v1049_v35, %v1049_v35  ;;  %v972_v42 = vadd.f32 %v966_v36, %v899_v31  ;;  %v900_v44 = vpop.f32.mrf.mxu1  ;;  %v2264_v4 = vsel %vm201_vm0, %v2259_v56, %v2263_v57  ;;  %v9439_v35 = vld [vmem:[%s8792_s16 + $0x60] sm:$0xff]  ;;  %v2542_v36 = vunpack.c.l.b16 %v6984_v23  ;;  %v8518_v43 = vld [vmem:[%s10523_s1 + $0x70] sm:$0xff] }
  0xf2   : > { %v2450_v10 = vsel %vm201_vm0, %v2446_v58, %v2449_v59  ;;  %v2548_v47 = vshll.u32 %v9439_v35, 16  ;;  %v9468_v48 = vpack.c.b16 %v2671_v21, %v2671_v21 }
  0xf3   : > { %6415 = vst.msk [vmem:[%s9163_s26 + $0x1c] sm:$0xf] %vm469_vm2, %v1052_v41  ;;  %v1044_v50 = vadd.f32 %v1038_v37, %v972_v42  ;;  %v9442_v37 = vld [vmem:[%s8792_s16 + $0x6c] sm:$0xff]  ;;  %v8506_v41 = vld [vmem:[%s10523_s1 + $0x18] sm:$0xff]  ;;  %v9465_v46 = vpack.c.b16 %v2542_v36, %v2542_v36  ;;  %v7097_v36 = vld [vmem:[%s8792_s16 + $0x74] sm:$0x7] }
  0xf4   : > { %v8514_v42 = vld [vmem:[%s10523_s1 + $0x50] sm:$0xff]  ;;  %v2550_v58 = vrot.slane %v2548_v47, 1 }
  0xf5   : > { %v1047_v55 = vadd.f32 %v9152_v38, %v1044_v50 }
  0xf7   : > { %v1050_v60 = vmax.f32 %v1047_v55, 0.0 }
  0xf8   : > { %v968_v61 = vpop.f32.mrf.mxu2  ;;  %v1139_v3 = vpop.f32.mrf.mxu0 }
  0xf9   : > { %v1040_v62 = vpop.f32.mrf.mxu3  ;;  %v1053_v2 = vpack.c.bf16 %v1050_v60, %v1050_v60  ;;  %v1185_v7 = vpop.f32.mrf.mxu1  ;;  %v2733_v60 = vshrl.u32 %v9442_v37, 16 }
  0xfa   : > { %v1186_v11 = vadd.f32 %v1185_v7, %v1139_v3  ;;  %v2739_v62 = vshll.u32 %v9468_v48, 16  ;;  %v8504_v3 = vld [vmem:[%s10523_s1 + $0x8] sm:$0xff] }
  0xfb   : > { %6416 = vst.msk [vmem:[%s9163_s26 + $0x20] sm:$0x3] %vm472_vm3, %v1053_v2  ;;  %6900 = vmatmul.msk.bf16.vlgmr.msrb.gmra.mxu0 %vm241_vm1, %v2264_v4  ;;  %v8508_v2 = vld [vmem:[%s10523_s1 + $0x28] sm:$0xff] }
  0xfc   : > { %6918 = vmatmul.msk.bf16.vlgmr.msrb.gmra.mxu1 %vm241_vm1, %v9348_v22  ;;  %v2451_v22 = vshrl.u32 %v9377_v34, 16  ;;  %2886 = vmatpush.bf16.msrb.mxu0 %v8510_v40 }
  0xfd   : > { %6951 = vmatmul.msk.bf16.vlgmr.msrb.gmra.mxu2 %vm241_vm1, %v9351_v24  ;;  %2932 = vmatpush.bf16.msrb.mxu1 %v8506_v41 }
  0xfe   : > { %6977 = vmatmul.msk.bf16.vlgmr.msrb.gmra.mxu3 %vm241_vm1, %v2450_v10  ;;  %3000 = vmatpush.bf16.msrb.mxu2 %v8515_v6  ;;  %v2453_v19 = vor.u32 %v2451_v22, %v2449_v59  ;;  %v2553_v59 = vshll.u32 %v9465_v46, 16  ;;  %v8503_v22 = vld [vmem:[%s10523_s1] sm:$0xff] }
  0xff   : > { %3072 = vmatpush.bf16.msrb.mxu3 %v8519_v12 }
 0x100   : > { %v1253_v13 = vpop.f32.mrf.mxu2  ;;  %v1141_v16 = vpop.f32.mrf.mxu0  ;;  %2887 = vmatpush.bf16.msrb.mxu0 %v8509_v52  ;;  %v2555_v9 = vrot.slane %v2553_v59, 1 }
 0x101   : > { %v1325_v14 = vpop.f32.mrf.mxu3  ;;  %v1262_v15 = vadd.f32 %v1253_v13, %v1186_v11  ;;  %v1187_v17 = vpop.f32.mrf.mxu1  ;;  %2933 = vmatpush.bf16.msrb.mxu1 %v8505_v53  ;;  %v2741_v11 = vrot.slane %v2739_v62, 1  ;;  %v8528_v53 = vld [vmem:[%s10523_s1 + $0x38] sm:$0xff] }
 0x102   : > { %v1188_v8 = vadd.f32 %v1187_v17, %v1141_v16  ;;  %3001 = vmatpush.bf16.msrb.mxu2 %v8514_v42  ;;  %v8507_v16 = vld [vmem:[%s10523_s1 + $0x20] sm:$0xff] }
 0x103   : > { %v1334_v18 = vadd.f32 %v1325_v14, %v1262_v15  ;;  %3073 = vmatpush.bf16.msrb.mxu3 %v8518_v43  ;;  %v8512_v14 = vld [vmem:[%s10523_s1 + $0x40] sm:$0xff] }
 0x104   : > { %2888 = vmatpush.bf16.msrb.mxu0 %v8508_v2  ;;  %v8516_v15 = vld [vmem:[%s10523_s1 + $0x60] sm:$0xff]  ;;  %v8523_v2 = vld [vmem:[%s10523_s1 + $0x10] sm:$0xff] }
 0x105   : > { %v1337_v5 = vadd.f32 %v9152_v38, %v1334_v18  ;;  %2934 = vmatpush.bf16.msrb.mxu1 %v8504_v3 }
 0x106   : > { %3002 = vmatpush.bf16.msrb.mxu2 %v8513_v0 }
 0x107   : > { %v1340_v24 = vmax.f32 %v1337_v5, 0.0  ;;  %3074 = vmatpush.bf16.msrb.mxu3 %v8517_v1  ;;  %v8527_v1 = vld [vmem:[%s10523_s1 + $0x30] sm:$0xff] }
 0x108   : > { %v1255_v26 = vpop.f32.mrf.mxu2  ;;  %v1144_v31 = vpop.f32.mrf.mxu0  ;;  %2889 = vmatpush.bf16.msrb.mxu0 %v8507_v16  ;;  %v8535_v16 = vld [vmem:[%s10523_s1 + $0x68] sm:$0xff] }
 0x109   : > { %v1327_v27 = vpop.f32.mrf.mxu3  ;;  %v1343_v29 = vpack.c.bf16 %v1340_v24, %v1340_v24  ;;  %v1263_v30 = vadd.f32 %v1255_v26, %v1188_v8  ;;  %v1190_v33 = vpop.f32.mrf.mxu1  ;;  %2935 = vmatpush.bf16.msrb.mxu1 %v8503_v22  ;;  %v8533_v8 = vld [vmem:[%s10523_s1 + $0x58] sm:$0xff] }
 0x10a   : > { %v1191_v45 = vadd.f32 %v1190_v33, %v1144_v31  ;;  %3003 = vmatpush.bf16.msrb.mxu2 %v8512_v14  ;;  %v2557_v33 = vshrl.u32 %v9465_v46, 16 }
 0x10b   : > { %6527 = vst.msk [vmem:[%s9163_s26 + $0x24] sm:$0xf] %vm469_vm2, %v1343_v29  ;;  %v1335_v39 = vadd.f32 %v1327_v27, %v1263_v30  ;;  %6901 = vmatmul.msk.bf16.gmra.mxu0 %vm241_vm1, %v2267_v28  ;;  %3075 = vmatpush.bf16.msrb.mxu3 %v8516_v15  ;;  %v8531_v15 = vld [vmem:[%s10523_s1 + $0x48] sm:$0xff] }
 0x10c   : > { %6919 = vmatmul.msk.bf16.gmra.mxu1 %vm241_vm1, %v9374_v32  ;;  %v2735_v32 = vshll.u32 %v9442_v37, 16  ;;  %v2559_v42 = vor.u32 %v2557_v33, %v2555_v9 }
 0x10d   : > { %v1338_v44 = vadd.f32 %v9152_v38, %v1335_v39  ;;  %6952 = vmatmul.msk.bf16.gmra.mxu2 %vm241_vm1, %v9377_v34  ;;  %v2546_v34 = vshrl.u32 %v9439_v35, 16  ;;  %v7148_v39 = vld [vmem:[%s8792_s16 + $0x80] sm:$0x7] }
 0x10e   : > { %6978 = vmatmul.msk.bf16.gmra.mxu3 %vm241_vm1, %v2453_v19  ;;  %v2737_v61 = vrot.slane %v2735_v32, 1 }
 0x10f   : > { %v1341_v49 = vmax.f32 %v1338_v44, 0.0  ;;  %v2551_v4 = vor.u32 %v2550_v58, %v2546_v34  ;;  %v2963_v34 = vunpack.c.l.b16 %v7148_v39 }
 0x110   : > { %v1258_v50 = vpop.f32.mrf.mxu2  ;;  %v1146_v56 = vpop.f32.mrf.mxu0  ;;  %v2738_v10 = vor.u32 %v2737_v61, %v2733_v60 }
 0x111   : > { %v1330_v51 = vpop.f32.mrf.mxu3  ;;  %v1344_v54 = vpack.c.bf16 %v1341_v49, %v1341_v49  ;;  %v1264_v55 = vadd.f32 %v1258_v50, %v1191_v45  ;;  %v1192_v57 = vpop.f32.mrf.mxu1  ;;  %v2556_v5 = vsel %vm201_vm0, %v2551_v4, %v2555_v9  ;;  %v9530_v49 = vld [vmem:[%s8792_s16 + $0x6c] sm:$0xff]  ;;  %v2834_v50 = vunpack.c.l.b16 %v7097_v36 }
 0x112   : > { %v2742_v23 = vsel %vm201_vm0, %v2738_v10, %v2741_v11  ;;  %v8536_v56 = vld [vmem:[%s10523_s1 + $0x70] sm:$0xff]  ;;  %v2840_v60 = vshll.u32 %v9530_v49, 16  ;;  %v9559_v61 = vpack.c.b16 %v2963_v34, %v2963_v34 }
 0x113   : > { %6528 = vst.msk [vmem:[%s9163_s26 + $0x28] sm:$0xf] %vm469_vm2, %v1344_v54  ;;  %v1336_v63 = vadd.f32 %v1330_v51, %v1264_v55  ;;  %v9533_v51 = vld [vmem:[%s8792_s16 + $0x78] sm:$0xff]  ;;  %v8532_v55 = vld [vmem:[%s10523_s1 + $0x50] sm:$0xff]  ;;  %v9556_v59 = vpack.c.b16 %v2834_v50, %v2834_v50  ;;  %v7210_v50 = vld [vmem:[%s8792_s16 + $0x80] sm:$0x7] }
 0x114   : > { %v8524_v54 = vld [vmem:[%s10523_s1 + $0x18] sm:$0xff]  ;;  %v2842_v10 = vrot.slane %v2840_v60, 1 }
 0x115   : > { %v1339_v7 = vadd.f32 %v9152_v38, %v1336_v63 }
 0x117   : > { %v1342_v6 = vmax.f32 %v1339_v7, 0.0 }
 0x118   : > { %v1260_v12 = vpop.f32.mrf.mxu2  ;;  %v1431_v18 = vpop.f32.mrf.mxu0 }
 0x119   : > { %v1332_v13 = vpop.f32.mrf.mxu3  ;;  %v1345_v17 = vpack.c.bf16 %v1342_v6, %v1342_v6  ;;  %v1477_v20 = vpop.f32.mrf.mxu1  ;;  %v3025_v6 = vshrl.u32 %v9533_v51, 16 }
 0x11a   : > { %v1478_v24 = vadd.f32 %v1477_v20, %v1431_v18  ;;  %v3031_v13 = vshll.u32 %v9559_v61, 16  ;;  %v8522_v18 = vld [vmem:[%s10523_s1 + $0x8] sm:$0xff] }
 0x11b   : > { %6529 = vst.msk [vmem:[%s9163_s26 + $0x2c] sm:$0x3] %vm472_vm3, %v1345_v17  ;;  %7013 = vmatmul.msk.bf16.vlgmr.msra.gmra.mxu0 %vm241_vm1, %v2556_v5  ;;  %v8526_v17 = vld [vmem:[%s10523_s1 + $0x28] sm:$0xff] }
 0x11c   : > { %7031 = vmatmul.msk.bf16.vlgmr.msra.gmra.mxu1 %vm241_vm1, %v9439_v35  ;;  %v2743_v35 = vshrl.u32 %v9468_v48, 16  ;;  %3178 = vmatpush.bf16.msra.mxu0 %v8528_v53 }
 0x11d   : > { %7064 = vmatmul.msk.bf16.vlgmr.msra.gmra.mxu2 %vm241_vm1, %v9442_v37  ;;  %3224 = vmatpush.bf16.msra.mxu1 %v8524_v54 }
 0x11e   : > { %7090 = vmatmul.msk.bf16.vlgmr.msra.gmra.mxu3 %vm241_vm1, %v2742_v23  ;;  %3292 = vmatpush.bf16.msra.mxu2 %v8533_v8  ;;  %v2745_v32 = vor.u32 %v2743_v35, %v2741_v11  ;;  %v2845_v11 = vshll.u32 %v9556_v59, 16 }
 0x11f   : > { %3364 = vmatpush.bf16.msra.mxu3 %v8537_v25 }
 0x120   : > { %v1545_v26 = vpop.f32.mrf.mxu2  ;;  %v1433_v29 = vpop.f32.mrf.mxu0  ;;  %3179 = vmatpush.bf16.msra.mxu0 %v8527_v1  ;;  %v2847_v22 = vrot.slane %v2845_v11, 1 }
 0x121   : > { %v1617_v27 = vpop.f32.mrf.mxu3  ;;  %v1554_v28 = vadd.f32 %v1545_v26, %v1478_v24  ;;  %v1479_v30 = vpop.f32.mrf.mxu1  ;;  %3225 = vmatpush.bf16.msra.mxu1 %v8523_v2  ;;  %v3033_v24 = vrot.slane %v3031_v13, 1  ;;  %v8546_v2 = vld [vmem:[%s10523_s1 + $0x38] sm:$0xff] }
 0x122   : > { %v1480_v21 = vadd.f32 %v1479_v30, %v1433_v29  ;;  %3293 = vmatpush.bf16.msra.mxu2 %v8532_v55 }
 0x123   : > { %v1626_v31 = vadd.f32 %v1617_v27, %v1554_v28  ;;  %3365 = vmatpush.bf16.msra.mxu3 %v8536_v56  ;;  %v8530_v27 = vld [vmem:[%s10523_s1 + $0x40] sm:$0xff] }
 0x124   : > { %3180 = vmatpush.bf16.msra.mxu0 %v8526_v17  ;;  %v8525_v28 = vld [vmem:[%s10523_s1 + $0x20] sm:$0xff]  ;;  %v8541_v17 = vld [vmem:[%s10523_s1 + $0x10] sm:$0xff] }
 0x125   : > { %v1629_v19 = vadd.f32 %v9152_v38, %v1626_v31  ;;  %3226 = vmatpush.bf16.msra.mxu1 %v8522_v18 }
 0x126   : > { %3294 = vmatpush.bf16.msra.mxu2 %v8531_v15 }
 0x127   : > { %v1632_v37 = vmax.f32 %v1629_v19, 0.0  ;;  %3366 = vmatpush.bf16.msra.mxu3 %v8535_v16  ;;  %v8521_v19 = vld [vmem:[%s10523_s1] sm:$0xff]  ;;  %v8545_v16 = vld [vmem:[%s10523_s1 + $0x30] sm:$0xff] }
 0x128   : > { %v1547_v40 = vpop.f32.mrf.mxu2  ;;  %v1436_v45 = vpop.f32.mrf.mxu0  ;;  %3181 = vmatpush.bf16.msra.mxu0 %v8525_v28  ;;  %v8553_v28 = vld [vmem:[%s10523_s1 + $0x68] sm:$0xff] }
 0x129   : > { %v1619_v41 = vpop.f32.mrf.mxu3  ;;  %v1635_v43 = vpack.c.bf16 %v1632_v37, %v1632_v37  ;;  %v1555_v44 = vadd.f32 %v1547_v40, %v1480_v21  ;;  %v1482_v47 = vpop.f32.mrf.mxu1  ;;  %3227 = vmatpush.bf16.msra.mxu1 %v8521_v19  ;;  %v8551_v37 = vld [vmem:[%s10523_s1 + $0x58] sm:$0xff] }
 0x12a   : > { %v1483_v58 = vadd.f32 %v1482_v47, %v1436_v45  ;;  %3295 = vmatpush.bf16.msra.mxu2 %v8530_v27  ;;  %v8555_v21 = vld [vmem:[%s10523_s1 + $0x78] sm:$0xff]  ;;  %v2849_v45 = vshrl.u32 %v9556_v59, 16  ;;  %v9619_v47 = vld [vmem:[%s10524_s2] ss:$0 sm:$0xff] }
 0x12b   : > { %6640 = vst.msk [vmem:[%s9163_s26 + $0x30] sm:$0xf] %vm469_vm2, %v1635_v43  ;;  %v1627_v52 = vadd.f32 %v1619_v41, %v1555_v44  ;;  %7014 = vmatmul.msk.bf16.gmra.mxu0 %vm241_vm1, %v2559_v42 }
 0x12c   : > { %7032 = vmatmul.msk.bf16.gmra.mxu1 %vm241_vm1, %v9465_v46  ;;  %v3027_v46 = vshll.u32 %v9533_v51, 16  ;;  %v2851_v55 = vor.u32 %v2849_v45, %v2847_v22 }
 0x12d   : > { %v1630_v57 = vadd.f32 %v9152_v38, %v1627_v52  ;;  %7065 = vmatmul.msk.bf16.gmra.mxu2 %vm241_vm1, %v9468_v48  ;;  %v2838_v48 = vshrl.u32 %v9530_v49, 16  ;;  %v7261_v52 = vld [vmem:[%s8792_s16 + $0x8c] sm:$0x7] }
 0x12e   : > { %7091 = vmatmul.msk.bf16.gmra.mxu3 %vm241_vm1, %v2745_v32  ;;  %v3029_v12 = vrot.slane %v3027_v46, 1 }
 0x12f   : > { %v1633_v62 = vmax.f32 %v1630_v57, 0.0  ;;  %v2843_v5 = vor.u32 %v2842_v10, %v2838_v48  ;;  %v3255_v48 = vunpack.c.l.b16 %v7261_v52  ;;  %v8573_v52 = vld [vmem:[%s10523_s1 + $0x78] sm:$0xff] }
 0x130   : > { %v1550_v63 = vpop.f32.mrf.mxu2  ;;  %v1438_v4 = vpop.f32.mrf.mxu0  ;;  %v3030_v23 = vor.u32 %v3029_v12, %v3025_v6 }
 0x131   : > { %v1622_v0 = vpop.f32.mrf.mxu3  ;;  %v1636_v3 = vpack.c.bf16 %v1633_v62, %v1633_v62  ;;  %v1556_v7 = vadd.f32 %v1550_v63, %v1483_v58  ;;  %v1484_v9 = vpop.f32.mrf.mxu1  ;;  %v2848_v33 = vsel %vm201_vm0, %v2843_v5, %v2847_v22  ;;  %v9626_v62 = vld [vmem:[%s8792_s16 + $0x78] sm:$0xff]  ;;  %v3126_v63 = vunpack.c.l.b16 %v7210_v50  ;;  %v8554_v4 = vld [vmem:[%s10523_s1 + $0x70] sm:$0xff] }
 0x132   : > { %v3034_v35 = vsel %vm201_vm0, %v3030_v23, %v3033_v24  ;;  %v3132_v6 = vshll.u32 %v9626_v62, 16  ;;  %v9655_v12 = vpack.c.b16 %v3255_v48, %v3255_v48 }
 0x133   : > { %6641 = vst.msk [vmem:[%s9163_s26 + $0x34] sm:$0xf] %vm469_vm2, %v1636_v3  ;;  %v1628_v14 = vadd.f32 %v1622_v0, %v1556_v7  ;;  %v9629_v0 = vld [vmem:[%s8792_s16 + $0x84] sm:$0xff]  ;;  %v8542_v3 = vld [vmem:[%s10523_s1 + $0x18] sm:$0xff]  ;;  %v8550_v7 = vld [vmem:[%s10523_s1 + $0x50] sm:$0xff]  ;;  %v9652_v11 = vpack.c.b16 %v3126_v63, %v3126_v63 }
 0x134   : > { %v3134_v23 = vrot.slane %v3132_v6, 1  ;;  %v7323_v63 = vld [vmem:[%s8792_s16 + $0x8c] sm:$0x7] }
 0x135   : > { %v1631_v20 = vadd.f32 %v9152_v38, %v1628_v14  ;;  %v8534_v38 = vld [vmem:[%s10523_s1 + $0x60] sm:$0xff] }
 0x136   : > { %3367 = vmatpush.bf16.msra.mxu3 %v8534_v38  ;;  %v8549_v38 = vld [vmem:[%s10523_s1 + $0x48] sm:$0xff] }
 0x137   : > { %v1634_v8 = vmax.f32 %v1631_v20, 0.0 }
 0x138   : > { %v1552_v25 = vpop.f32.mrf.mxu2  ;;  %v1723_v30 = vpop.f32.mrf.mxu0 }
 0x139   : > { %v1624_v26 = vpop.f32.mrf.mxu3  ;;  %v1637_v29 = vpack.c.bf16 %v1634_v8, %v1634_v8  ;;  %v1769_v31 = vpop.f32.mrf.mxu1  ;;  %v3317_v8 = vshrl.u32 %v9629_v0, 16 }
 0x13a   : > { %v1770_v36 = vadd.f32 %v1769_v31, %v1723_v30  ;;  %v3323_v26 = vshll.u32 %v9655_v12, 16  ;;  %v8540_v30 = vld [vmem:[%s10523_s1 + $0x8] sm:$0xff] }
 0x13b   : > { %6642 = vst.msk [vmem:[%s9163_s26 + $0x38] sm:$0x3] %vm472_vm3, %v1637_v29  ;;  %7126 = vmatmul.msk.bf16.vlgmr.msrb.gmra.mxu0 %vm241_vm1, %v2848_v33  ;;  %v8544_v29 = vld [vmem:[%s10523_s1 + $0x28] sm:$0xff] }
 0x13c   : > { %7144 = vmatmul.msk.bf16.vlgmr.msrb.gmra.mxu1 %vm241_vm1, %v9530_v49  ;;  %v3035_v49 = vshrl.u32 %v9559_v61, 16  ;;  %3470 = vmatpush.bf16.msrb.mxu0 %v8546_v2 }
 0x13d   : > { %7177 = vmatmul.msk.bf16.vlgmr.msrb.gmra.mxu2 %vm241_vm1, %v9533_v51  ;;  %3516 = vmatpush.bf16.msrb.mxu1 %v8542_v3 }
 0x13e   : > { %7203 = vmatmul.msk.bf16.vlgmr.msrb.gmra.mxu3 %vm241_vm1, %v3034_v35  ;;  %3584 = vmatpush.bf16.msrb.mxu2 %v8551_v37  ;;  %v3037_v46 = vor.u32 %v3035_v49, %v3033_v24  ;;  %v3137_v24 = vshll.u32 %v9652_v11, 16  ;;  %v8539_v49 = vld [vmem:[%s10523_s1] sm:$0xff] }
 0x13f   : > { %3656 = vmatpush.bf16.msrb.mxu3 %v8555_v21 }
 0x140   : > { %v1837_v39 = vpop.f32.mrf.mxu2  ;;  %v1725_v42 = vpop.f32.mrf.mxu0  ;;  %3471 = vmatpush.bf16.msrb.mxu0 %v8545_v16  ;;  %v3139_v19 = vrot.slane %v3137_v24, 1 }
 0x141   : > { %v1909_v40 = vpop.f32.mrf.mxu3  ;;  %v1846_v41 = vadd.f32 %v1837_v39, %v1770_v36  ;;  %v1771_v43 = vpop.f32.mrf.mxu1  ;;  %3517 = vmatpush.bf16.msrb.mxu1 %v8541_v17  ;;  %v3325_v36 = vrot.slane %v3323_v26, 1  ;;  %v8564_v17 = vld [vmem:[%s10523_s1 + $0x38] sm:$0xff] }
 0x142   : > { %v1772_v34 = vadd.f32 %v1771_v43, %v1725_v42  ;;  %3585 = vmatpush.bf16.msrb.mxu2 %v8550_v7  ;;  %v8543_v42 = vld [vmem:[%s10523_s1 + $0x20] sm:$0xff] }
 0x143   : > { %v1918_v44 = vadd.f32 %v1909_v40, %v1846_v41  ;;  %3657 = vmatpush.bf16.msrb.mxu3 %v8554_v4  ;;  %v8548_v40 = vld [vmem:[%s10523_s1 + $0x40] sm:$0xff] }
 0x144   : > { %3472 = vmatpush.bf16.msrb.mxu0 %v8544_v29  ;;  %v8552_v41 = vld [vmem:[%s10523_s1 + $0x60] sm:$0xff]  ;;  %v8559_v29 = vld [vmem:[%s10523_s1 + $0x10] sm:$0xff] }
 0x145   : > { %v1921_v32 = vadd.f32 %v9619_v47, %v1918_v44  ;;  %3518 = vmatpush.bf16.msrb.mxu1 %v8540_v30 }
 0x146   : > { %3586 = vmatpush.bf16.msrb.mxu2 %v8549_v38 }
 0x147   : > { %v1924_v51 = vmax.f32 %v1921_v32, 0.0  ;;  %3658 = vmatpush.bf16.msrb.mxu3 %v8553_v28  ;;  %v8563_v28 = vld [vmem:[%s10523_s1 + $0x30] sm:$0xff] }
 0x148   : > { %v1839_v53 = vpop.f32.mrf.mxu2  ;;  %v1728_v58 = vpop.f32.mrf.mxu0  ;;  %3473 = vmatpush.bf16.msrb.mxu0 %v8543_v42  ;;  %v8571_v42 = vld [vmem:[%s10523_s1 + $0x68] sm:$0xff] }
 0x149   : > { %v1911_v54 = vpop.f32.mrf.mxu3  ;;  %v1927_v56 = vpack.c.bf16 %v1924_v51, %v1924_v51  ;;  %v1847_v57 = vadd.f32 %v1839_v53, %v1772_v34  ;;  %v1774_v60 = vpop.f32.mrf.mxu1  ;;  %3519 = vmatpush.bf16.msrb.mxu1 %v8539_v49  ;;  %v8569_v34 = vld [vmem:[%s10523_s1 + $0x58] sm:$0xff] }
 0x14a   : > { %v1775_v10 = vadd.f32 %v1774_v60, %v1728_v58  ;;  %3587 = vmatpush.bf16.msrb.mxu2 %v8548_v40  ;;  %v3141_v60 = vshrl.u32 %v9652_v11, 16 }
 0x14b   : > { %6753 = vst.msk [vmem:[%s9163_s26 + $0x3c] sm:$0xf] %vm469_vm2, %v1927_v56  ;;  %v1919_v1 = vadd.f32 %v1911_v54, %v1847_v57  ;;  %7127 = vmatmul.msk.bf16.gmra.mxu0 %vm241_vm1, %v2851_v55  ;;  %3659 = vmatpush.bf16.msrb.mxu3 %v8552_v41  ;;  %v8567_v41 = vld [vmem:[%s10523_s1 + $0x48] sm:$0xff] }
 0x14c   : > { %7145 = vmatmul.msk.bf16.gmra.mxu1 %vm241_vm1, %v9556_v59  ;;  %v3319_v59 = vshll.u32 %v9629_v0, 16  ;;  %v3143_v7 = vor.u32 %v3141_v60, %v3139_v19 }
 0x14d   : > { %v1922_v9 = vadd.f32 %v9619_v47, %v1919_v1  ;;  %7178 = vmatmul.msk.bf16.gmra.mxu2 %vm241_vm1, %v9559_v61  ;;  %v3130_v61 = vshrl.u32 %v9626_v62, 16  ;;  %v7374_v1 = vld [vmem:[%s8792_s16 + $0x98] sm:$0x7] }
 0x14e   : > { %7204 = vmatmul.msk.bf16.gmra.mxu3 %vm241_vm1, %v3037_v46  ;;  %v3321_v25 = vrot.slane %v3319_v59, 1 }
 0x14f   : > { %v1925_v13 = vmax.f32 %v1922_v9, 0.0  ;;  %v3135_v33 = vor.u32 %v3134_v23, %v3130_v61  ;;  %v3547_v61 = vunpack.c.l.b16 %v7374_v1  ;;  %v8591_v1 = vld [vmem:[%s10523_s1 + $0x78] sm:$0xff] }
 0x150   : > { %v1842_v14 = vpop.f32.mrf.mxu2  ;;  %v1730_v5 = vpop.f32.mrf.mxu0  ;;  %v3322_v35 = vor.u32 %v3321_v25, %v3317_v8 }
 0x151   : > { %v1914_v15 = vpop.f32.mrf.mxu3  ;;  %v1928_v18 = vpack.c.bf16 %v1925_v13, %v1925_v13  ;;  %v1848_v20 = vadd.f32 %v1842_v14, %v1775_v10  ;;  %v1776_v22 = vpop.f32.mrf.mxu1  ;;  %v3140_v32 = vsel %vm201_vm0, %v3135_v33, %v3139_v19  ;;  %v9717_v13 = vld [vmem:[%s8792_s16 + $0x84] sm:$0xff]  ;;  %v3418_v14 = vunpack.c.l.b16 %v7323_v63  ;;  %v8572_v5 = vld [vmem:[%s10523_s1 + $0x70] sm:$0xff] }
 0x152   : > { %v3326_v50 = vsel %vm201_vm0, %v3322_v35, %v3325_v36  ;;  %v3424_v8 = vshll.u32 %v9717_v13, 16  ;;  %v9746_v25 = vpack.c.b16 %v3547_v61, %v3547_v61 }
 0x153   : > { %6754 = vst.msk [vmem:[%s9163_s26 + $0x40] sm:$0xf] %vm469_vm2, %v1928_v18  ;;  %v1920_v27 = vadd.f32 %v1914_v15, %v1848_v20  ;;  %v9720_v15 = vld [vmem:[%s8792_s16 + $0x90] sm:$0xff]  ;;  %v8560_v18 = vld [vmem:[%s10523_s1 + $0x18] sm:$0xff]  ;;  %v9743_v24 = vpack.c.b16 %v3418_v14, %v3418_v14 }
 0x154   : > { %v8568_v20 = vld [vmem:[%s10523_s1 + $0x50] sm:$0xff]  ;;  %v3426_v35 = vrot.slane %v3424_v8, 1  ;;  %v7436_v14 = vld [vmem:[%s8792_s16 + $0x98] sm:$0x7] }
 0x155   : > { %v1923_v31 = vadd.f32 %v9619_v47, %v1920_v27 }
 0x157   : > { %v1926_v37 = vmax.f32 %v1923_v31, 0.0 }
 0x158   : > { %v1844_v21 = vpop.f32.mrf.mxu2  ;;  %v2015_v44 = vpop.f32.mrf.mxu0 }
 0x159   : > { %v1916_v39 = vpop.f32.mrf.mxu3  ;;  %v1929_v43 = vpack.c.bf16 %v1926_v37, %v1926_v37  ;;  %v2061_v45 = vpop.f32.mrf.mxu1  ;;  %v3609_v37 = vshrl.u32 %v9720_v15, 16 }
 0x15a   : > { %v2062_v51 = vadd.f32 %v2061_v45, %v2015_v44  ;;  %v3615_v39 = vshll.u32 %v9746_v25, 16  ;;  %v8558_v44 = vld [vmem:[%s10523_s1 + $0x8] sm:$0xff] }
 0x15b   : > { %6755 = vst.msk [vmem:[%s9163_s26 + $0x44] sm:$0x3] %vm472_vm3, %v1929_v43  ;;  %7239 = vmatmul.msk.bf16.vlgmr.msra.gmra.mxu0 %vm241_vm1, %v3140_v32  ;;  %v8562_v43 = vld [vmem:[%s10523_s1 + $0x28] sm:$0xff] }
 0x15c   : > { %7257 = vmatmul.msk.bf16.vlgmr.msra.gmra.mxu1 %vm241_vm1, %v9626_v62  ;;  %v3327_v62 = vshrl.u32 %v9655_v12, 16  ;;  %3762 = vmatpush.bf16.msra.mxu0 %v8564_v17 }
 0x15d   : > { %7290 = vmatmul.msk.bf16.vlgmr.msra.gmra.mxu2 %vm241_vm1, %v9629_v0  ;;  %3808 = vmatpush.bf16.msra.mxu1 %v8560_v18 }
 0x15e   : > { %7316 = vmatmul.msk.bf16.vlgmr.msra.gmra.mxu3 %vm241_vm1, %v3326_v50  ;;  %3876 = vmatpush.bf16.msra.mxu2 %v8569_v34  ;;  %v3329_v59 = vor.u32 %v3327_v62, %v3325_v36  ;;  %v3429_v36 = vshll.u32 %v9743_v24, 16  ;;  %v8557_v62 = vld [vmem:[%s10523_s1] sm:$0xff] }
 0x15f   : > { %3948 = vmatpush.bf16.msra.mxu3 %v8573_v52 }
 0x160   : > { %v2129_v53 = vpop.f32.mrf.mxu2  ;;  %v2017_v56 = vpop.f32.mrf.mxu0  ;;  %3763 = vmatpush.bf16.msra.mxu0 %v8563_v28  ;;  %v3431_v49 = vrot.slane %v3429_v36, 1 }
 0x161   : > { %v2201_v54 = vpop.f32.mrf.mxu3  ;;  %v2138_v55 = vadd.f32 %v2129_v53, %v2062_v51  ;;  %v2063_v57 = vpop.f32.mrf.mxu1  ;;  %3809 = vmatpush.bf16.msra.mxu1 %v8559_v29  ;;  %v3617_v51 = vrot.slane %v3615_v39, 1  ;;  %v8582_v29 = vld [vmem:[%s10523_s1 + $0x38] sm:$0xff] }
 0x162   : > { %v2064_v48 = vadd.f32 %v2063_v57, %v2017_v56  ;;  %3877 = vmatpush.bf16.msra.mxu2 %v8568_v20  ;;  %v8561_v56 = vld [vmem:[%s10523_s1 + $0x20] sm:$0xff] }
 0x163   : > { %v2210_v58 = vadd.f32 %v2201_v54, %v2138_v55  ;;  %3949 = vmatpush.bf16.msra.mxu3 %v8572_v5  ;;  %v8566_v54 = vld [vmem:[%s10523_s1 + $0x40] sm:$0xff] }
 0x164   : > { %3764 = vmatpush.bf16.msra.mxu0 %v8562_v43  ;;  %v8570_v55 = vld [vmem:[%s10523_s1 + $0x60] sm:$0xff]  ;;  %v8577_v43 = vld [vmem:[%s10523_s1 + $0x10] sm:$0xff] }
 0x165   : > { %v2213_v46 = vadd.f32 %v9619_v47, %v2210_v58  ;;  %3810 = vmatpush.bf16.msra.mxu1 %v8558_v44 }
 0x166   : > { %3878 = vmatpush.bf16.msra.mxu2 %v8567_v41 }
 0x167   : > { %v2216_v0 = vmax.f32 %v2213_v46, 0.0  ;;  %3950 = vmatpush.bf16.msra.mxu3 %v8571_v42  ;;  %v8581_v42 = vld [vmem:[%s10523_s1 + $0x30] sm:$0xff] }
 0x168   : > { %v2131_v2 = vpop.f32.mrf.mxu2  ;;  %v2020_v10 = vpop.f32.mrf.mxu0  ;;  %3765 = vmatpush.bf16.msra.mxu0 %v8561_v56  ;;  %v8589_v56 = vld [vmem:[%s10523_s1 + $0x68] sm:$0xff] }
 0x169   : > { %v2203_v3 = vpop.f32.mrf.mxu3  ;;  %v2219_v4 = vpack.c.bf16 %v2216_v0, %v2216_v0  ;;  %v2139_v9 = vadd.f32 %v2131_v2, %v2064_v48  ;;  %v2066_v6 = vpop.f32.mrf.mxu1  ;;  %3811 = vmatpush.bf16.msra.mxu1 %v8557_v62  ;;  %v8587_v48 = vld [vmem:[%s10523_s1 + $0x58] sm:$0xff] }
 0x16a   : > { %v2067_v23 = vadd.f32 %v2066_v6, %v2020_v10  ;;  %3879 = vmatpush.bf16.msra.mxu2 %v8566_v54  ;;  %v3433_v6 = vshrl.u32 %v9743_v24, 16 }
 0x16b   : > { %6866 = vst.msk [vmem:[%s9163_s26 + $0x48] sm:$0xf] %vm469_vm2, %v2219_v4  ;;  %v2211_v16 = vadd.f32 %v2203_v3, %v2139_v9  ;;  %7240 = vmatmul.msk.bf16.gmra.mxu0 %vm241_vm1, %v3143_v7  ;;  %3951 = vmatpush.bf16.msra.mxu3 %v8570_v55  ;;  %v8585_v55 = vld [vmem:[%s10523_s1 + $0x48] sm:$0xff] }
 0x16c   : > { %7258 = vmatmul.msk.bf16.gmra.mxu1 %vm241_vm1, %v9652_v11  ;;  %v3611_v11 = vshll.u32 %v9720_v15, 16  ;;  %v3435_v20 = vor.u32 %v3433_v6, %v3431_v49 }
 0x16d   : > { %v2214_v22 = vadd.f32 %v9619_v47, %v2211_v16  ;;  %7291 = vmatmul.msk.bf16.gmra.mxu2 %vm241_vm1, %v9655_v12  ;;  %v3422_v12 = vshrl.u32 %v9717_v13, 16  ;;  %v7487_v16 = vld [vmem:[%s8792_s16 + $0xa4] sm:$0x7] }
 0x16e   : > { %7317 = vmatmul.msk.bf16.gmra.mxu3 %vm241_vm1, %v3329_v59  ;;  %v3613_v21 = vrot.slane %v3611_v11, 1 }
 0x16f   : > { %v2217_v26 = vmax.f32 %v2214_v22, 0.0  ;;  %v3427_v32 = vor.u32 %v3426_v35, %v3422_v12  ;;  %v3839_v12 = vunpack.c.l.b16 %v7487_v16  ;;  %v8609_v16 = vld [vmem:[%s10523_s1 + $0x78] sm:$0xff] }
 0x170   : > { %v2134_v27 = vpop.f32.mrf.mxu2  ;;  %v2022_v33 = vpop.f32.mrf.mxu0  ;;  %v3614_v50 = vor.u32 %v3613_v21, %v3609_v37 }
 0x171   : > { %v2206_v38 = vpop.f32.mrf.mxu3  ;;  %v2220_v30 = vpack.c.bf16 %v2217_v26, %v2217_v26  ;;  %v2140_v31 = vadd.f32 %v2134_v27, %v2067_v23  ;;  %v2068_v19 = vpop.f32.mrf.mxu1  ;;  %v3432_v46 = vsel %vm201_vm0, %v3427_v32, %v3431_v49  ;;  %v9808_v26 = vld [vmem:[%s8792_s16 + $0x90] sm:$0xff]  ;;  %v3710_v27 = vunpack.c.l.b16 %v7436_v14 }
 0x172   : > { %v3618_v63 = vsel %vm201_vm0, %v3614_v50, %v3617_v51  ;;  %v8590_v33 = vld [vmem:[%s10523_s1 + $0x70] sm:$0xff]  ;;  %v3716_v37 = vshll.u32 %v9808_v26, 16  ;;  %v9837_v21 = vpack.c.b16 %v3839_v12, %v3839_v12 }
 0x173   : > { %6867 = vst.msk [vmem:[%s9163_s26 + $0x4c] sm:$0xf] %vm469_vm2, %v2220_v30  ;;  %v2212_v40 = vadd.f32 %v2206_v38, %v2140_v31  ;;  %v9811_v38 = vld [vmem:[%s8792_s16 + $0x9c] sm:$0xff]  ;;  %v8586_v31 = vld [vmem:[%s10523_s1 + $0x50] sm:$0xff]  ;;  %v9834_v36 = vpack.c.b16 %v3710_v27, %v3710_v27  ;;  %v7549_v27 = vld [vmem:[%s8792_s16 + $0xa4] sm:$0x7] }
 0x174   : > { %v8578_v30 = vld [vmem:[%s10523_s1 + $0x18] sm:$0xff]  ;;  %v3718_v50 = vrot.slane %v3716_v37, 1 }
 0x175   : > { %v2215_v45 = vadd.f32 %v9619_v47, %v2212_v40 }
 0x177   : > { %v2218_v34 = vmax.f32 %v2215_v45, 0.0 }
 0x178   : > { %v2136_v52 = vpop.f32.mrf.mxu2  ;;  %v2307_v58 = vpop.f32.mrf.mxu0 }
 0x179   : > { %v2208_v53 = vpop.f32.mrf.mxu3  ;;  %v2221_v57 = vpack.c.bf16 %v2218_v34, %v2218_v34  ;;  %v2353_v60 = vpop.f32.mrf.mxu1  ;;  %v3901_v34 = vshrl.u32 %v9811_v38, 16 }
 0x17a   : > { %v2354_v0 = vadd.f32 %v2353_v60, %v2307_v58  ;;  %v3907_v53 = vshll.u32 %v9837_v21, 16  ;;  %v8576_v58 = vld [vmem:[%s10523_s1 + $0x8] sm:$0xff] }
 0x17b   : > { %6868 = vst.msk [vmem:[%s9163_s26 + $0x50] sm:$0x3] %vm472_vm3, %v2221_v57  ;;  %7352 = vmatmul.msk.bf16.vlgmr.msrb.gmra.mxu0 %vm241_vm1, %v3432_v46  ;;  %v8580_v57 = vld [vmem:[%s10523_s1 + $0x28] sm:$0xff] }
 0x17c   : > { %7370 = vmatmul.msk.bf16.vlgmr.msrb.gmra.mxu1 %vm241_vm1, %v9717_v13  ;;  %v3619_v13 = vshrl.u32 %v9746_v25, 16  ;;  %4054 = vmatpush.bf16.msrb.mxu0 %v8582_v29 }
 0x17d   : > { %7403 = vmatmul.msk.bf16.vlgmr.msrb.gmra.mxu2 %vm241_vm1, %v9720_v15  ;;  %4100 = vmatpush.bf16.msrb.mxu1 %v8578_v30 }
 0x17e   : > { %7429 = vmatmul.msk.bf16.vlgmr.msrb.gmra.mxu3 %vm241_vm1, %v3618_v63  ;;  %4168 = vmatpush.bf16.msrb.mxu2 %v8587_v48  ;;  %v3621_v11 = vor.u32 %v3619_v13, %v3617_v51  ;;  %v3721_v51 = vshll.u32 %v9834_v36, 16  ;;  %v8575_v13 = vld [vmem:[%s10523_s1] sm:$0xff] }
 0x17f   : > { %4240 = vmatpush.bf16.msrb.mxu3 %v8591_v1 }
 0x180   : > { %v2421_v2 = vpop.f32.mrf.mxu2  ;;  %v2309_v4 = vpop.f32.mrf.mxu0  ;;  %4055 = vmatpush.bf16.msrb.mxu0 %v8581_v42  ;;  %v3723_v62 = vrot.slane %v3721_v51, 1 }
 0x181   : > { %v2493_v3 = vpop.f32.mrf.mxu3  ;;  %v2430_v7 = vadd.f32 %v2421_v2, %v2354_v0  ;;  %v2355_v9 = vpop.f32.mrf.mxu1  ;;  %4101 = vmatpush.bf16.msrb.mxu1 %v8577_v43  ;;  %v3909_v0 = vrot.slane %v3907_v53, 1  ;;  %v8600_v43 = vld [vmem:[%s10523_s1 + $0x38] sm:$0xff] }
 0x182   : > { %v2356_v61 = vadd.f32 %v2355_v9, %v2309_v4  ;;  %4169 = vmatpush.bf16.msrb.mxu2 %v8586_v31  ;;  %v8579_v4 = vld [vmem:[%s10523_s1 + $0x20] sm:$0xff] }
 0x183   : > { %v2502_v10 = vadd.f32 %v2493_v3, %v2430_v7  ;;  %4241 = vmatpush.bf16.msrb.mxu3 %v8590_v33  ;;  %v8584_v3 = vld [vmem:[%s10523_s1 + $0x40] sm:$0xff] }
 0x184   : > { %4056 = vmatpush.bf16.msrb.mxu0 %v8580_v57  ;;  %v8588_v7 = vld [vmem:[%s10523_s1 + $0x60] sm:$0xff]  ;;  %v8595_v57 = vld [vmem:[%s10523_s1 + $0x10] sm:$0xff] }
 0x185   : > { %v2505_v59 = vadd.f32 %v9619_v47, %v2502_v10  ;;  %4102 = vmatpush.bf16.msrb.mxu1 %v8576_v58 }
 0x186   : > { %4170 = vmatpush.bf16.msrb.mxu2 %v8585_v55 }
 0x187   : > { %v2508_v15 = vmax.f32 %v2505_v59, 0.0  ;;  %4242 = vmatpush.bf16.msrb.mxu3 %v8589_v56  ;;  %v8599_v56 = vld [vmem:[%s10523_s1 + $0x30] sm:$0xff] }
 0x188   : > { %v2423_v17 = vpop.f32.mrf.mxu2  ;;  %v2312_v23 = vpop.f32.mrf.mxu0  ;;  %4057 = vmatpush.bf16.msrb.mxu0 %v8579_v4  ;;  %v8607_v4 = vld [vmem:[%s10523_s1 + $0x68] sm:$0xff] }
 0x189   : > { %v2495_v18 = vpop.f32.mrf.mxu3  ;;  %v2511_v5 = vpack.c.bf16 %v2508_v15, %v2508_v15  ;;  %v2431_v22 = vadd.f32 %v2423_v17, %v2356_v61  ;;  %v2358_v8 = vpop.f32.mrf.mxu1  ;;  %4103 = vmatpush.bf16.msrb.mxu1 %v8575_v13  ;;  %v8605_v61 = vld [vmem:[%s10523_s1 + $0x58] sm:$0xff] }
 0x18a   : > { %v2359_v35 = vadd.f32 %v2358_v8, %v2312_v23  ;;  %4171 = vmatpush.bf16.msrb.mxu2 %v8584_v3  ;;  %v3725_v8 = vshrl.u32 %v9834_v36, 16 }
 0x18b   : > { %6979 = vst.msk [vmem:[%s9163_s26 + $0x54] sm:$0xf] %vm469_vm2, %v2511_v5  ;;  %v2503_v28 = vadd.f32 %v2495_v18, %v2431_v22  ;;  %7353 = vmatmul.msk.bf16.gmra.mxu0 %vm241_vm1, %v3435_v20  ;;  %4243 = vmatpush.bf16.msrb.mxu3 %v8588_v7  ;;  %v8603_v7 = vld [vmem:[%s10523_s1 + $0x48] sm:$0xff] }
 0x18c   : > { %7371 = vmatmul.msk.bf16.gmra.mxu1 %vm241_vm1, %v9743_v24  ;;  %v3903_v24 = vshll.u32 %v9811_v38, 16  ;;  %v3727_v31 = vor.u32 %v3725_v8, %v3723_v62 }
 0x18d   : > { %v2506_v19 = vadd.f32 %v9619_v47, %v2503_v28  ;;  %7404 = vmatmul.msk.bf16.gmra.mxu2 %vm241_vm1, %v9746_v25  ;;  %v3714_v25 = vshrl.u32 %v9808_v26, 16  ;;  %v7600_v28 = vld [vmem:[%s8792_s16 + $0xb0] sm:$0x7] }
 0x18e   : > { %7430 = vmatmul.msk.bf16.gmra.mxu3 %vm241_vm1, %v3621_v11  ;;  %v3905_v52 = vrot.slane %v3903_v24, 1 }
 0x18f   : > { %v2509_v39 = vmax.f32 %v2506_v19, 0.0  ;;  %v3719_v46 = vor.u32 %v3718_v50, %v3714_v25  ;;  %v4131_v25 = vunpack.c.l.b16 %v7600_v28  ;;  %v8627_v28 = vld [vmem:[%s10523_s1 + $0x78] sm:$0xff] }
 0x190   : > { %v2426_v40 = vpop.f32.mrf.mxu2  ;;  %v2314_v32 = vpop.f32.mrf.mxu0  ;;  %v3906_v63 = vor.u32 %v3905_v52, %v3901_v34 }
 0x191   : > { %v2498_v41 = vpop.f32.mrf.mxu3  ;;  %v2512_v44 = vpack.c.bf16 %v2509_v39, %v2509_v39  ;;  %v2432_v45 = vadd.f32 %v2426_v40, %v2359_v35  ;;  %v2360_v49 = vpop.f32.mrf.mxu1  ;;  %v3724_v59 = vsel %vm201_vm0, %v3719_v46, %v3723_v62  ;;  %v9899_v39 = vld [vmem:[%s8792_s16 + $0x9c] sm:$0xff]  ;;  %v4002_v40 = vunpack.c.l.b16 %v7549_v27  ;;  %v8608_v32 = vld [vmem:[%s10523_s1 + $0x70] sm:$0xff] }
 0x192   : > { %v3910_v14 = vsel %vm201_vm0, %v3906_v63, %v3909_v0  ;;  %v4008_v34 = vshll.u32 %v9899_v39, 16  ;;  %v9928_v52 = vpack.c.b16 %v4131_v25, %v4131_v25 }
 0x193   : > { %6980 = vst.msk [vmem:[%s9163_s26 + $0x58] sm:$0xf] %vm469_vm2, %v2512_v44  ;;  %v2504_v54 = vadd.f32 %v2498_v41, %v2432_v45  ;;  %v9902_v41 = vld [vmem:[%s8792_s16 + $0xa8] sm:$0xff]  ;;  %v8596_v44 = vld [vmem:[%s10523_s1 + $0x18] sm:$0xff]  ;;  %v8604_v45 = vld [vmem:[%s10523_s1 + $0x50] sm:$0xff]  ;;  %v9925_v51 = vpack.c.b16 %v4002_v40, %v4002_v40 }
 0x194   : > { %v4010_v63 = vrot.slane %v4008_v34, 1  ;;  %v7662_v40 = vld [vmem:[%s8792_s16 + $0xb0] sm:$0x7] }
 0x195   : > { %v2507_v60 = vadd.f32 %v9619_v47, %v2504_v54 }
 0x197   : > { %v2510_v48 = vmax.f32 %v2507_v60, 0.0 }
 0x198   : > { %v2428_v1 = vpop.f32.mrf.mxu2  ;;  %v2599_v10 = vpop.f32.mrf.mxu0 }
 0x199   : > { %v2500_v2 = vpop.f32.mrf.mxu3  ;;  %v2513_v9 = vpack.c.bf16 %v2510_v48, %v2510_v48  ;;  %v2645_v6 = vpop.f32.mrf.mxu1  ;;  %v4193_v48 = vshrl.u32 %v9902_v41, 16 }
 0x19a   : > { %v2646_v15 = vadd.f32 %v2645_v6, %v2599_v10  ;;  %v4199_v2 = vshll.u32 %v9928_v52, 16  ;;  %v8594_v10 = vld [vmem:[%s10523_s1 + $0x8] sm:$0xff] }
 0x19b   : > { %6981 = vst.msk [vmem:[%s9163_s26 + $0x5c] sm:$0x3] %vm472_vm3, %v2513_v9  ;;  %7465 = vmatmul.msk.bf16.vlgmr.msra.gmra.mxu0 %vm241_vm1, %v3724_v59  ;;  %v8598_v9 = vld [vmem:[%s10523_s1 + $0x28] sm:$0xff] }
 0x19c   : > { %7483 = vmatmul.msk.bf16.vlgmr.msra.gmra.mxu1 %vm241_vm1, %v9808_v26  ;;  %v3911_v26 = vshrl.u32 %v9837_v21, 16  ;;  %4346 = vmatpush.bf16.msra.mxu0 %v8600_v43 }
 0x19d   : > { %7516 = vmatmul.msk.bf16.vlgmr.msra.gmra.mxu2 %vm241_vm1, %v9811_v38  ;;  %4392 = vmatpush.bf16.msra.mxu1 %v8596_v44 }
 0x19e   : > { %7542 = vmatmul.msk.bf16.vlgmr.msra.gmra.mxu3 %vm241_vm1, %v3910_v14  ;;  %4460 = vmatpush.bf16.msra.mxu2 %v8605_v61  ;;  %v3913_v24 = vor.u32 %v3911_v26, %v3909_v0  ;;  %v4013_v0 = vshll.u32 %v9925_v51, 16  ;;  %v8593_v26 = vld [vmem:[%s10523_s1] sm:$0xff] }
 0x19f   : > { %4532 = vmatpush.bf16.msra.mxu3 %v8609_v16 }
 0x1a0   : > { %v2713_v17 = vpop.f32.mrf.mxu2  ;;  %v2601_v5 = vpop.f32.mrf.mxu0  ;;  %4347 = vmatpush.bf16.msra.mxu0 %v8599_v56  ;;  %v4015_v13 = vrot.slane %v4013_v0, 1 }
 0x1a1   : > { %v2785_v18 = vpop.f32.mrf.mxu3  ;;  %v2722_v20 = vadd.f32 %v2713_v17, %v2646_v15  ;;  %v2647_v22 = vpop.f32.mrf.mxu1  ;;  %4393 = vmatpush.bf16.msra.mxu1 %v8595_v57  ;;  %v4201_v15 = vrot.slane %v4199_v2, 1  ;;  %v8618_v57 = vld [vmem:[%s10523_s1 + $0x38] sm:$0xff] }
 0x1a2   : > { %v2648_v12 = vadd.f32 %v2647_v22, %v2601_v5  ;;  %4461 = vmatpush.bf16.msra.mxu2 %v8604_v45  ;;  %v8597_v5 = vld [vmem:[%s10523_s1 + $0x20] sm:$0xff] }
 0x1a3   : > { %v2794_v23 = vadd.f32 %v2785_v18, %v2722_v20  ;;  %4533 = vmatpush.bf16.msra.mxu3 %v8608_v32  ;;  %v8602_v18 = vld [vmem:[%s10523_s1 + $0x40] sm:$0xff] }
 0x1a4   : > { %4348 = vmatpush.bf16.msra.mxu0 %v8598_v9  ;;  %v8606_v20 = vld [vmem:[%s10523_s1 + $0x60] sm:$0xff]  ;;  %v8613_v9 = vld [vmem:[%s10523_s1 + $0x10] sm:$0xff] }
 0x1a5   : > { %v2797_v11 = vadd.f32 %v9619_v47, %v2794_v23  ;;  %4394 = vmatpush.bf16.msra.mxu1 %v8594_v10 }
 0x1a6   : > { %4462 = vmatpush.bf16.msra.mxu2 %v8603_v7 }
 0x1a7   : > { %v2800_v38 = vmax.f32 %v2797_v11, 0.0  ;;  %4534 = vmatpush.bf16.msra.mxu3 %v8607_v4  ;;  %v8617_v4 = vld [vmem:[%s10523_s1 + $0x30] sm:$0xff] }
 0x1a8   : > { %v2715_v29 = vpop.f32.mrf.mxu2  ;;  %v2604_v35 = vpop.f32.mrf.mxu0  ;;  %4349 = vmatpush.bf16.msra.mxu0 %v8597_v5  ;;  %v8625_v5 = vld [vmem:[%s10523_s1 + $0x68] sm:$0xff] }
 0x1a9   : > { %v2787_v30 = vpop.f32.mrf.mxu3  ;;  %v2803_v33 = vpack.c.bf16 %v2800_v38, %v2800_v38  ;;  %v2723_v19 = vadd.f32 %v2715_v29, %v2648_v12  ;;  %v2650_v37 = vpop.f32.mrf.mxu1  ;;  %4395 = vmatpush.bf16.msra.mxu1 %v8593_v26  ;;  %v8623_v12 = vld [vmem:[%s10523_s1 + $0x58] sm:$0xff] }
 0x1aa   : > { %v2651_v50 = vadd.f32 %v2650_v37, %v2604_v35  ;;  %4463 = vmatpush.bf16.msra.mxu2 %v8602_v18  ;;  %v4017_v37 = vshrl.u32 %v9925_v51, 16 }
 0x1ab   : > { %7092 = vst.msk [vmem:[%s9163_s26 + $0x60] sm:$0xf] %vm469_vm2, %v2803_v33  ;;  %v2795_v42 = vadd.f32 %v2787_v30, %v2723_v19  ;;  %7466 = vmatmul.msk.bf16.gmra.mxu0 %vm241_vm1, %v3727_v31  ;;  %4535 = vmatpush.bf16.msra.mxu3 %v8606_v20  ;;  %v8621_v20 = vld [vmem:[%s10523_s1 + $0x48] sm:$0xff] }
 0x1ac   : > { %7484 = vmatmul.msk.bf16.gmra.mxu1 %vm241_vm1, %v9834_v36  ;;  %v4195_v36 = vshll.u32 %v9902_v41, 16  ;;  %v4019_v45 = vor.u32 %v4017_v37, %v4015_v13 }
 0x1ad   : > { %v2798_v49 = vadd.f32 %v9619_v47, %v2795_v42  ;;  %7517 = vmatmul.msk.bf16.gmra.mxu2 %vm241_vm1, %v9837_v21  ;;  %v4006_v21 = vshrl.u32 %v9899_v39, 16  ;;  %v7713_v42 = vld [vmem:[%s8792_s16 + $0xbc] sm:$0x7] }
 0x1ae   : > { %7543 = vmatmul.msk.bf16.gmra.mxu3 %vm241_vm1, %v3913_v24  ;;  %v4197_v1 = vrot.slane %v4195_v36, 1 }
 0x1af   : > { %v2801_v53 = vmax.f32 %v2798_v49, 0.0  ;;  %v4011_v59 = vor.u32 %v4010_v63, %v4006_v21  ;;  %v4423_v21 = vunpack.c.l.b16 %v7713_v42 }
 0x1b0   : > { %v2718_v54 = vpop.f32.mrf.mxu2  ;;  %v2606_v46 = vpop.f32.mrf.mxu0  ;;  %v4198_v14 = vor.u32 %v4197_v1, %v4193_v48 }
 0x1b1   : > { %v2790_v55 = vpop.f32.mrf.mxu3  ;;  %v2804_v58 = vpack.c.bf16 %v2801_v53, %v2801_v53  ;;  %v2724_v60 = vadd.f32 %v2718_v54, %v2651_v50  ;;  %v2652_v62 = vpop.f32.mrf.mxu1  ;;  %v4016_v11 = vsel %vm201_vm0, %v4011_v59, %v4015_v13  ;;  %v9990_v53 = vld [vmem:[%s8792_s16 + $0xa8] sm:$0xff]  ;;  %v4294_v54 = vunpack.c.l.b16 %v7662_v40  ;;  %v8626_v46 = vld [vmem:[%s10523_s1 + $0x70] sm:$0xff] }
 0x1b2   : > { %v4202_v27 = vsel %vm201_vm0, %v4198_v14, %v4201_v15  ;;  %v4300_v48 = vshll.u32 %v9990_v53, 16  ;;  %v10019_v1 = vpack.c.b16 %v4423_v21, %v4423_v21 }
 0x1b3   : > { %7093 = vst.msk [vmem:[%s9163_s26 + $0x64] sm:$0xf] %vm469_vm2, %v2804_v58  ;;  %v2796_v3 = vadd.f32 %v2790_v55, %v2724_v60  ;;  %v9993_v55 = vld [vmem:[%s8792_s16 + $0xb4] sm:$0xff]  ;;  %v10016_v0 = vpack.c.b16 %v4294_v54, %v4294_v54  ;;  %v7775_v54 = vld [vmem:[%s8792_s16 + $0xbc] sm:$0x7] }
 0x1b4   : > { %v8614_v58 = vld [vmem:[%s10523_s1 + $0x18] sm:$0xff]  ;;  %v8622_v60 = vld [vmem:[%s10523_s1 + $0x50] sm:$0xff]  ;;  %v4302_v14 = vrot.slane %v4300_v48, 1 }
 0x1b5   : > { %v2799_v6 = vadd.f32 %v9619_v47, %v2796_v3 }
 0x1b7   : > { %v2802_v61 = vmax.f32 %v2799_v6, 0.0 }
 0x1b8   : > { %v2720_v16 = vpop.f32.mrf.mxu2  ;;  %v2891_v23 = vpop.f32.mrf.mxu0 }
 0x1b9   : > { %v2792_v17 = vpop.f32.mrf.mxu3  ;;  %v2805_v22 = vpack.c.bf16 %v2802_v61, %v2802_v61  ;;  %v2937_v8 = vpop.f32.mrf.mxu1  ;;  %v4485_v61 = vshrl.u32 %v9993_v55, 16 }
 0x1ba   : > { %v2938_v38 = vadd.f32 %v2937_v8, %v2891_v23  ;;  %v4491_v17 = vshll.u32 %v10019_v1, 16  ;;  %v8612_v23 = vld [vmem:[%s10523_s1 + $0x8] sm:$0xff] }
 0x1bb   : > { %7094 = vst.msk [vmem:[%s9163_s26 + $0x68] sm:$0x3] %vm472_vm3, %v2805_v22  ;;  %7578 = vmatmul.msk.bf16.vlgmr.msrb.gmra.mxu0 %vm241_vm1, %v4016_v11  ;;  %v8616_v22 = vld [vmem:[%s10523_s1 + $0x28] sm:$0xff] }
 0x1bc   : > { %7596 = vmatmul.msk.bf16.vlgmr.msrb.gmra.mxu1 %vm241_vm1, %v9899_v39  ;;  %v4203_v39 = vshrl.u32 %v9928_v52, 16  ;;  %4638 = vmatpush.bf16.msrb.mxu0 %v8618_v57 }
 0x1bd   : > { %7629 = vmatmul.msk.bf16.vlgmr.msrb.gmra.mxu2 %vm241_vm1, %v9902_v41  ;;  %4684 = vmatpush.bf16.msrb.mxu1 %v8614_v58 }
 0x1be   : > { %7655 = vmatmul.msk.bf16.vlgmr.msrb.gmra.mxu3 %vm241_vm1, %v4202_v27  ;;  %4752 = vmatpush.bf16.msrb.mxu2 %v8623_v12  ;;  %v4205_v36 = vor.u32 %v4203_v39, %v4201_v15  ;;  %v4305_v15 = vshll.u32 %v10016_v0, 16 }
 0x1bf   : > { %4824 = vmatpush.bf16.msrb.mxu3 %v8627_v28 }
 0x1c0   : > { %v3005_v29 = vpop.f32.mrf.mxu2  ;;  %v2893_v33 = vpop.f32.mrf.mxu0  ;;  %4639 = vmatpush.bf16.msrb.mxu0 %v8617_v4  ;;  %v4307_v26 = vrot.slane %v4305_v15, 1 }
 0x1c1   : > { %v3077_v30 = vpop.f32.mrf.mxu3  ;;  %v3014_v31 = vadd.f32 %v3005_v29, %v2938_v38  ;;  %v2939_v19 = vpop.f32.mrf.mxu1  ;;  %4685 = vmatpush.bf16.msrb.mxu1 %v8613_v9  ;;  %v4493_v38 = vrot.slane %v4491_v17, 1  ;;  %v8636_v9 = vld [vmem:[%s10523_s1 + $0x38] sm:$0xff] }
 0x1c2   : > { %v2940_v25 = vadd.f32 %v2939_v19, %v2893_v33  ;;  %4753 = vmatpush.bf16.msrb.mxu2 %v8622_v60 }
 0x1c3   : > { %v3086_v35 = vadd.f32 %v3077_v30, %v3014_v31  ;;  %4825 = vmatpush.bf16.msrb.mxu3 %v8626_v46  ;;  %v8620_v30 = vld [vmem:[%s10523_s1 + $0x40] sm:$0xff] }
 0x1c4   : > { %4640 = vmatpush.bf16.msrb.mxu0 %v8616_v22  ;;  %v8615_v31 = vld [vmem:[%s10523_s1 + $0x20] sm:$0xff]  ;;  %v8631_v22 = vld [vmem:[%s10523_s1 + $0x10] sm:$0xff] }
 0x1c5   : > { %v3089_v24 = vadd.f32 %v9619_v47, %v3086_v35  ;;  %4686 = vmatpush.bf16.msrb.mxu1 %v8612_v23 }
 0x1c6   : > { %4754 = vmatpush.bf16.msrb.mxu2 %v8621_v20 }
 0x1c7   : > { %v3092_v41 = vmax.f32 %v3089_v24, 0.0  ;;  %4826 = vmatpush.bf16.msrb.mxu3 %v8625_v5  ;;  %v8611_v24 = vld [vmem:[%s10523_s1] sm:$0xff]  ;;  %v8635_v5 = vld [vmem:[%s10523_s1 + $0x30] sm:$0xff] }
 0x1c8   : > { %v3007_v43 = vpop.f32.mrf.mxu2  ;;  %v2896_v50 = vpop.f32.mrf.mxu0  ;;  %4641 = vmatpush.bf16.msrb.mxu0 %v8615_v31  ;;  %v8643_v31 = vld [vmem:[%s10523_s1 + $0x68] sm:$0xff] }
 0x1c9   : > { %v3079_v44 = vpop.f32.mrf.mxu3  ;;  %v3095_v32 = vpack.c.bf16 %v3092_v41, %v3092_v41  ;;  %v3015_v49 = vadd.f32 %v3007_v43, %v2940_v25  ;;  %v2942_v34 = vpop.f32.mrf.mxu1  ;;  %4687 = vmatpush.bf16.msrb.mxu1 %v8611_v24  ;;  %v8641_v41 = vld [vmem:[%s10523_s1 + $0x58] sm:$0xff] }
 0x1ca   : > { %v2943_v63 = vadd.f32 %v2942_v34, %v2896_v50  ;;  %4755 = vmatpush.bf16.msrb.mxu2 %v8620_v30  ;;  %v8645_v25 = vld [vmem:[%s10523_s1 + $0x78] sm:$0xff]  ;;  %v4309_v50 = vshrl.u32 %v10016_v0, 16  ;;  %v10079_v34 = vld [vmem:[%s10524_s2] ss:$0 sm:$0xff] }
 0x1cb   : > { %7205 = vst.msk [vmem:[%s9163_s26 + $0x6c] sm:$0xf] %vm469_vm2, %v3095_v32  ;;  %v3087_v56 = vadd.f32 %v3079_v44, %v3015_v49  ;;  %7579 = vmatmul.msk.bf16.gmra.mxu0 %vm241_vm1, %v4019_v45 }
 0x1cc   : > { %7597 = vmatmul.msk.bf16.gmra.mxu1 %vm241_vm1, %v9925_v51  ;;  %v4487_v51 = vshll.u32 %v9993_v55, 16  ;;  %v4311_v60 = vor.u32 %v4309_v50, %v4307_v26 }
 0x1cd   : > { %v3090_v62 = vadd.f32 %v9619_v47, %v3087_v56  ;;  %7630 = vmatmul.msk.bf16.gmra.mxu2 %vm241_vm1, %v9928_v52  ;;  %v4298_v52 = vshrl.u32 %v9990_v53, 16  ;;  %v7826_v56 = vld [vmem:[%s8792_s16 + $0xc8] sm:$0x7] }
 0x1ce   : > { %7656 = vmatmul.msk.bf16.gmra.mxu3 %vm241_vm1, %v4205_v36  ;;  %v4489_v16 = vrot.slane %v4487_v51, 1 }
 0x1cf   : > { %v3093_v2 = vmax.f32 %v3090_v62, 0.0  ;;  %v4303_v11 = vor.u32 %v4302_v14, %v4298_v52  ;;  %v4715_v52 = vunpack.c.l.b16 %v7826_v56  ;;  %v8663_v56 = vld [vmem:[%s10523_s1 + $0x78] sm:$0xff] }
 0x1d0   : > { %v3010_v3 = vpop.f32.mrf.mxu2  ;;  %v2898_v59 = vpop.f32.mrf.mxu0  ;;  %v4490_v27 = vor.u32 %v4489_v16, %v4485_v61 }
 0x1d1   : > { %v3082_v7 = vpop.f32.mrf.mxu3  ;;  %v3096_v10 = vpack.c.bf16 %v3093_v2, %v3093_v2  ;;  %v3016_v6 = vadd.f32 %v3010_v3, %v2943_v63  ;;  %v2944_v13 = vpop.f32.mrf.mxu1  ;;  %v4308_v37 = vsel %vm201_vm0, %v4303_v11, %v4307_v26  ;;  %v10086_v2 = vld [vmem:[%s8792_s16 + $0xb4] sm:$0xff]  ;;  %v4586_v3 = vunpack.c.l.b16 %v7775_v54 }
 0x1d2   : > { %v4494_v39 = vsel %vm201_vm0, %v4490_v27, %v4493_v38  ;;  %v8644_v59 = vld [vmem:[%s10523_s1 + $0x70] sm:$0xff]  ;;  %v4592_v61 = vshll.u32 %v10086_v2, 16  ;;  %v10115_v16 = vpack.c.b16 %v4715_v52, %v4715_v52 }
 0x1d3   : > { %7206 = vst.msk [vmem:[%s9163_s26 + $0x70] sm:$0xf] %vm469_vm2, %v3096_v10  ;;  %v3088_v18 = vadd.f32 %v3082_v7, %v3016_v6  ;;  %v10089_v7 = vld [vmem:[%s8792_s16 + $0xc0] sm:$0xff]  ;;  %v8632_v10 = vld [vmem:[%s10523_s1 + $0x18] sm:$0xff]  ;;  %v8640_v6 = vld [vmem:[%s10523_s1 + $0x50] sm:$0xff]  ;;  %v10112_v15 = vpack.c.b16 %v4586_v3, %v4586_v3 }
 0x1d4   : > { %v4594_v27 = vrot.slane %v4592_v61, 1  ;;  %v7888_v3 = vld [vmem:[%s8792_s16 + $0xc8] sm:$0x7] }
 0x1d5   : > { %v3091_v8 = vadd.f32 %v9619_v47, %v3088_v18  ;;  %v8624_v47 = vld [vmem:[%s10523_s1 + $0x60] sm:$0xff] }
 0x1d6   : > { %4827 = vmatpush.bf16.msrb.mxu3 %v8624_v47  ;;  %v8639_v47 = vld [vmem:[%s10523_s1 + $0x48] sm:$0xff] }
 0x1d7   : > { %v3094_v12 = vmax.f32 %v3091_v8, 0.0 }
 0x1d8   : > { %v3012_v28 = vpop.f32.mrf.mxu2  ;;  %v3183_v19 = vpop.f32.mrf.mxu0 }
 0x1d9   : > { %v3084_v29 = vpop.f32.mrf.mxu3  ;;  %v3097_v33 = vpack.c.bf16 %v3094_v12, %v3094_v12  ;;  %v3229_v35 = vpop.f32.mrf.mxu1  ;;  %v4777_v12 = vshrl.u32 %v10089_v7, 16 }
 0x1da   : > { %v3230_v40 = vadd.f32 %v3229_v35, %v3183_v19  ;;  %v4783_v29 = vshll.u32 %v10115_v16, 16  ;;  %v8630_v19 = vld [vmem:[%s10523_s1 + $0x8] sm:$0xff] }
 0x1db   : > { %7207 = vst.msk [vmem:[%s9163_s26 + $0x74] sm:$0x3] %vm472_vm3, %v3097_v33  ;;  %7691 = vmatmul.msk.bf16.vlgmr.msra.gmra.mxu0 %vm241_vm1, %v4308_v37  ;;  %v8634_v33 = vld [vmem:[%s10523_s1 + $0x28] sm:$0xff] }
 0x1dc   : > { %7709 = vmatmul.msk.bf16.vlgmr.msra.gmra.mxu1 %vm241_vm1, %v9990_v53  ;;  %v4495_v53 = vshrl.u32 %v10019_v1, 16  ;;  %4930 = vmatpush.bf16.msra.mxu0 %v8636_v9 }
 0x1dd   : > { %7742 = vmatmul.msk.bf16.vlgmr.msra.gmra.mxu2 %vm241_vm1, %v9993_v55  ;;  %4976 = vmatpush.bf16.msra.mxu1 %v8632_v10 }
 0x1de   : > { %7768 = vmatmul.msk.bf16.vlgmr.msra.gmra.mxu3 %vm241_vm1, %v4494_v39  ;;  %5044 = vmatpush.bf16.msra.mxu2 %v8641_v41  ;;  %v4497_v51 = vor.u32 %v4495_v53, %v4493_v38  ;;  %v4597_v38 = vshll.u32 %v10112_v15, 16  ;;  %v8629_v53 = vld [vmem:[%s10523_s1] sm:$0xff] }
 0x1df   : > { %5116 = vmatpush.bf16.msra.mxu3 %v8645_v25 }
 0x1e0   : > { %v3297_v42 = vpop.f32.mrf.mxu2  ;;  %v3185_v45 = vpop.f32.mrf.mxu0  ;;  %4931 = vmatpush.bf16.msra.mxu0 %v8635_v5  ;;  %v4599_v24 = vrot.slane %v4597_v38, 1 }
 0x1e1   : > { %v3369_v43 = vpop.f32.mrf.mxu3  ;;  %v3306_v44 = vadd.f32 %v3297_v42, %v3230_v40  ;;  %v3231_v32 = vpop.f32.mrf.mxu1  ;;  %4977 = vmatpush.bf16.msra.mxu1 %v8631_v22  ;;  %v4785_v40 = vrot.slane %v4783_v29, 1  ;;  %v8654_v22 = vld [vmem:[%s10523_s1 + $0x38] sm:$0xff] }
 0x1e2   : > { %v3232_v21 = vadd.f32 %v3231_v32, %v3185_v45  ;;  %5045 = vmatpush.bf16.msra.mxu2 %v8640_v6  ;;  %v8633_v45 = vld [vmem:[%s10523_s1 + $0x20] sm:$0xff] }
 0x1e3   : > { %v3378_v49 = vadd.f32 %v3369_v43, %v3306_v44  ;;  %5117 = vmatpush.bf16.msra.mxu3 %v8644_v59  ;;  %v8638_v43 = vld [vmem:[%s10523_s1 + $0x40] sm:$0xff] }
 0x1e4   : > { %4932 = vmatpush.bf16.msra.mxu0 %v8634_v33  ;;  %v8642_v44 = vld [vmem:[%s10523_s1 + $0x60] sm:$0xff]  ;;  %v8649_v33 = vld [vmem:[%s10523_s1 + $0x10] sm:$0xff] }
 0x1e5   : > { %v3381_v36 = vadd.f32 %v10079_v34, %v3378_v49  ;;  %4978 = vmatpush.bf16.msra.mxu1 %v8630_v19 }
 0x1e6   : > { %5046 = vmatpush.bf16.msra.mxu2 %v8639_v47 }
 0x1e7   : > { %v3384_v55 = vmax.f32 %v3381_v36, 0.0  ;;  %5118 = vmatpush.bf16.msra.mxu3 %v8643_v31  ;;  %v8653_v31 = vld [vmem:[%s10523_s1 + $0x30] sm:$0xff] }
 0x1e8   : > { %v3299_v57 = vpop.f32.mrf.mxu2  ;;  %v3188_v63 = vpop.f32.mrf.mxu0  ;;  %4933 = vmatpush.bf16.msra.mxu0 %v8633_v45  ;;  %v8661_v45 = vld [vmem:[%s10523_s1 + $0x68] sm:$0xff] }
 0x1e9   : > { %v3371_v58 = vpop.f32.mrf.mxu3  ;;  %v3387_v46 = vpack.c.bf16 %v3384_v55, %v3384_v55  ;;  %v3307_v62 = vadd.f32 %v3299_v57, %v3232_v21  ;;  %v3234_v48 = vpop.f32.mrf.mxu1  ;;  %4979 = vmatpush.bf16.msra.mxu1 %v8629_v53  ;;  %v8659_v21 = vld [vmem:[%s10523_s1 + $0x58] sm:$0xff] }
 0x1ea   : > { %v3235_v14 = vadd.f32 %v3234_v48, %v3188_v63  ;;  %5047 = vmatpush.bf16.msra.mxu2 %v8638_v43  ;;  %v4601_v48 = vshrl.u32 %v10112_v15, 16 }
 0x1eb   : > { %7318 = vst.msk [vmem:[%s9163_s26 + $0x78] sm:$0xf] %vm469_vm2, %v3387_v46  ;;  %v3379_v4 = vadd.f32 %v3371_v58, %v3307_v62  ;;  %7692 = vmatmul.msk.bf16.gmra.mxu0 %vm241_vm1, %v4311_v60  ;;  %5119 = vmatpush.bf16.msra.mxu3 %v8642_v44  ;;  %v8657_v44 = vld [vmem:[%s10523_s1 + $0x48] sm:$0xff] }
 0x1ec   : > { %7710 = vmatmul.msk.bf16.gmra.mxu1 %vm241_vm1, %v10016_v0  ;;  %v4779_v0 = vshll.u32 %v10089_v7, 16  ;;  %v4603_v6 = vor.u32 %v4601_v48, %v4599_v24 }
 0x1ed   : > { %v3382_v13 = vadd.f32 %v10079_v34, %v3379_v4  ;;  %7743 = vmatmul.msk.bf16.gmra.mxu2 %vm241_vm1, %v10019_v1  ;;  %v4590_v1 = vshrl.u32 %v10086_v2, 16  ;;  %v7939_v4 = vld [vmem:[%s8792_s16 + $0xd4] sm:$0x7] }
 0x1ee   : > { %7769 = vmatmul.msk.bf16.gmra.mxu3 %vm241_vm1, %v4497_v51  ;;  %v4781_v28 = vrot.slane %v4779_v0, 1 }
 0x1ef   : > { %v3385_v17 = vmax.f32 %v3382_v13, 0.0  ;;  %v4595_v37 = vor.u32 %v4594_v27, %v4590_v1  ;;  %v5007_v1 = vunpack.c.l.b16 %v7939_v4  ;;  %v8681_v4 = vld [vmem:[%s10523_s1 + $0x78] sm:$0xff] }
 0x1f0   : > { %v3302_v18 = vpop.f32.mrf.mxu2  ;;  %v3190_v11 = vpop.f32.mrf.mxu0  ;;  %v4782_v39 = vor.u32 %v4781_v28, %v4777_v12 }
 0x1f1   : > { %v3374_v20 = vpop.f32.mrf.mxu3  ;;  %v3388_v23 = vpack.c.bf16 %v3385_v17, %v3385_v17  ;;  %v3308_v8 = vadd.f32 %v3302_v18, %v3235_v14  ;;  %v3236_v26 = vpop.f32.mrf.mxu1  ;;  %v4600_v36 = vsel %vm201_vm0, %v4595_v37, %v4599_v24  ;;  %v10177_v17 = vld [vmem:[%s8792_s16 + $0xc0] sm:$0xff]  ;;  %v4878_v18 = vunpack.c.l.b16 %v7888_v3  ;;  %v8662_v11 = vld [vmem:[%s10523_s1 + $0x70] sm:$0xff] }
 0x1f2   : > { %v4786_v54 = vsel %vm201_vm0, %v4782_v39, %v4785_v40  ;;  %v4884_v12 = vshll.u32 %v10177_v17, 16  ;;  %v10206_v28 = vpack.c.b16 %v5007_v1, %v5007_v1 }
 0x1f3   : > { %7319 = vst.msk [vmem:[%s9163_s26 + $0x7c] sm:$0xf] %vm469_vm2, %v3388_v23  ;;  %v3380_v30 = vadd.f32 %v3374_v20, %v3308_v8  ;;  %v10180_v20 = vld [vmem:[%s8792_s16 + $0xcc] sm:$0xff]  ;;  %v8650_v23 = vld [vmem:[%s10523_s1 + $0x18] sm:$0xff]  ;;  %v10203_v38 = vpack.c.b16 %v4878_v18, %v4878_v18  ;;  %v8001_v18 = vld [vmem:[%s8792_s16 + $0xd4] sm:$0x7] }
 0x1f4   : > { %v8658_v8 = vld [vmem:[%s10523_s1 + $0x50] sm:$0xff]  ;;  %v4886_v39 = vrot.slane %v4884_v12, 1 }
 0x1f5   : > { %v3383_v35 = vadd.f32 %v10079_v34, %v3380_v30 }
 0x1f7   : > { %v3386_v41 = vmax.f32 %v3383_v35, 0.0 }
 0x1f8   : > { %v3304_v25 = vpop.f32.mrf.mxu2  ;;  %v3475_v49 = vpop.f32.mrf.mxu0 }
 0x1f9   : > { %v3376_v42 = vpop.f32.mrf.mxu3  ;;  %v3389_v32 = vpack.c.bf16 %v3386_v41, %v3386_v41  ;;  %v3521_v50 = vpop.f32.mrf.mxu1  ;;  %v5069_v41 = vshrl.u32 %v10180_v20, 16 }
 0x1fa   : > { %v3522_v55 = vadd.f32 %v3521_v50, %v3475_v49  ;;  %v5075_v42 = vshll.u32 %v10206_v28, 16  ;;  %v8648_v49 = vld [vmem:[%s10523_s1 + $0x8] sm:$0xff] }
 0x1fb   : > { %7320 = vst.msk [vmem:[%s9163_s26 + $0x80] sm:$0x3] %vm472_vm3, %v3389_v32  ;;  %7804 = vmatmul.msk.bf16.vlgmr.msrb.gmra.mxu0 %vm241_vm1, %v4600_v36  ;;  %v8652_v32 = vld [vmem:[%s10523_s1 + $0x28] sm:$0xff] }
 0x1fc   : > { %7822 = vmatmul.msk.bf16.vlgmr.msrb.gmra.mxu1 %vm241_vm1, %v10086_v2  ;;  %v4787_v2 = vshrl.u32 %v10115_v16, 16  ;;  %5222 = vmatpush.bf16.msrb.mxu0 %v8654_v22 }
 0x1fd   : > { %7855 = vmatmul.msk.bf16.vlgmr.msrb.gmra.mxu2 %vm241_vm1, %v10089_v7  ;;  %5268 = vmatpush.bf16.msrb.mxu1 %v8650_v23 }
 0x1fe   : > { %7881 = vmatmul.msk.bf16.vlgmr.msrb.gmra.mxu3 %vm241_vm1, %v4786_v54  ;;  %5336 = vmatpush.bf16.msrb.mxu2 %v8659_v21  ;;  %v4789_v0 = vor.u32 %v4787_v2, %v4785_v40  ;;  %v4889_v40 = vshll.u32 %v10203_v38, 16  ;;  %v8647_v2 = vld [vmem:[%s10523_s1] sm:$0xff] }
 0x1ff   : > { %5408 = vmatpush.bf16.msrb.mxu3 %v8663_v56 }
 0x200   : > { %v3589_v57 = vpop.f32.mrf.mxu2  ;;  %v3477_v46 = vpop.f32.mrf.mxu0  ;;  %5223 = vmatpush.bf16.msrb.mxu0 %v8653_v31  ;;  %v4891_v53 = vrot.slane %v4889_v40, 1 }
 0x201   : > { %v3661_v58 = vpop.f32.mrf.mxu3  ;;  %v3598_v60 = vadd.f32 %v3589_v57, %v3522_v55  ;;  %v3523_v62 = vpop.f32.mrf.mxu1  ;;  %5269 = vmatpush.bf16.msrb.mxu1 %v8649_v33  ;;  %v5077_v55 = vrot.slane %v5075_v42, 1  ;;  %v8672_v33 = vld [vmem:[%s10523_s1 + $0x38] sm:$0xff] }
 0x202   : > { %v3524_v52 = vadd.f32 %v3523_v62, %v3477_v46  ;;  %5337 = vmatpush.bf16.msrb.mxu2 %v8658_v8  ;;  %v8651_v46 = vld [vmem:[%s10523_s1 + $0x20] sm:$0xff] }
 0x203   : > { %v3670_v63 = vadd.f32 %v3661_v58, %v3598_v60  ;;  %5409 = vmatpush.bf16.msrb.mxu3 %v8662_v11  ;;  %v8656_v58 = vld [vmem:[%s10523_s1 + $0x40] sm:$0xff] }
 0x204   : > { %5224 = vmatpush.bf16.msrb.mxu0 %v8652_v32  ;;  %v8660_v60 = vld [vmem:[%s10523_s1 + $0x60] sm:$0xff]  ;;  %v8667_v32 = vld [vmem:[%s10523_s1 + $0x10] sm:$0xff] }
 0x205   : > { %v3673_v51 = vadd.f32 %v10079_v34, %v3670_v63  ;;  %5270 = vmatpush.bf16.msrb.mxu1 %v8648_v49 }
 0x206   : > { %5338 = vmatpush.bf16.msrb.mxu2 %v8657_v44 }
 0x207   : > { %v3676_v7 = vmax.f32 %v3673_v51, 0.0  ;;  %5410 = vmatpush.bf16.msrb.mxu3 %v8661_v45  ;;  %v8671_v45 = vld [vmem:[%s10523_s1 + $0x30] sm:$0xff] }
 0x208   : > { %v3591_v9 = vpop.f32.mrf.mxu2  ;;  %v3480_v14 = vpop.f32.mrf.mxu0  ;;  %5225 = vmatpush.bf16.msrb.mxu0 %v8651_v46  ;;  %v8679_v46 = vld [vmem:[%s10523_s1 + $0x68] sm:$0xff] }
 0x209   : > { %v3663_v10 = vpop.f32.mrf.mxu3  ;;  %v3679_v59 = vpack.c.bf16 %v3676_v7, %v3676_v7  ;;  %v3599_v13 = vadd.f32 %v3591_v9, %v3524_v52  ;;  %v3526_v61 = vpop.f32.mrf.mxu1  ;;  %5271 = vmatpush.bf16.msrb.mxu1 %v8647_v2  ;;  %v8677_v52 = vld [vmem:[%s10523_s1 + $0x58] sm:$0xff] }
 0x20a   : > { %v3527_v27 = vadd.f32 %v3526_v61, %v3480_v14  ;;  %5339 = vmatpush.bf16.msrb.mxu2 %v8656_v58  ;;  %v4893_v61 = vshrl.u32 %v10203_v38, 16 }
 0x20b   : > { %7431 = vst.msk [vmem:[%s9163_s26 + $0x84] sm:$0xf] %vm469_vm2, %v3679_v59  ;;  %v3671_v5 = vadd.f32 %v3663_v10, %v3599_v13  ;;  %7805 = vmatmul.msk.bf16.gmra.mxu0 %vm241_vm1, %v4603_v6  ;;  %5411 = vmatpush.bf16.msrb.mxu3 %v8660_v60  ;;  %v8675_v60 = vld [vmem:[%s10523_s1 + $0x48] sm:$0xff] }
 0x20c   : > { %7823 = vmatmul.msk.bf16.gmra.mxu1 %vm241_vm1, %v10112_v15  ;;  %v5071_v15 = vshll.u32 %v10180_v20, 16  ;;  %v4895_v8 = vor.u32 %v4893_v61, %v4891_v53 }
 0x20d   : > { %v3674_v26 = vadd.f32 %v10079_v34, %v3671_v5  ;;  %7856 = vmatmul.msk.bf16.gmra.mxu2 %vm241_vm1, %v10115_v16  ;;  %v4882_v16 = vshrl.u32 %v10177_v17, 16  ;;  %v8052_v5 = vld [vmem:[%s8792_s16 + $0xe0] sm:$0x7] }
 0x20e   : > { %7882 = vmatmul.msk.bf16.gmra.mxu3 %vm241_vm1, %v4789_v0  ;;  %v5073_v25 = vrot.slane %v5071_v15, 1 }
 0x20f   : > { %v3677_v29 = vmax.f32 %v3674_v26, 0.0  ;;  %v4887_v36 = vor.u32 %v4886_v39, %v4882_v16  ;;  %v5299_v16 = vunpack.c.l.b16 %v8052_v5  ;;  %v8699_v5 = vld [vmem:[%s10523_s1 + $0x78] sm:$0xff] }
 0x210   : > { %v3594_v30 = vpop.f32.mrf.mxu2  ;;  %v3482_v37 = vpop.f32.mrf.mxu0  ;;  %v5074_v54 = vor.u32 %v5073_v25, %v5069_v41 }
 0x211   : > { %v3666_v47 = vpop.f32.mrf.mxu3  ;;  %v3680_v19 = vpack.c.bf16 %v3677_v29, %v3677_v29  ;;  %v3600_v35 = vadd.f32 %v3594_v30, %v3527_v27  ;;  %v3528_v24 = vpop.f32.mrf.mxu1  ;;  %v4892_v51 = vsel %vm201_vm0, %v4887_v36, %v4891_v53  ;;  %v10268_v29 = vld [vmem:[%s8792_s16 + $0xcc] sm:$0xff]  ;;  %v5170_v30 = vunpack.c.l.b16 %v8001_v18 }
 0x212   : > { %v5078_v3 = vsel %vm201_vm0, %v5074_v54, %v5077_v55  ;;  %v8680_v37 = vld [vmem:[%s10523_s1 + $0x70] sm:$0xff]  ;;  %v5176_v41 = vshll.u32 %v10268_v29, 16  ;;  %v10297_v25 = vpack.c.b16 %v5299_v16, %v5299_v16 }
 0x213   : > { %7432 = vst.msk [vmem:[%s9163_s26 + $0x88] sm:$0xf] %vm469_vm2, %v3680_v19  ;;  %v3672_v43 = vadd.f32 %v3666_v47, %v3600_v35  ;;  %v10271_v47 = vld [vmem:[%s8792_s16 + $0xd8] sm:$0xff]  ;;  %v8676_v35 = vld [vmem:[%s10523_s1 + $0x50] sm:$0xff]  ;;  %v10294_v40 = vpack.c.b16 %v5170_v30, %v5170_v30  ;;  %v8114_v30 = vld [vmem:[%s8792_s16 + $0xe0] sm:$0x7] }
 0x214   : > { %v8668_v19 = vld [vmem:[%s10523_s1 + $0x18] sm:$0xff]  ;;  %v5178_v54 = vrot.slane %v5176_v41, 1 }
 0x215   : > { %v3675_v50 = vadd.f32 %v10079_v34, %v3672_v43 }
 0x217   : > { %v3678_v21 = vmax.f32 %v3675_v50, 0.0 }
 0x218   : > { %v3596_v56 = vpop.f32.mrf.mxu2  ;;  %v3767_v63 = vpop.f32.mrf.mxu0 }
 0x219   : > { %v3668_v57 = vpop.f32.mrf.mxu3  ;;  %v3681_v62 = vpack.c.bf16 %v3678_v21, %v3678_v21  ;;  %v3813_v48 = vpop.f32.mrf.mxu1  ;;  %v5361_v21 = vshrl.u32 %v10271_v47, 16 }
 0x21a   : > { %v3814_v7 = vadd.f32 %v3813_v48, %v3767_v63  ;;  %v5367_v57 = vshll.u32 %v10297_v25, 16  ;;  %v8666_v63 = vld [vmem:[%s10523_s1 + $0x8] sm:$0xff] }
 0x21b   : > { %7433 = vst.msk [vmem:[%s9163_s26 + $0x8c] sm:$0x3] %vm472_vm3, %v3681_v62  ;;  %7917 = vmatmul.msk.bf16.vlgmr.msra.gmra.mxu0 %vm241_vm1, %v4892_v51  ;;  %v8670_v62 = vld [vmem:[%s10523_s1 + $0x28] sm:$0xff] }
 0x21c   : > { %7935 = vmatmul.msk.bf16.vlgmr.msra.gmra.mxu1 %vm241_vm1, %v10177_v17  ;;  %v5079_v17 = vshrl.u32 %v10206_v28, 16  ;;  %5514 = vmatpush.bf16.msra.mxu0 %v8672_v33 }
 0x21d   : > { %7968 = vmatmul.msk.bf16.vlgmr.msra.gmra.mxu2 %vm241_vm1, %v10180_v20  ;;  %5560 = vmatpush.bf16.msra.mxu1 %v8668_v19 }
 0x21e   : > { %7994 = vmatmul.msk.bf16.vlgmr.msra.gmra.mxu3 %vm241_vm1, %v5078_v3  ;;  %5628 = vmatpush.bf16.msra.mxu2 %v8677_v52  ;;  %v5081_v15 = vor.u32 %v5079_v17, %v5077_v55  ;;  %v5181_v55 = vshll.u32 %v10294_v40, 16  ;;  %v8665_v17 = vld [vmem:[%s10523_s1] sm:$0xff] }
 0x21f   : > { %5700 = vmatpush.bf16.msra.mxu3 %v8681_v4 }
 0x220   : > { %v3881_v9 = vpop.f32.mrf.mxu2  ;;  %v3769_v59 = vpop.f32.mrf.mxu0  ;;  %5515 = vmatpush.bf16.msra.mxu0 %v8671_v45  ;;  %v5183_v2 = vrot.slane %v5181_v55, 1 }
 0x221   : > { %v3953_v10 = vpop.f32.mrf.mxu3  ;;  %v3890_v6 = vadd.f32 %v3881_v9, %v3814_v7  ;;  %v3815_v13 = vpop.f32.mrf.mxu1  ;;  %5561 = vmatpush.bf16.msra.mxu1 %v8667_v32  ;;  %v5369_v7 = vrot.slane %v5367_v57, 1  ;;  %v8690_v32 = vld [vmem:[%s10523_s1 + $0x38] sm:$0xff] }
 0x222   : > { %v3816_v1 = vadd.f32 %v3815_v13, %v3769_v59  ;;  %5629 = vmatpush.bf16.msra.mxu2 %v8676_v35  ;;  %v8669_v59 = vld [vmem:[%s10523_s1 + $0x20] sm:$0xff] }
 0x223   : > { %v3962_v14 = vadd.f32 %v3953_v10, %v3890_v6  ;;  %5701 = vmatpush.bf16.msra.mxu3 %v8680_v37  ;;  %v8674_v10 = vld [vmem:[%s10523_s1 + $0x40] sm:$0xff] }
 0x224   : > { %5516 = vmatpush.bf16.msra.mxu0 %v8670_v62  ;;  %v8678_v6 = vld [vmem:[%s10523_s1 + $0x60] sm:$0xff]  ;;  %v8685_v62 = vld [vmem:[%s10523_s1 + $0x10] sm:$0xff] }
 0x225   : > { %v3965_v0 = vadd.f32 %v10079_v34, %v3962_v14  ;;  %5562 = vmatpush.bf16.msra.mxu1 %v8666_v63 }
 0x226   : > { %5630 = vmatpush.bf16.msra.mxu2 %v8675_v60 }
 0x227   : > { %v3968_v20 = vmax.f32 %v3965_v0, 0.0  ;;  %5702 = vmatpush.bf16.msra.mxu3 %v8679_v46  ;;  %v8689_v46 = vld [vmem:[%s10523_s1 + $0x30] sm:$0xff] }
 0x228   : > { %v3883_v22 = vpop.f32.mrf.mxu2  ;;  %v3772_v27 = vpop.f32.mrf.mxu0  ;;  %5517 = vmatpush.bf16.msra.mxu0 %v8669_v59  ;;  %v8697_v59 = vld [vmem:[%s10523_s1 + $0x68] sm:$0xff] }
 0x229   : > { %v3955_v23 = vpop.f32.mrf.mxu3  ;;  %v3971_v11 = vpack.c.bf16 %v3968_v20, %v3968_v20  ;;  %v3891_v26 = vadd.f32 %v3883_v22, %v3816_v1  ;;  %v3818_v12 = vpop.f32.mrf.mxu1  ;;  %5563 = vmatpush.bf16.msra.mxu1 %v8665_v17  ;;  %v8695_v1 = vld [vmem:[%s10523_s1 + $0x58] sm:$0xff] }
 0x22a   : > { %v3819_v39 = vadd.f32 %v3818_v12, %v3772_v27  ;;  %5631 = vmatpush.bf16.msra.mxu2 %v8674_v10  ;;  %v5185_v12 = vshrl.u32 %v10294_v40, 16 }
 0x22b   : > { %7544 = vst.msk [vmem:[%s9163_s26 + $0x90] sm:$0xf] %vm469_vm2, %v3971_v11  ;;  %v3963_v31 = vadd.f32 %v3955_v23, %v3891_v26  ;;  %7918 = vmatmul.msk.bf16.gmra.mxu0 %vm241_vm1, %v4895_v8  ;;  %5703 = vmatpush.bf16.msra.mxu3 %v8678_v6  ;;  %v8693_v6 = vld [vmem:[%s10523_s1 + $0x48] sm:$0xff] }
 0x22c   : > { %7936 = vmatmul.msk.bf16.gmra.mxu1 %vm241_vm1, %v10203_v38  ;;  %v5363_v38 = vshll.u32 %v10271_v47, 16  ;;  %v5187_v35 = vor.u32 %v5185_v12, %v5183_v2 }
 0x22d   : > { %v3966_v24 = vadd.f32 %v10079_v34, %v3963_v31  ;;  %7969 = vmatmul.msk.bf16.gmra.mxu2 %vm241_vm1, %v10206_v28  ;;  %v5174_v28 = vshrl.u32 %v10268_v29, 16  ;;  %v8165_v31 = vld [vmem:[%s8792_s16 + $0xec] sm:$0x7] }
 0x22e   : > { %7995 = vmatmul.msk.bf16.gmra.mxu3 %vm241_vm1, %v5081_v15  ;;  %v5365_v56 = vrot.slane %v5363_v38, 1 }
 0x22f   : > { %v3969_v42 = vmax.f32 %v3966_v24, 0.0  ;;  %v5179_v51 = vor.u32 %v5178_v54, %v5174_v28  ;;  %v5591_v28 = vunpack.c.l.b16 %v8165_v31 }
 0x230   : > { %v3886_v43 = vpop.f32.mrf.mxu2  ;;  %v3774_v36 = vpop.f32.mrf.mxu0  ;;  %v5366_v3 = vor.u32 %v5365_v56, %v5361_v21 }
 0x231   : > { %v3958_v44 = vpop.f32.mrf.mxu3  ;;  %v3972_v49 = vpack.c.bf16 %v3969_v42, %v3969_v42  ;;  %v3892_v50 = vadd.f32 %v3886_v43, %v3819_v39  ;;  %v3820_v53 = vpop.f32.mrf.mxu1  ;;  %v5184_v0 = vsel %vm201_vm0, %v5179_v51, %v5183_v2  ;;  %v10359_v42 = vld [vmem:[%s8792_s16 + $0xd8] sm:$0xff]  ;;  %v5462_v43 = vunpack.c.l.b16 %v8114_v30  ;;  %v8698_v36 = vld [vmem:[%s10523_s1 + $0x70] sm:$0xff] }
 0x232   : > { %v5370_v18 = vsel %vm201_vm0, %v5366_v3, %v5369_v7  ;;  %v5468_v21 = vshll.u32 %v10359_v42, 16  ;;  %v10388_v56 = vpack.c.b16 %v5591_v28, %v5591_v28 }
 0x233   : > { %7545 = vst.msk [vmem:[%s9163_s26 + $0x94] sm:$0xf] %vm469_vm2, %v3972_v49  ;;  %v3964_v58 = vadd.f32 %v3958_v44, %v3892_v50  ;;  %v10362_v44 = vld [vmem:[%s8792_s16 + $0xe4] sm:$0xff]  ;;  %v8686_v49 = vld [vmem:[%s10523_s1 + $0x18] sm:$0xff]  ;;  %v8694_v50 = vld [vmem:[%s10523_s1 + $0x50] sm:$0xff]  ;;  %v10385_v55 = vpack.c.b16 %v5462_v43, %v5462_v43 }
 0x234   : > { %v5470_v3 = vrot.slane %v5468_v21, 1  ;;  %v8682_v21 = vld [vmem:[%s8792_s16 + $0xe4] sm:$0xff] }
 0x235   : > { %v3967_v48 = vadd.f32 %v10079_v34, %v3964_v58 }
 0x237   : > { %v3970_v52 = vmax.f32 %v3967_v48, 0.0 }
 0x238   : > { %v3888_v4 = vpop.f32.mrf.mxu2  ;;  %v4059_v14 = vpop.f32.mrf.mxu0 }
 0x239   : > { %v3960_v9 = vpop.f32.mrf.mxu3  ;;  %v3973_v13 = vpack.c.bf16 %v3970_v52, %v3970_v52  ;;  %v4105_v61 = vpop.f32.mrf.mxu1  ;;  %v5653_v52 = vshrl.u32 %v10362_v44, 16 }
 0x23a   : > { %v4106_v20 = vadd.f32 %v4105_v61, %v4059_v14  ;;  %v5659_v9 = vshll.u32 %v10388_v56, 16  ;;  %v8684_v14 = vld [vmem:[%s10523_s1 + $0x8] sm:$0xff] }
 0x23b   : > { %7546 = vst.msk [vmem:[%s9163_s26 + $0x98] sm:$0x3] %vm472_vm3, %v3973_v13  ;;  %8030 = vmatmul.msk.bf16.vlgmr.msrb.gmra.mxu0 %vm241_vm1, %v5184_v0  ;;  %v8688_v13 = vld [vmem:[%s10523_s1 + $0x28] sm:$0xff] }
 0x23c   : > { %8048 = vmatmul.msk.bf16.vlgmr.msrb.gmra.mxu1 %vm241_vm1, %v10268_v29  ;;  %v5371_v29 = vshrl.u32 %v10297_v25, 16  ;;  %5806 = vmatpush.bf16.msrb.mxu0 %v8690_v32 }
 0x23d   : > { %8081 = vmatmul.msk.bf16.vlgmr.msrb.gmra.mxu2 %vm241_vm1, %v10271_v47  ;;  %5852 = vmatpush.bf16.msrb.mxu1 %v8686_v49 }
 0x23e   : > { %8107 = vmatmul.msk.bf16.vlgmr.msrb.gmra.mxu3 %vm241_vm1, %v5370_v18  ;;  %5920 = vmatpush.bf16.msrb.mxu2 %v8695_v1  ;;  %v5373_v38 = vor.u32 %v5371_v29, %v5369_v7  ;;  %v5473_v7 = vshll.u32 %v10385_v55, 16  ;;  %v8683_v29 = vld [vmem:[%s10523_s1] sm:$0xff] }
 0x23f   : > { %5992 = vmatpush.bf16.msrb.mxu3 %v8699_v5 }
 0x240   : > { %v4173_v22 = vpop.f32.mrf.mxu2  ;;  %v4061_v11 = vpop.f32.mrf.mxu0  ;;  %5807 = vmatpush.bf16.msrb.mxu0 %v8689_v46  ;;  %v5475_v17 = vrot.slane %v5473_v7, 1 }
 0x241   : > { %v4245_v23 = vpop.f32.mrf.mxu3  ;;  %v4182_v8 = vadd.f32 %v4173_v22, %v4106_v20  ;;  %v4107_v26 = vpop.f32.mrf.mxu1  ;;  %5853 = vmatpush.bf16.msrb.mxu1 %v8685_v62  ;;  %v5661_v20 = vrot.slane %v5659_v9, 1 }
 0x242   : > { %v4108_v16 = vadd.f32 %v4107_v26, %v4061_v11  ;;  %5921 = vmatpush.bf16.msrb.mxu2 %v8694_v50  ;;  %v8687_v11 = vld [vmem:[%s10523_s1 + $0x20] sm:$0xff] }
 0x243   : > { %v4254_v27 = vadd.f32 %v4245_v23, %v4182_v8  ;;  %5993 = vmatpush.bf16.msrb.mxu3 %v8698_v36  ;;  %v8692_v23 = vld [vmem:[%s10523_s1 + $0x40] sm:$0xff] }
 0x244   : > { %5808 = vmatpush.bf16.msrb.mxu0 %v8688_v13  ;;  %v8696_v8 = vld [vmem:[%s10523_s1 + $0x60] sm:$0xff] }
 0x245   : > { %v4257_v15 = vadd.f32 %v10079_v34, %v4254_v27  ;;  %5854 = vmatpush.bf16.msrb.mxu1 %v8684_v14 }
 0x246   : > { %5922 = vmatpush.bf16.msrb.mxu2 %v8693_v6 }
 0x247   : > { %v4260_v47 = vmax.f32 %v4257_v15, 0.0  ;;  %5994 = vmatpush.bf16.msrb.mxu3 %v8697_v59 }
 0x248   : > { %v4175_v33 = vpop.f32.mrf.mxu2  ;;  %v4064_v39 = vpop.f32.mrf.mxu0  ;;  %5809 = vmatpush.bf16.msrb.mxu0 %v8687_v11 }
 0x249   : > { %v4247_v19 = vpop.f32.mrf.mxu3  ;;  %v4263_v37 = vpack.c.bf16 %v4260_v47, %v4260_v47  ;;  %v4183_v24 = vadd.f32 %v4175_v33, %v4108_v16  ;;  %v4110_v41 = vpop.f32.mrf.mxu1  ;;  %5855 = vmatpush.bf16.msrb.mxu1 %v8683_v29 }
 0x24a   : > { %v4111_v54 = vadd.f32 %v4110_v41, %v4064_v39  ;;  %5923 = vmatpush.bf16.msrb.mxu2 %v8692_v23  ;;  %v5663_v41 = vshrl.u32 %v10388_v56, 16 }
 0x24b   : > { %7657 = vst.msk [vmem:[%s9163_s26 + $0x9c] sm:$0xf] %vm469_vm2, %v4263_v37  ;;  %v4255_v45 = vadd.f32 %v4247_v19, %v4183_v24  ;;  %8031 = vmatmul.msk.bf16.gmra.mxu0 %vm241_vm1, %v5187_v35  ;;  %5995 = vmatpush.bf16.msrb.mxu3 %v8696_v8  ;;  %v5477_v24 = vshrl.u32 %v10385_v55, 16 }
 0x24c   : > { %8049 = vmatmul.msk.bf16.gmra.mxu1 %vm241_vm1, %v10294_v40  ;;  %v5655_v40 = vshll.u32 %v10362_v44, 16 }
 0x24d   : > { %v4258_v53 = vadd.f32 %v10079_v34, %v4255_v45  ;;  %8082 = vmatmul.msk.bf16.gmra.mxu2 %vm241_vm1, %v10297_v25  ;;  %v5466_v25 = vshrl.u32 %v10359_v42, 16  ;;  %v5479_v32 = vor.u32 %v5477_v24, %v5475_v17 }
 0x24e   : > { %8108 = vmatmul.msk.bf16.gmra.mxu3 %vm241_vm1, %v5373_v38  ;;  %v5657_v4 = vrot.slane %v5655_v40, 1  ;;  %v8227_v38 = vld [vmem:[%s8792_s16 + $0xec] sm:$0x7] }
 0x24f   : > { %v4261_v57 = vmax.f32 %v4258_v53, 0.0  ;;  %v5471_v0 = vor.u32 %v5470_v3, %v5466_v25  ;;  %v5754_v40 = vunpack.c.l.b16 %v8227_v38 }
 0x250   : > { %v4178_v58 = vpop.f32.mrf.mxu2  ;;  %v4066_v51 = vpop.f32.mrf.mxu0  ;;  %v5658_v18 = vor.u32 %v5657_v4, %v5653_v52  ;;  %v5758_v52 = vshrl.u32 %v8682_v21, 16 }
 0x251   : > { %v4250_v60 = vpop.f32.mrf.mxu3  ;;  %v4264_v63 = vpack.c.bf16 %v4261_v57, %v4261_v57  ;;  %v4184_v48 = vadd.f32 %v4178_v58, %v4111_v54  ;;  %v4112_v2 = vpop.f32.mrf.mxu1  ;;  %v5476_v15 = vsel %vm201_vm0, %v5471_v0, %v5475_v17  ;;  %v5665_v54 = vor.u32 %v5663_v41, %v5661_v20  ;;  %v8691_v57 = vld [vmem:[%s8792_s16 + $0xf0] sm:$0xff] }
 0x252   : > { %v5662_v30 = vsel %vm201_vm0, %v5658_v18, %v5661_v20  ;;  %v5756_v62 = vpack.c.b16 %v5754_v40, %v5754_v40  ;;  %v5947_v51 = vshll.u32 %v8691_v57, 16  ;;  %v5945_v13 = vshrl.u32 %v8691_v57, 16 }
 0x253   : > { %7658 = vst.msk [vmem:[%s9163_s26 + $0xa0] sm:$0xf] %vm469_vm2, %v4264_v63  ;;  %v4256_v10 = vadd.f32 %v4250_v60, %v4184_v48  ;;  %v5760_v63 = vshll.u32 %v8682_v21, 16 }
 0x254   : > { %v5765_v59 = vshll.u32 %v5756_v62, 16  ;;  %v5949_v14 = vrot.slane %v5947_v51, 1 }
 0x255   : > { %v4259_v61 = vadd.f32 %v10079_v34, %v4256_v10  ;;  %v5762_v6 = vrot.slane %v5760_v63, 1 }
 0x256   : > { %v5767_v18 = vrot.slane %v5765_v59, 1  ;;  %v5950_v20 = vor.u32 %v5949_v14, %v5945_v13 }
 0x257   : > { %v4262_v1 = vmax.f32 %v4259_v61, 0.0  ;;  %v5763_v17 = vor.u32 %v5762_v6, %v5758_v52 }
 0x258   : > { %v4180_v5 = vpop.f32.mrf.mxu2  ;;  %v4351_v27 = vpop.f32.mrf.mxu0 }
 0x259   : > { %v4252_v22 = vpop.f32.mrf.mxu3  ;;  %v4265_v26 = vpack.c.bf16 %v4262_v1, %v4262_v1  ;;  %v4397_v12 = vpop.f32.mrf.mxu1 }
 0x25a   : > { %v4398_v47 = vadd.f32 %v4397_v12, %v4351_v27  ;;  %v5768_v27 = vsel %vm201_vm0, %v5763_v17, %v5767_v18 }
 0x25b   : > { %7659 = vst.msk [vmem:[%s9163_s26 + $0xa4] sm:$0x3] %vm472_vm3, %v4265_v26  ;;  %8143 = vmatmul.msk.bf16.vlgmr.msra.gmra.mxu0 %vm241_vm1, %v5476_v15 }
 0x25c   : > { %8161 = vmatmul.msk.bf16.vlgmr.msra.gmra.mxu1 %vm241_vm1, %v10359_v42 }
 0x25d   : > { %8194 = vmatmul.msk.bf16.vlgmr.msra.gmra.mxu2 %vm241_vm1, %v10362_v44  ;;  %v8278_v44 = vld [vmem:[%s8792_s16 + $0xf8] sm:$0x7] }
 0x25e   : > { %8220 = vmatmul.msk.bf16.vlgmr.msra.gmra.mxu3 %vm241_vm1, %v5662_v30  ;;  %v5883_v58 = vunpack.c.l.b16 %v8278_v44 }
 0x260   : > { %v4465_v16 = vpop.f32.mrf.mxu2  ;;  %v4353_v19 = vpop.f32.mrf.mxu0  ;;  %v5885_v48 = vpack.c.b16 %v5883_v58, %v5883_v58 }
 0x261   : > { %v4537_v31 = vpop.f32.mrf.mxu3  ;;  %v4474_v33 = vadd.f32 %v4465_v16, %v4398_v47  ;;  %v4399_v35 = vpop.f32.mrf.mxu1 }
 0x262   : > { %v4400_v43 = vadd.f32 %v4399_v35, %v4353_v19  ;;  %v5769_v19 = vshrl.u32 %v5756_v62, 16 }
 0x263   : > { %v4546_v37 = vadd.f32 %v4537_v31, %v4474_v33 }
 0x265   : > { %v4549_v39 = vadd.f32 %v10079_v34, %v4546_v37  ;;  %v5955_v37 = vshrl.u32 %v5885_v48, 16 }
 0x267   : > { %v4552_v42 = vmax.f32 %v4549_v39, 0.0 }
 0x268   : > { %v4467_v28 = vpop.f32.mrf.mxu2  ;;  %v4356_v36 = vpop.f32.mrf.mxu0 }
 0x269   : > { %v4539_v45 = vpop.f32.mrf.mxu3  ;;  %v4555_v49 = vpack.c.bf16 %v4552_v42, %v4552_v42  ;;  %v4475_v50 = vadd.f32 %v4467_v28, %v4400_v43  ;;  %v4402_v53 = vpop.f32.mrf.mxu1  ;;  %v5771_v42 = vor.u32 %v5769_v19, %v5767_v18 }
 0x26a   : > { %v4403_v46 = vadd.f32 %v4402_v53, %v4356_v36 }
 0x26b   : > { %7770 = vst.msk [vmem:[%s9163_s26 + $0xa8] sm:$0xf] %vm469_vm2, %v4555_v49  ;;  %v4547_v60 = vadd.f32 %v4539_v45, %v4475_v50  ;;  %8144 = vmatmul.msk.bf16.gmra.mxu0 %vm241_vm1, %v5479_v32 }
 0x26c   : > { %8162 = vmatmul.msk.bf16.gmra.mxu1 %vm241_vm1, %v10385_v55 }
 0x26d   : > { %v4550_v25 = vadd.f32 %v10079_v34, %v4547_v60  ;;  %8195 = vmatmul.msk.bf16.gmra.mxu2 %vm241_vm1, %v10388_v56  ;;  %v5951_v56 = vshll.u32 %v5885_v48, 16 }
 0x26e   : > { %8221 = vmatmul.msk.bf16.gmra.mxu3 %vm241_vm1, %v5665_v54 }
 0x26f   : > { %v4553_v2 = vmax.f32 %v4550_v25, 0.0  ;;  %v5953_v1 = vrot.slane %v5951_v56, 1 }
 0x270   : > { %v4470_v3 = vpop.f32.mrf.mxu2  ;;  %v4358_v55 = vpop.f32.mrf.mxu0 }
 0x271   : > { %v4542_v7 = vpop.f32.mrf.mxu3  ;;  %v4556_v4 = vpack.c.bf16 %v4553_v2, %v4553_v2  ;;  %v4476_v9 = vadd.f32 %v4470_v3, %v4403_v46  ;;  %v4404_v10 = vpop.f32.mrf.mxu1  ;;  %v5954_v12 = vsel %vm201_vm0, %v5950_v20, %v5953_v1  ;;  %v5957_v32 = vor.u32 %v5955_v37, %v5953_v1 }
 0x273   : > { %7771 = vst.msk [vmem:[%s9163_s26 + $0xac] sm:$0xf] %vm469_vm2, %v4556_v4  ;;  %v4548_v61 = vadd.f32 %v4542_v7, %v4476_v9 }
 0x275   : > { %v4551_v0 = vadd.f32 %v10079_v34, %v4548_v61 }
 0x277   : > { %v4554_v5 = vmax.f32 %v4551_v0, 0.0 }
 0x278   : > { %v4472_v22 = vpop.f32.mrf.mxu2  ;;  %v4643_v11 = vpop.f32.mrf.mxu0 }
 0x279   : > { %v4544_v23 = vpop.f32.mrf.mxu3  ;;  %v4557_v8 = vpack.c.bf16 %v4554_v5, %v4554_v5  ;;  %v4689_v26 = vpop.f32.mrf.mxu1 }
 0x27a   : > { %v4690_v15 = vadd.f32 %v4689_v26, %v4643_v11 }
 0x27b   : > { %7772 = vst.msk [vmem:[%s9163_s26 + $0xb0] sm:$0x3] %vm472_vm3, %v4557_v8  ;;  %8256 = vmatmul.msk.bf16.vlgmr.msrb.gmra.mxu0 %vm241_vm1, %v5768_v27 }
 0x27c   : > { %8274 = vmatmul.msk.bf16.vlgmr.msrb.gmra.mxu1 %vm241_vm1, %v8682_v21 }
 0x27d   : > { %8307 = vmatmul.msk.bf16.vlgmr.msrb.gmra.mxu2 %vm241_vm1, %v8691_v57 }
 0x27e   : > { %8333 = vmatmul.msk.bf16.vlgmr.msrb.gmra.mxu3 %vm241_vm1, %v5954_v12 }
 0x280   : > { %v4757_v29 = vpop.f32.mrf.mxu2  ;;  %v4645_v16 = vpop.f32.mrf.mxu0 }
 0x281   : > { %v4829_v30 = vpop.f32.mrf.mxu3  ;;  %v4766_v47 = vadd.f32 %v4757_v29, %v4690_v15  ;;  %v4691_v31 = vpop.f32.mrf.mxu1 }
 0x282   : > { %v4692_v39 = vadd.f32 %v4691_v31, %v4645_v16 }
 0x283   : > { %v4838_v33 = vadd.f32 %v4829_v30, %v4766_v47 }
 0x285   : > { %v4841_v35 = vadd.f32 %v10079_v34, %v4838_v33 }
 0x287   : > { %v4844_v24 = vmax.f32 %v4841_v35, 0.0 }
 0x288   : > { %v4759_v41 = vpop.f32.mrf.mxu2  ;;  %v4648_v28 = vpop.f32.mrf.mxu0 }
 0x289   : > { %v4831_v38 = vpop.f32.mrf.mxu3  ;;  %v4847_v43 = vpack.c.bf16 %v4844_v24, %v4844_v24  ;;  %v4767_v44 = vadd.f32 %v4759_v41, %v4692_v39  ;;  %v4694_v45 = vpop.f32.mrf.mxu1 }
 0x28a   : > { %v4695_v36 = vadd.f32 %v4694_v45, %v4648_v28 }
 0x28b   : > { %7883 = vst.msk [vmem:[%s9163_s26 + $0xb4] sm:$0xf] %vm469_vm2, %v4847_v43  ;;  %v4839_v49 = vadd.f32 %v4831_v38, %v4767_v44  ;;  %8257 = vmatmul.msk.bf16.gmra.mxu0 %vm241_vm1, %v5771_v42 }
 0x28c   : > { %8275 = vmatmul.msk.bf16.gmra.mxu1 %vm241_vm1, %v5756_v62 }
 0x28d   : > { %v4842_v50 = vadd.f32 %v10079_v34, %v4839_v49  ;;  %8308 = vmatmul.msk.bf16.gmra.mxu2 %vm241_vm1, %v5885_v48 }
 0x28e   : > { %8334 = vmatmul.msk.bf16.gmra.mxu3 %vm241_vm1, %v5957_v32 }
 0x28f   : > { %v4845_v53 = vmax.f32 %v4842_v50, 0.0 }
 0x290   : > { %v4762_v54 = vpop.f32.mrf.mxu2  ;;  %v4650_v58 = vpop.f32.mrf.mxu0 }
 0x291   : > { %v4834_v21 = vpop.f32.mrf.mxu3  ;;  %v4848_v40 = vpack.c.bf16 %v4845_v53, %v4845_v53  ;;  %v4768_v57 = vadd.f32 %v4762_v54, %v4695_v36  ;;  %v4696_v60 = vpop.f32.mrf.mxu1 }
 0x293   : > { %7884 = vst.msk [vmem:[%s9163_s26 + $0xb8] sm:$0xf] %vm469_vm2, %v4848_v40  ;;  %v4840_v25 = vadd.f32 %v4834_v21, %v4768_v57 }
 0x295   : > { %v4843_v46 = vadd.f32 %v10079_v34, %v4840_v25  ;;  %v10481_v34 = vld [vmem:[%s10524_s2] ss:$0 sm:$0xff] }
 0x297   : > { %v4846_v62 = vmax.f32 %v4843_v46, 0.0 }
 0x298   : > { %v4764_v63 = vpop.f32.mrf.mxu2  ;;  %v4935_v48 = vpop.f32.mrf.mxu0 }
 0x299   : > { %v4836_v51 = vpop.f32.mrf.mxu3  ;;  %v4849_v2 = vpack.c.bf16 %v4846_v62, %v4846_v62  ;;  %v4981_v3 = vpop.f32.mrf.mxu1 }
 0x29a   : > { %v4982_v7 = vadd.f32 %v4981_v3, %v4935_v48 }
 0x29b   : > { %7885 = vst.msk [vmem:[%s9163_s26 + $0xbc] sm:$0x3] %vm472_vm3, %v4849_v2 }
 0x2a0   : > { %v5049_v52 = vpop.f32.mrf.mxu2  ;;  %v4937_v55 = vpop.f32.mrf.mxu0 }
 0x2a1   : > { %v5121_v4 = vpop.f32.mrf.mxu3  ;;  %v5058_v9 = vadd.f32 %v5049_v52, %v4982_v7  ;;  %v4983_v10 = vpop.f32.mrf.mxu1 }
 0x2a2   : > { %v4984_v14 = vadd.f32 %v4983_v10, %v4937_v55 }
 0x2a3   : > { %v5130_v6 = vadd.f32 %v5121_v4, %v5058_v9 }
 0x2a5   : > { %v5133_v59 = vadd.f32 %v10481_v34, %v5130_v6 }
 0x2a7   : > { %v5136_v13 = vmax.f32 %v5133_v59, 0.0 }
 0x2a8   : > { %v5051_v56 = vpop.f32.mrf.mxu2  ;;  %v4940_v18 = vpop.f32.mrf.mxu0 }
 0x2a9   : > { %v5123_v61 = vpop.f32.mrf.mxu3  ;;  %v5139_v0 = vpack.c.bf16 %v5136_v13, %v5136_v13  ;;  %v5059_v17 = vadd.f32 %v5051_v56, %v4984_v14  ;;  %v4986_v20 = vpop.f32.mrf.mxu1 }
 0x2aa   : > { %v4987_v22 = vadd.f32 %v4986_v20, %v4940_v18 }
 0x2ab   : > { %7996 = vst.msk [vmem:[%s9163_s26 + $0xc0] sm:$0xf] %vm469_vm2, %v5139_v0  ;;  %v5131_v1 = vadd.f32 %v5123_v61, %v5059_v17 }
 0x2ad   : > { %v5134_v5 = vadd.f32 %v10481_v34, %v5131_v1 }
 0x2af   : > { %v5137_v23 = vmax.f32 %v5134_v5, 0.0 }
 0x2b0   : > { %v5054_v8 = vpop.f32.mrf.mxu2  ;;  %v4942_v12 = vpop.f32.mrf.mxu0 }
 0x2b1   : > { %v5126_v11 = vpop.f32.mrf.mxu3  ;;  %v5140_v26 = vpack.c.bf16 %v5137_v23, %v5137_v23  ;;  %v5060_v27 = vadd.f32 %v5054_v8, %v4987_v22  ;;  %v4988_v15 = vpop.f32.mrf.mxu1 }
 0x2b3   : > { %7997 = vst.msk [vmem:[%s9163_s26 + $0xc4] sm:$0xf] %vm469_vm2, %v5140_v26  ;;  %v5132_v29 = vadd.f32 %v5126_v11, %v5060_v27 }
 0x2b5   : > { %v5135_v30 = vadd.f32 %v10481_v34, %v5132_v29 }
 0x2b7   : > { %v5138_v47 = vmax.f32 %v5135_v30, 0.0 }
 0x2b8   : > { %v5056_v16 = vpop.f32.mrf.mxu2  ;;  %v5227_v19 = vpop.f32.mrf.mxu0 }
 0x2b9   : > { %v5128_v31 = vpop.f32.mrf.mxu3  ;;  %v5141_v33 = vpack.c.bf16 %v5138_v47, %v5138_v47  ;;  %v5273_v35 = vpop.f32.mrf.mxu1 }
 0x2ba   : > { %v5274_v37 = vadd.f32 %v5273_v35, %v5227_v19 }
 0x2bb   : > { %7998 = vst.msk [vmem:[%s9163_s26 + $0xc8] sm:$0x3] %vm472_vm3, %v5141_v33 }
 0x2c0   : > { %v5341_v24 = vpop.f32.mrf.mxu2  ;;  %v5229_v38 = vpop.f32.mrf.mxu0 }
 0x2c1   : > { %v5413_v39 = vpop.f32.mrf.mxu3  ;;  %v5350_v41 = vadd.f32 %v5341_v24, %v5274_v37  ;;  %v5275_v42 = vpop.f32.mrf.mxu1 }
 0x2c2   : > { %v5276_v45 = vadd.f32 %v5275_v42, %v5229_v38 }
 0x2c3   : > { %v5422_v43 = vadd.f32 %v5413_v39, %v5350_v41 }
 0x2c5   : > { %v5425_v44 = vadd.f32 %v10481_v34, %v5422_v43 }
 0x2c7   : > { %v5428_v28 = vmax.f32 %v5425_v44, 0.0 }
 0x2c8   : > { %v5343_v32 = vpop.f32.mrf.mxu2  ;;  %v5232_v53 = vpop.f32.mrf.mxu0 }
 0x2c9   : > { %v5415_v49 = vpop.f32.mrf.mxu3  ;;  %v5431_v50 = vpack.c.bf16 %v5428_v28, %v5428_v28  ;;  %v5351_v36 = vadd.f32 %v5343_v32, %v5276_v45  ;;  %v5278_v54 = vpop.f32.mrf.mxu1 }
 0x2ca   : > { %v5279_v57 = vadd.f32 %v5278_v54, %v5232_v53 }
 0x2cb   : > { %8109 = vst.msk [vmem:[%s9163_s26 + $0xcc] sm:$0xf] %vm469_vm2, %v5431_v50  ;;  %v5423_v21 = vadd.f32 %v5415_v49, %v5351_v36 }
 0x2cd   : > { %v5426_v40 = vadd.f32 %v10481_v34, %v5423_v21 }
 0x2cf   : > { %v5429_v58 = vmax.f32 %v5426_v40, 0.0 }
 0x2d0   : > { %v5346_v60 = vpop.f32.mrf.mxu2  ;;  %v5234_v63 = vpop.f32.mrf.mxu0 }
 0x2d1   : > { %v5418_v25 = vpop.f32.mrf.mxu3  ;;  %v5432_v46 = vpack.c.bf16 %v5429_v58, %v5429_v58  ;;  %v5352_v62 = vadd.f32 %v5346_v60, %v5279_v57  ;;  %v5280_v51 = vpop.f32.mrf.mxu1 }
 0x2d3   : > { %8110 = vst.msk [vmem:[%s9163_s26 + $0xd0] sm:$0xf] %vm469_vm2, %v5432_v46  ;;  %v5424_v2 = vadd.f32 %v5418_v25, %v5352_v62 }
 0x2d5   : > { %v5427_v48 = vadd.f32 %v10481_v34, %v5424_v2 }
 0x2d7   : > { %v5430_v3 = vmax.f32 %v5427_v48, 0.0 }
 0x2d8   : > { %v5348_v7 = vpop.f32.mrf.mxu2  ;;  %v5519_v9 = vpop.f32.mrf.mxu0 }
 0x2d9   : > { %v5420_v52 = vpop.f32.mrf.mxu3  ;;  %v5433_v4 = vpack.c.bf16 %v5430_v3, %v5430_v3  ;;  %v5565_v55 = vpop.f32.mrf.mxu1 }
 0x2da   : > { %v5566_v10 = vadd.f32 %v5565_v55, %v5519_v9 }
 0x2db   : > { %8111 = vst.msk [vmem:[%s9163_s26 + $0xd4] sm:$0x3] %vm472_vm3, %v5433_v4 }
 0x2e0   : > { %v5633_v6 = vpop.f32.mrf.mxu2  ;;  %v5521_v14 = vpop.f32.mrf.mxu0 }
 0x2e1   : > { %v5705_v59 = vpop.f32.mrf.mxu3  ;;  %v5642_v13 = vadd.f32 %v5633_v6, %v5566_v10  ;;  %v5567_v56 = vpop.f32.mrf.mxu1 }
 0x2e2   : > { %v5568_v18 = vadd.f32 %v5567_v56, %v5521_v14 }
 0x2e3   : > { %v5714_v61 = vadd.f32 %v5705_v59, %v5642_v13 }
 0x2e5   : > { %v5717_v0 = vadd.f32 %v10481_v34, %v5714_v61 }
 0x2e7   : > { %v5720_v17 = vmax.f32 %v5717_v0, 0.0 }
 0x2e8   : > { %v5635_v20 = vpop.f32.mrf.mxu2  ;;  %v5524_v23 = vpop.f32.mrf.mxu0 }
 0x2e9   : > { %v5707_v1 = vpop.f32.mrf.mxu3  ;;  %v5723_v5 = vpack.c.bf16 %v5720_v17, %v5720_v17  ;;  %v5643_v22 = vadd.f32 %v5635_v20, %v5568_v18  ;;  %v5570_v8 = vpop.f32.mrf.mxu1 }
 0x2ea   : > { %v5571_v27 = vadd.f32 %v5570_v8, %v5524_v23 }
 0x2eb   : > { %8222 = vst.msk [vmem:[%s9163_s26 + $0xd8] sm:$0xf] %vm469_vm2, %v5723_v5  ;;  %v5715_v11 = vadd.f32 %v5707_v1, %v5643_v22 }
 0x2ed   : > { %v5718_v26 = vadd.f32 %v10481_v34, %v5715_v11 }
 0x2ef   : > { %v5721_v12 = vmax.f32 %v5718_v26, 0.0 }
 0x2f0   : > { %v5638_v15 = vpop.f32.mrf.mxu2  ;;  %v5526_v16 = vpop.f32.mrf.mxu0 }
 0x2f1   : > { %v5710_v29 = vpop.f32.mrf.mxu3  ;;  %v5724_v30 = vpack.c.bf16 %v5721_v12, %v5721_v12  ;;  %v5644_v47 = vadd.f32 %v5638_v15, %v5571_v27  ;;  %v5572_v31 = vpop.f32.mrf.mxu1 }
 0x2f3   : > { %8223 = vst.msk [vmem:[%s9163_s26 + $0xdc] sm:$0xf] %vm469_vm2, %v5724_v30  ;;  %v5716_v33 = vadd.f32 %v5710_v29, %v5644_v47 }
 0x2f5   : > { %v5719_v19 = vadd.f32 %v10481_v34, %v5716_v33 }
 0x2f7   : > { %v5722_v35 = vmax.f32 %v5719_v19, 0.0 }
 0x2f8   : > { %v5640_v37 = vpop.f32.mrf.mxu2  ;;  %v5811_v41 = vpop.f32.mrf.mxu0 }
 0x2f9   : > { %v5712_v24 = vpop.f32.mrf.mxu3  ;;  %v5725_v39 = vpack.c.bf16 %v5722_v35, %v5722_v35  ;;  %v5857_v38 = vpop.f32.mrf.mxu1 }
 0x2fa   : > { %v5858_v42 = vadd.f32 %v5857_v38, %v5811_v41 }
 0x2fb   : > { %8224 = vst.msk [vmem:[%s9163_s26 + $0xe0] sm:$0x3] %vm472_vm3, %v5725_v39 }
 0x300   : > { %v5925_v43 = vpop.f32.mrf.mxu2  ;;  %v5813_v45 = vpop.f32.mrf.mxu0 }
 0x301   : > { %v5997_v44 = vpop.f32.mrf.mxu3  ;;  %v5934_v28 = vadd.f32 %v5925_v43, %v5858_v42  ;;  %v5859_v32 = vpop.f32.mrf.mxu1 }
 0x302   : > { %v5860_v53 = vadd.f32 %v5859_v32, %v5813_v45 }
 0x303   : > { %v6006_v49 = vadd.f32 %v5997_v44, %v5934_v28 }
 0x305   : > { %v6009_v50 = vadd.f32 %v10481_v34, %v6006_v49 }
 0x307   : > { %v6012_v36 = vmax.f32 %v6009_v50, 0.0 }
 0x308   : > { %v5927_v54 = vpop.f32.mrf.mxu2  ;;  %v5816_v58 = vpop.f32.mrf.mxu0 }
 0x309   : > { %v5999_v21 = vpop.f32.mrf.mxu3  ;;  %v6015_v40 = vpack.c.bf16 %v6012_v36, %v6012_v36  ;;  %v5935_v57 = vadd.f32 %v5927_v54, %v5860_v53  ;;  %v5862_v60 = vpop.f32.mrf.mxu1 }
 0x30a   : > { %v5863_v62 = vadd.f32 %v5862_v60, %v5816_v58 }
 0x30b   : > { %8335 = vst.msk [vmem:[%s9163_s26 + $0xe4] sm:$0xf] %vm469_vm2, %v6015_v40  ;;  %v6007_v25 = vadd.f32 %v5999_v21, %v5935_v57 }
 0x30d   : > { %v6010_v46 = vadd.f32 %v10481_v34, %v6007_v25 }
 0x30f   : > { %v6013_v63 = vmax.f32 %v6010_v46, 0.0 }
 0x310   : > { %v5930_v51 = vpop.f32.mrf.mxu2  ;;  %v5818_v7 = vpop.f32.mrf.mxu0 }
 0x311   : > { %v6002_v2 = vpop.f32.mrf.mxu3  ;;  %v6016_v48 = vpack.c.bf16 %v6013_v63, %v6013_v63  ;;  %v5936_v3 = vadd.f32 %v5930_v51, %v5863_v62  ;;  %v5864_v52 = vpop.f32.mrf.mxu1 }
 0x313   : > { %8336 = vst.msk [vmem:[%s9163_s26 + $0xe8] sm:$0xf] %vm469_vm2, %v6016_v48  ;;  %v6008_v4 = vadd.f32 %v6002_v2, %v5936_v3 }
 0x315   : > { %v6011_v9 = vadd.f32 %v10481_v34, %v6008_v4 }
 0x317   : > { %v6014_v55 = vmax.f32 %v6011_v9, 0.0 }
 0x318   : > { %v5932_v10 = vpop.f32.mrf.mxu2 }
 0x319   : > { %v6004_v6 = vpop.f32.mrf.mxu3  ;;  %v6017_v59 = vpack.c.bf16 %v6014_v55, %v6014_v55 }
 0x31b   : > { %8337 = vst.msk [vmem:[%s9163_s26 + $0xec] sm:$0x3] %vm472_vm3, %v6017_v59 }
 0x31c PF: > { %s13_s12 = sadd.s32 1, %s8720_s12  }
 0x31d   : > { %p10_p4 = scmp.ge.s32.totalorder %s13_s12, 4  }
 0x31f   :  { %12 = sbr.rel (!%p10_p4) target bundleno = 1 (0x1), region = 104 }

</bundles_post_ra>
